<compile_context>
chip_gen: v6e
topology: v6e:2x2x1
jax: 0.10.0
libtpu: 0.0.40
codegen_flags: <defaults>
</compile_context>

<pallas_src>
import functools

import jax
import jax.numpy as jnp
from jax.experimental import pallas as pl
from jax.experimental.pallas import tpu as pltpu

Z_DIM = 128
BN_EPS = 1e-5
LEAKY_SLOPE = 0.01
LANE = 128
NUM_PARTS = 2                      # batch parts -> v7x megacore; harmless on v5e/v6e
FUSED_VMEM_GATE_BYTES = 18 << 20   # take the fully-fused path below this footprint


def _round_up(x, m):
    return ((x + m - 1) // m) * m


def _cdiv(a, b):
    return -(-a // b)


# --------------------------------------------------------------------------
# Fully fused path: whole decoder in one kernel (everything VMEM-resident)
# --------------------------------------------------------------------------

def _fused_decoder_kernel(x_ref, w1_ref, w2_ref, w3_ref, w4_ref, b4_ref,
                          o_ref, *, n_valid):
    b_pad = x_ref.shape[0]
    rows = jax.lax.broadcasted_iota(jnp.int32, (b_pad, 1), 0)
    valid = (rows < n_valid).astype(jnp.float32)
    inv_n = 1.0 / n_valid

    def bn_lrelu(h):
        # Padded batch rows of `h` are exactly zero (inputs masked below), so
        # plain column sums / n_valid give the true batch mean.  Two-pass
        # (shifted) variance avoids E[x^2]-E[x]^2 cancellation.
        mean = jnp.sum(h, axis=0, keepdims=True) * inv_n
        d = (h - mean) * valid
        var = jnp.sum(d * d, axis=0, keepdims=True) * inv_n
        hn = (h - mean) * jax.lax.rsqrt(var + BN_EPS)
        a = jnp.maximum(hn, LEAKY_SLOPE * hn)           # leaky_relu, one VPU op
        return (a * valid).astype(jnp.bfloat16)         # re-zero padded rows

    h1 = jnp.dot(x_ref[...], w1_ref[...], preferred_element_type=jnp.float32)
    h2 = jnp.dot(bn_lrelu(h1), w2_ref[...], preferred_element_type=jnp.float32)
    h3 = jnp.dot(bn_lrelu(h2), w3_ref[...], preferred_element_type=jnp.float32)
    o_ref[...] = (jnp.dot(bn_lrelu(h3), w4_ref[...],
                          preferred_element_type=jnp.float32) + b4_ref[...])


def _fused_decoder_call(x, w1, w2, w3, w4, b4, n_valid, vmem_bytes):
    bp = x.shape[0]
    f4 = w4.shape[1]
    kern = functools.partial(_fused_decoder_kernel, n_valid=n_valid)

    def full(a):
        return pl.BlockSpec(a.shape, lambda i: (0, 0))

    return pl.pallas_call(
        kern,
        out_shape=jax.ShapeDtypeStruct((bp, f4), jnp.float32),
        grid=(1,),
        in_specs=[full(x), full(w1), full(w2), full(w3), full(w4), full(b4)],
        out_specs=pl.BlockSpec((bp, f4), lambda i: (0, 0)),
        compiler_params=pltpu.CompilerParams(
            dimension_semantics=("arbitrary",),
            vmem_limit_bytes=vmem_bytes),
    )(x, w1, w2, w3, w4, b4)


def _fused_vmem_estimate(b_pad, k1, f1, f2, f3, f4):
    # bf16 input + (f32 pre-act + bf16 activation) per hidden layer + f32 out
    act = b_pad * (2 * k1 + 6 * (f1 + f2 + f3) + 4 * f4)
    wts = 2 * (k1 * f1 + f1 * f2 + f2 * f3 + f3 * f4) + 4 * f4
    return act + wts


# --------------------------------------------------------------------------
# Streaming path kernels (large B): batch-tiled pipeline, bf16 intermediates,
# per-part BN accumulators so the batch axis can be "parallel" (v7x megacore)
# --------------------------------------------------------------------------

def _matmul_stats_kernel(x_ref, w_ref, h_ref, sum_ref, ssq_ref):
    """h = x @ W (bf16 MXU, f32 acc); per-part feature sum / sum-of-squares.
    Padded batch rows of x are zero, so layer 1 needs no validity mask."""
    @pl.when(pl.program_id(1) == 0)
    def _init():
        sum_ref[...] = jnp.zeros_like(sum_ref)
        ssq_ref[...] = jnp.zeros_like(ssq_ref)

    h = jnp.dot(x_ref[...], w_ref[...], preferred_element_type=jnp.float32)
    h_ref[...] = h.astype(h_ref.dtype)          # bf16 store -> half HBM traffic
    sum_ref[...] += jnp.sum(h, axis=0, keepdims=True)[None, :, :]
    ssq_ref[...] += jnp.sum(h * h, axis=0, keepdims=True)[None, :, :]


def _bn_from_stats(h, sum_parts, ssq_parts, n_valid):
    """Training-mode BN (gamma=1, beta=0) + leaky_relu from per-part partial
    sums of shape (NUM_PARTS, 1, f); all math in f32."""
    inv_n = 1.0 / n_valid
    mean = jnp.sum(sum_parts, axis=0) * inv_n            # (1, f)
    ex2 = jnp.sum(ssq_parts, axis=0) * inv_n
    var = jnp.maximum(ex2 - mean * mean, 0.0)
    hn = (h - mean) * jax.lax.rsqrt(var + BN_EPS)
    return jnp.maximum(hn, LEAKY_SLOPE * hn)


def _bn_act_matmul_stats_kernel(h_ref, sum_ref, ssq_ref, w_ref,
                                o_ref, osum_ref, ossq_ref, *, n_valid, tile_b):
    p, i = pl.program_id(0), pl.program_id(1)

    @pl.when(i == 0)
    def _init():
        osum_ref[...] = jnp.zeros_like(osum_ref)
        ossq_ref[...] = jnp.zeros_like(ossq_ref)

    a = _bn_from_stats(h_ref[...].astype(jnp.float32),
                       sum_ref[...], ssq_ref[...], n_valid)
    # Zero padded batch rows of the (narrow) activation so they pollute
    # neither the matmul output nor the next layer's statistics.
    row0 = (p * pl.num_programs(1) + i) * tile_b
    rows = jax.lax.broadcasted_iota(jnp.int32, (tile_b, 1), 0) + row0
    a = a * (rows < n_valid).astype(jnp.float32)

    h = jnp.dot(a.astype(jnp.bfloat16), w_ref[...],
                preferred_element_type=jnp.float32)
    o_ref[...] = h.astype(o_ref.dtype)
    osum_ref[...] += jnp.sum(h, axis=0, keepdims=True)[None, :, :]
    ossq_ref[...] += jnp.sum(h * h, axis=0, keepdims=True)[None, :, :]


def _bn_act_matmul_bias_kernel(h_ref, sum_ref, ssq_ref, w_ref, b_ref, o_ref, *,
                               n_valid):
    a = _bn_from_stats(h_ref[...].astype(jnp.float32),
                       sum_ref[...], ssq_ref[...], n_valid)
    o_ref[...] = (jnp.dot(a.astype(jnp.bfloat16), w_ref[...],
                          preferred_element_type=jnp.float32) + b_ref[...])


def _stream_vmem_budget(tb, k, f):
    est = 2 * tb * k * 2                 # bf16 input tile, double-buffered
    est += 2 * tb * f * 2                # bf16/f32 output tile, double-buffered
    est += 2 * tb * f * 4                # in-kernel f32 matmul result headroom
    est += 2 * k * f * 2                 # resident bf16 weights
    est += 8 * NUM_PARTS * (k + f) * 4   # stats rows
    est = int(est * 1.25) + (4 << 20)
    return max(32 << 20, min(est, 48 << 20))   # <=48 MiB: safe on v7x (64 MiB)


def _matmul_stats_call(x, w, tb, tpp, vmem_bytes):
    bp, k = x.shape
    f = w.shape[1]
    return pl.pallas_call(
        _matmul_stats_kernel,
        out_shape=(jax.ShapeDtypeStruct((bp, f), jnp.bfloat16),
                   jax.ShapeDtypeStruct((NUM_PARTS, 1, f), jnp.float32),
                   jax.ShapeDtypeStruct((NUM_PARTS, 1, f), jnp.float32)),
        grid=(NUM_PARTS, tpp),
        in_specs=[pl.BlockSpec((tb, k), lambda p, i: (p * tpp + i, 0)),
                  pl.BlockSpec((k, f), lambda p, i: (0, 0))],          # resident W
        out_specs=(pl.BlockSpec((tb, f), lambda p, i: (p * tpp + i, 0)),
                   pl.BlockSpec((1, 1, f), lambda p, i: (p, 0, 0)),    # per-part acc
                   pl.BlockSpec((1, 1, f), lambda p, i: (p, 0, 0))),
        compiler_params=pltpu.CompilerParams(
            dimension_semantics=("parallel", "arbitrary"),
            vmem_limit_bytes=vmem_bytes),
    )(x, w)


def _bn_act_matmul_stats_call(h, s, q, w, tb, tpp, n_valid, vmem_bytes):
    bp, k = h.shape
    f = w.shape[1]
    kern = functools.partial(_bn_act_matmul_stats_kernel,
                             n_valid=n_valid, tile_b=tb)
    return pl.pallas_call(
        kern,
        out_shape=(jax.ShapeDtypeStruct((bp, f), jnp.bfloat16),
                   jax.ShapeDtypeStruct((NUM_PARTS, 1, f), jnp.float32),
                   jax.ShapeDtypeStruct((NUM_PARTS, 1, f), jnp.float32)),
        grid=(NUM_PARTS, tpp),
        in_specs=[pl.BlockSpec((tb, k), lambda p, i: (p * tpp + i, 0)),
                  pl.BlockSpec((NUM_PARTS, 1, k), lambda p, i: (0, 0, 0)),
                  pl.BlockSpec((NUM_PARTS, 1, k), lambda p, i: (0, 0, 0)),
                  pl.BlockSpec((k, f), lambda p, i: (0, 0))],
        out_specs=(pl.BlockSpec((tb, f), lambda p, i: (p * tpp + i, 0)),
                   pl.BlockSpec((1, 1, f), lambda p, i: (p, 0, 0)),
                   pl.BlockSpec((1, 1, f), lambda p, i: (p, 0, 0))),
        compiler_params=pltpu.CompilerParams(
            dimension_semantics=("parallel", "arbitrary"),
            vmem_limit_bytes=vmem_bytes),
    )(h, s, q, w)


def _bn_act_matmul_bias_call(h, s, q, w, b, tb, tpp, n_valid, vmem_bytes):
    bp, k = h.shape
    f = w.shape[1]
    kern = functools.partial(_bn_act_matmul_bias_kernel, n_valid=n_valid)
    return pl.pallas_call(
        kern,
        out_shape=jax.ShapeDtypeStruct((bp, f), jnp.float32),
        grid=(NUM_PARTS, tpp),
        in_specs=[pl.BlockSpec((tb, k), lambda p, i: (p * tpp + i, 0)),
                  pl.BlockSpec((NUM_PARTS, 1, k), lambda p, i: (0, 0, 0)),
                  pl.BlockSpec((NUM_PARTS, 1, k), lambda p, i: (0, 0, 0)),
                  pl.BlockSpec((k, f), lambda p, i: (0, 0)),
                  pl.BlockSpec((1, f), lambda p, i: (0, 0))],
        out_specs=pl.BlockSpec((tb, f), lambda p, i: (p * tpp + i, 0)),
        # No cross-tile accumulator -> both grid axes can shard across cores.
        compiler_params=pltpu.CompilerParams(
            dimension_semantics=("parallel", "parallel"),
            vmem_limit_bytes=vmem_bytes),
    )(h, s, q, w, b)


# --------------------------------------------------------------------------
# Parameters & forward
# --------------------------------------------------------------------------

def init_decoder_params(key, ef_dim, num_classes, p_dim, bias_scale=0.0):
    """Xavier-uniform weights, biases (PyTorch init -> 0; bias_scale>0 to
    exercise the bias path).  Weights stored pre-transposed as [in, out]."""
    d_in = Z_DIM + num_classes
    dims = [d_in, ef_dim * 16, ef_dim * 32, ef_dim * 64, p_dim * 4]
    params = []
    keys = jax.random.split(key, 8)
    for n, (fi, fo) in enumerate(zip(dims[:-1], dims[1:])):
        bound = (6.0 / (fi + fo)) ** 0.5
        w = jax.random.uniform(keys[2 * n], (fi, fo), jnp.float32,
                               minval=-bound, maxval=bound)
        b = bias_scale * jax.random.normal(keys[2 * n + 1], (1, fo), jnp.float32)
        params.append((w, b))
    return params


def decoder_forward(zs_labels, params, p_dim, *, batch_tile=None,
                    force_streaming=False):
    """zs_labels: [B, Z_DIM + num_classes] -> [B, 4, p_dim]."""
    B, d_in = zs_labels.shape
    (w1, _b1), (w2, _b2), (w3, _b3), (w4, b4) = params
    # b1..b3 cancel exactly under training-mode BatchNorm (beta=0): dropped.
    # TODO(synk): BatchNorm1d running_mean/var buffer updates (training side
    # effect) are not reproduced; only the forward output is computed.
    out_dim = p_dim * 4

    k1 = _round_up(d_in, LANE)
    f1 = _round_up(w1.shape[1], LANE)
    f2 = _round_up(w2.shape[1], LANE)
    f3 = _round_up(w3.shape[1], LANE)
    f4 = _round_up(out_dim, LANE)

    def pad2(a, r, c):
        return jnp.pad(a, ((0, r - a.shape[0]), (0, c - a.shape[1])))

    # Lane-dense zero padding (exact) + bf16 weights for the MXU.
    w1p = pad2(w1, k1, f1).astype(jnp.bfloat16)
    w2p = pad2(w2, f1, f2).astype(jnp.bfloat16)
    w3p = pad2(w3, f2, f3).astype(jnp.bfloat16)
    w4p = pad2(w4, f3, f4).astype(jnp.bfloat16)
    b4p = pad2(b4.astype(jnp.float32), 1, f4)

    # ----- fully fused path: one pallas_call, everything VMEM-resident -----
    b_pad_f = _round_up(B, 16)                   # 16: bf16 sublane packing
    est = _fused_vmem_estimate(b_pad_f, k1, f1, f2, f3, f4)
    if not force_streaming and est <= FUSED_VMEM_GATE_BYTES:
        x = pad2(zs_labels.astype(jnp.float32), b_pad_f, k1).astype(jnp.bfloat16)
        vmem = max(32 << 20, min(2 * est + (8 << 20), 48 << 20))
        out = _fused_decoder_call(x, w1p, w2p, w3p, w4p, b4p, B, vmem)
        return out[:B, :out_dim].reshape(B, 4, p_dim)

    # ----- streaming path: batch-tiled pipeline, bf16 intermediates --------
    if batch_tile is None:
        batch_tile = 1024 if B >= 4096 else 512
    tb = min(batch_tile, _round_up(_cdiv(B, NUM_PARTS), 16))
    tb = _round_up(tb, 16)
    b_pad = _round_up(B, NUM_PARTS * tb)
    tpp = b_pad // (NUM_PARTS * tb)              # batch tiles per part

    x = pad2(zs_labels.astype(jnp.float32), b_pad, k1).astype(jnp.bfloat16)

    h1, s1, q1 = _matmul_stats_call(x, w1p, tb, tpp,
                                    _stream_vmem_budget(tb, k1, f1))
    h2, s2, q2 = _bn_act_matmul_stats_call(h1, s1, q1, w2p, tb, tpp, B,
                                           _stream_vmem_budget(tb, f1, f2))
    h3, s3, q3 = _bn_act_matmul_stats_call(h2, s2, q2, w3p, tb, tpp, B,
                                           _stream_vmem_budget(tb, f2, f3))
    out = _bn_act_matmul_bias_call(h3, s3, q3, w4p, b4p, tb, tpp, B,
                                   _stream_vmem_budget(tb, f3, f4))
    return out[:B, :out_dim].reshape(B, 4, p_dim)


# --------------------------------------------------------------------------
# Pure-JAX references
# --------------------------------------------------------------------------

def _bn_lrelu_ref(h):
    mean = jnp.mean(h, axis=0, keepdims=True)
    var = jnp.mean(jnp.square(h - mean), axis=0, keepdims=True)  # biased var
    hn = (h - mean) * jax.lax.rsqrt(var + BN_EPS)
    return jnp.where(hn >= 0.0, hn, LEAKY_SLOPE * hn)


def decoder_reference(zs_labels, params, p_dim, *, simulate_bf16=False):
    h = zs_labels.astype(jnp.float32)
    for i, (w, b) in enumerate(params):
        hd, wd = h, w
        if simulate_bf16:
            hd = h.astype(jnp.bfloat16).astype(jnp.float32)
            wd = w.astype(jnp.bfloat16).astype(jnp.float32)
        h = jnp.dot(hd, wd, precision=jax.lax.Precision.HIGHEST) + b
        if i < 3:
            h = _bn_lrelu_ref(h)
    return h.reshape(zs_labels.shape[0], 4, p_dim)


# --------------------------------------------------------------------------
# Demo / self-check
# --------------------------------------------------------------------------

if __name__ == "__main__":
    # Small shapes consistent with the module; B=300 takes the fused path and
    # exercises the padded-row masking; the streaming path is also exercised
    # explicitly below with small tiles (grid 2x2) to cover the per-part BN
    # accumulators and bf16 intermediates.
    B = 300
    ef_dim = 8
    num_classes = 4
    p_dim = 16

    key = jax.random.PRNGKey(0)
    k_x, k_p = jax.random.split(key)

    zs_labels = jax.random.normal(k_x, (B, Z_DIM + num_classes), jnp.float32)
    # bias_scale>0 so b4 (and the BN-cancellation of b1..b3) is actually tested.
    params = init_decoder_params(k_p, ef_dim, num_classes, p_dim, bias_scale=0.05)

    # --- fully fused single-kernel path (default for small/medium B) ---
    fwd_fused = jax.jit(functools.partial(decoder_forward, p_dim=p_dim))
    out_fused = jax.block_until_ready(fwd_fused(zs_labels, params))
    assert out_fused.shape == (B, 4, p_dim), out_fused.shape
    assert bool(jnp.all(jnp.isfinite(out_fused))), "non-finite output (fused)"

    # Strict check vs a reference that applies the same bf16 rounding at the
    # matmul inputs (tests the kernel's BN / masking / fusion logic).
    ref_bf16 = decoder_reference(zs_labels, params, p_dim, simulate_bf16=True)
    assert jnp.allclose(out_fused, ref_bf16, atol=1e-2, rtol=1e-2), (
        "fused mismatch vs bf16-sim reference: "
        f"max abs diff {float(jnp.max(jnp.abs(out_fused - ref_bf16)))}")

    # Loose check vs the full-f32 reference (bf16 MXU inputs cost a little
    # precision, as accepted in the perf review).
    ref_f32 = decoder_reference(zs_labels, params, p_dim, simulate_bf16=False)
    assert jnp.allclose(out_fused, ref_f32, atol=1e-1, rtol=1e-1), (
        "fused mismatch vs f32 reference: "
        f"max abs diff {float(jnp.max(jnp.abs(out_fused - ref_f32)))}")

    # --- streaming (batch-tiled) path: forced with small tiles so the
    #     per-part accumulators + padded-row masking are covered ---
    fwd_stream = jax.jit(functools.partial(decoder_forward, p_dim=p_dim,
                                           force_streaming=True,
                                           batch_tile=128))
    out_stream = jax.block_until_ready(fwd_stream(zs_labels, params))
    assert out_stream.shape == (B, 4, p_dim), out_stream.shape
    assert bool(jnp.all(jnp.isfinite(out_stream))), "non-finite output (stream)"
    assert jnp.allclose(out_stream, out_fused, atol=1e-1, rtol=1e-1), (
        "streaming mismatch vs fused kernel: "
        f"max abs diff {float(jnp.max(jnp.abs(out_stream - out_fused)))}")

    print("KERNEL_OK")
</pallas_src>

<mosaic_0001>
module attributes {stable_mosaic.version = 11 : i64} {
  func.func @_fused_decoder_kernel(%arg0: i32, %arg1: memref<304x256xbf16, #tpu.memory_space<vmem>>, %arg2: memref<256x128xbf16, #tpu.memory_space<vmem>>, %arg3: memref<128x256xbf16, #tpu.memory_space<vmem>>, %arg4: memref<256x512xbf16, #tpu.memory_space<vmem>>, %arg5: memref<512x128xbf16, #tpu.memory_space<vmem>>, %arg6: memref<1x128xf32, #tpu.memory_space<vmem>>, %arg7: memref<304x128xf32, #tpu.memory_space<vmem>>) attributes {dimension_semantics = [#tpu.dimension_semantics<arbitrary>], iteration_bounds = array<i64: 1>, scalar_prefetch = 0 : i64, scratch_operands = 0 : i64, tpu.core_type = #tpu.core_type<tc>, window_params = [{pipeline_mode = #tpu.pipeline_mode<synchronous>, transform_indices = @transform_0, window_bounds = array<i64: 304, 256>}, {pipeline_mode = #tpu.pipeline_mode<synchronous>, transform_indices = @transform_1, window_bounds = array<i64: 256, 128>}, {pipeline_mode = #tpu.pipeline_mode<synchronous>, transform_indices = @transform_2, window_bounds = array<i64: 128, 256>}, {pipeline_mode = #tpu.pipeline_mode<synchronous>, transform_indices = @transform_3, window_bounds = array<i64: 256, 512>}, {pipeline_mode = #tpu.pipeline_mode<synchronous>, transform_indices = @transform_4, window_bounds = array<i64: 512, 128>}, {pipeline_mode = #tpu.pipeline_mode<synchronous>, transform_indices = @transform_5, window_bounds = array<i64: 1, 128>}, {pipeline_mode = #tpu.pipeline_mode<synchronous>, transform_indices = @transform_6, window_bounds = array<i64: 304, 128>}]} {
    %0 = tpu.iota {dimensions = array<i32: 0>} : vector<304x1xi32>
    %c300_i32 = arith.constant 300 : i32
    %1 = vector.broadcast %c300_i32 : i32 to vector<304x1xi32>
    %2 = arith.cmpi slt, %0, %1 : vector<304x1xi32>
    %3 = arith.extui %2 : vector<304x1xi1> to vector<304x1xi32>
    %4 = arith.sitofp %3 : vector<304x1xi32> to vector<304x1xf32>
    %c0 = arith.constant 0 : index
    %c0_0 = arith.constant 0 : index
    %5 = vector.load %arg1[%c0, %c0_0] : memref<304x256xbf16, #tpu.memory_space<vmem>>, vector<304x256xbf16>
    %c0_1 = arith.constant 0 : index
    %c0_2 = arith.constant 0 : index
    %6 = vector.load %arg2[%c0_1, %c0_2] : memref<256x128xbf16, #tpu.memory_space<vmem>>, vector<256x128xbf16>
    %cst = arith.constant dense<0.000000e+00> : vector<304x128xf32>
    %7 = tpu.matmul %5, %6, %cst {dimension_numbers = #tpu.dot_dimension_numbers<[1], [0], [0], [1], [0, 0, 1, 1], [], []>} : vector<304x256xbf16>, vector<256x128xbf16>, vector<304x128xf32> -> vector<304x128xf32>
    %cst_3 = arith.constant dense<0.000000e+00> : vector<128xf32>
    %8 = vector.multi_reduction <add>, %7, %cst_3 [0] : vector<304x128xf32> to vector<128xf32>
    %9 = vector.shape_cast %8 : vector<128xf32> to vector<1x128xf32>
    %cst_4 = arith.constant 0.00333333341 : f32
    %10 = vector.broadcast %cst_4 : f32 to vector<1x128xf32>
    %11 = arith.mulf %9, %10 : vector<1x128xf32>
    %12 = vector.broadcast %11 : vector<1x128xf32> to vector<304x128xf32>
    %13 = arith.subf %7, %12 : vector<304x128xf32>
    %14 = vector.broadcast %4 : vector<304x1xf32> to vector<304x128xf32>
    %15 = arith.mulf %13, %14 : vector<304x128xf32>
    %16 = arith.mulf %15, %15 : vector<304x128xf32>
    %cst_5 = arith.constant dense<0.000000e+00> : vector<128xf32>
    %17 = vector.multi_reduction <add>, %16, %cst_5 [0] : vector<304x128xf32> to vector<128xf32>
    %18 = vector.shape_cast %17 : vector<128xf32> to vector<1x128xf32>
    %cst_6 = arith.constant 0.00333333341 : f32
    %19 = vector.broadcast %cst_6 : f32 to vector<1x128xf32>
    %20 = arith.mulf %18, %19 : vector<1x128xf32>
    %21 = vector.broadcast %11 : vector<1x128xf32> to vector<304x128xf32>
    %22 = arith.subf %7, %21 : vector<304x128xf32>
    %cst_7 = arith.constant 9.99999974E-6 : f32
    %23 = vector.broadcast %cst_7 : f32 to vector<1x128xf32>
    %24 = arith.addf %20, %23 : vector<1x128xf32>
    %25 = math.rsqrt %24 : vector<1x128xf32>
    %26 = vector.broadcast %25 : vector<1x128xf32> to vector<304x128xf32>
    %27 = arith.mulf %22, %26 : vector<304x128xf32>
    %cst_8 = arith.constant 0.00999999977 : f32
    %28 = vector.broadcast %cst_8 : f32 to vector<304x128xf32>
    %29 = arith.mulf %28, %27 : vector<304x128xf32>
    %30 = arith.maximumf %27, %29 : vector<304x128xf32>
    %31 = vector.broadcast %4 : vector<304x1xf32> to vector<304x128xf32>
    %32 = arith.mulf %30, %31 : vector<304x128xf32>
    %33 = arith.truncf %32 : vector<304x128xf32> to vector<304x128xbf16>
    %c0_9 = arith.constant 0 : index
    %c0_10 = arith.constant 0 : index
    %34 = vector.load %arg3[%c0_9, %c0_10] : memref<128x256xbf16, #tpu.memory_space<vmem>>, vector<128x256xbf16>
    %cst_11 = arith.constant dense<0.000000e+00> : vector<304x256xf32>
    %35 = tpu.matmul %33, %34, %cst_11 {dimension_numbers = #tpu.dot_dimension_numbers<[1], [0], [0], [1], [0, 0, 1, 1], [], []>} : vector<304x128xbf16>, vector<128x256xbf16>, vector<304x256xf32> -> vector<304x256xf32>
    %cst_12 = arith.constant dense<0.000000e+00> : vector<256xf32>
    %36 = vector.multi_reduction <add>, %35, %cst_12 [0] : vector<304x256xf32> to vector<256xf32>
    %37 = vector.shape_cast %36 : vector<256xf32> to vector<1x256xf32>
    %cst_13 = arith.constant 0.00333333341 : f32
    %38 = vector.broadcast %cst_13 : f32 to vector<1x256xf32>
    %39 = arith.mulf %37, %38 : vector<1x256xf32>
    %40 = vector.broadcast %39 : vector<1x256xf32> to vector<304x256xf32>
    %41 = arith.subf %35, %40 : vector<304x256xf32>
    %42 = vector.broadcast %4 : vector<304x1xf32> to vector<304x256xf32>
    %43 = arith.mulf %41, %42 : vector<304x256xf32>
    %44 = arith.mulf %43, %43 : vector<304x256xf32>
    %cst_14 = arith.constant dense<0.000000e+00> : vector<256xf32>
    %45 = vector.multi_reduction <add>, %44, %cst_14 [0] : vector<304x256xf32> to vector<256xf32>
    %46 = vector.shape_cast %45 : vector<256xf32> to vector<1x256xf32>
    %cst_15 = arith.constant 0.00333333341 : f32
    %47 = vector.broadcast %cst_15 : f32 to vector<1x256xf32>
    %48 = arith.mulf %46, %47 : vector<1x256xf32>
    %49 = vector.broadcast %39 : vector<1x256xf32> to vector<304x256xf32>
    %50 = arith.subf %35, %49 : vector<304x256xf32>
    %cst_16 = arith.constant 9.99999974E-6 : f32
    %51 = vector.broadcast %cst_16 : f32 to vector<1x256xf32>
    %52 = arith.addf %48, %51 : vector<1x256xf32>
    %53 = math.rsqrt %52 : vector<1x256xf32>
    %54 = vector.broadcast %53 : vector<1x256xf32> to vector<304x256xf32>
    %55 = arith.mulf %50, %54 : vector<304x256xf32>
    %cst_17 = arith.constant 0.00999999977 : f32
    %56 = vector.broadcast %cst_17 : f32 to vector<304x256xf32>
    %57 = arith.mulf %56, %55 : vector<304x256xf32>
    %58 = arith.maximumf %55, %57 : vector<304x256xf32>
    %59 = vector.broadcast %4 : vector<304x1xf32> to vector<304x256xf32>
    %60 = arith.mulf %58, %59 : vector<304x256xf32>
    %61 = arith.truncf %60 : vector<304x256xf32> to vector<304x256xbf16>
    %c0_18 = arith.constant 0 : index
    %c0_19 = arith.constant 0 : index
    %62 = vector.load %arg4[%c0_18, %c0_19] : memref<256x512xbf16, #tpu.memory_space<vmem>>, vector<256x512xbf16>
    %cst_20 = arith.constant dense<0.000000e+00> : vector<304x512xf32>
    %63 = tpu.matmul %61, %62, %cst_20 {dimension_numbers = #tpu.dot_dimension_numbers<[1], [0], [0], [1], [0, 0, 1, 1], [], []>} : vector<304x256xbf16>, vector<256x512xbf16>, vector<304x512xf32> -> vector<304x512xf32>
    %cst_21 = arith.constant dense<0.000000e+00> : vector<512xf32>
    %64 = vector.multi_reduction <add>, %63, %cst_21 [0] : vector<304x512xf32> to vector<512xf32>
    %65 = vector.shape_cast %64 : vector<512xf32> to vector<1x512xf32>
    %cst_22 = arith.constant 0.00333333341 : f32
    %66 = vector.broadcast %cst_22 : f32 to vector<1x512xf32>
    %67 = arith.mulf %65, %66 : vector<1x512xf32>
    %68 = vector.broadcast %67 : vector<1x512xf32> to vector<304x512xf32>
    %69 = arith.subf %63, %68 : vector<304x512xf32>
    %70 = vector.broadcast %4 : vector<304x1xf32> to vector<304x512xf32>
    %71 = arith.mulf %69, %70 : vector<304x512xf32>
    %72 = arith.mulf %71, %71 : vector<304x512xf32>
    %cst_23 = arith.constant dense<0.000000e+00> : vector<512xf32>
    %73 = vector.multi_reduction <add>, %72, %cst_23 [0] : vector<304x512xf32> to vector<512xf32>
    %74 = vector.shape_cast %73 : vector<512xf32> to vector<1x512xf32>
    %cst_24 = arith.constant 0.00333333341 : f32
    %75 = vector.broadcast %cst_24 : f32 to vector<1x512xf32>
    %76 = arith.mulf %74, %75 : vector<1x512xf32>
    %77 = vector.broadcast %67 : vector<1x512xf32> to vector<304x512xf32>
    %78 = arith.subf %63, %77 : vector<304x512xf32>
    %cst_25 = arith.constant 9.99999974E-6 : f32
    %79 = vector.broadcast %cst_25 : f32 to vector<1x512xf32>
    %80 = arith.addf %76, %79 : vector<1x512xf32>
    %81 = math.rsqrt %80 : vector<1x512xf32>
    %82 = vector.broadcast %81 : vector<1x512xf32> to vector<304x512xf32>
    %83 = arith.mulf %78, %82 : vector<304x512xf32>
    %cst_26 = arith.constant 0.00999999977 : f32
    %84 = vector.broadcast %cst_26 : f32 to vector<304x512xf32>
    %85 = arith.mulf %84, %83 : vector<304x512xf32>
    %86 = arith.maximumf %83, %85 : vector<304x512xf32>
    %87 = vector.broadcast %4 : vector<304x1xf32> to vector<304x512xf32>
    %88 = arith.mulf %86, %87 : vector<304x512xf32>
    %89 = arith.truncf %88 : vector<304x512xf32> to vector<304x512xbf16>
    %c0_27 = arith.constant 0 : index
    %c0_28 = arith.constant 0 : index
    %90 = vector.load %arg5[%c0_27, %c0_28] : memref<512x128xbf16, #tpu.memory_space<vmem>>, vector<512x128xbf16>
    %cst_29 = arith.constant dense<0.000000e+00> : vector<304x128xf32>
    %91 = tpu.matmul %89, %90, %cst_29 {dimension_numbers = #tpu.dot_dimension_numbers<[1], [0], [0], [1], [0, 0, 1, 1], [], []>} : vector<304x512xbf16>, vector<512x128xbf16>, vector<304x128xf32> -> vector<304x128xf32>
    %c0_30 = arith.constant 0 : index
    %c0_31 = arith.constant 0 : index
    %92 = vector.load %arg6[%c0_30, %c0_31] : memref<1x128xf32, #tpu.memory_space<vmem>>, vector<1x128xf32>
    %93 = vector.broadcast %92 : vector<1x128xf32> to vector<304x128xf32>
    %94 = arith.addf %91, %93 : vector<304x128xf32>
    %c0_32 = arith.constant 0 : index
    %c0_33 = arith.constant 0 : index
    %95 = vector.load %arg7[%c0_32, %c0_33] : memref<304x128xf32, #tpu.memory_space<vmem>>, vector<304x128xf32>
    tpu.vector_store %arg7[%c0_32, %c0_33], %94 {strides = array<i32>} : memref<304x128xf32, #tpu.memory_space<vmem>>, vector<304x128xf32>,
    return
  }
  func.func @transform_0(%arg0: i32) -> (i32, i32) {
    %c0_i32 = arith.constant 0 : i32
    %c0_i32_0 = arith.constant 0 : i32
    %c0_i32_1 = arith.constant 0 : i32
    return %c0_i32, %c0_i32_0 : i32, i32
  }
  func.func @transform_1(%arg0: i32) -> (i32, i32) {
    %c0_i32 = arith.constant 0 : i32
    %c0_i32_0 = arith.constant 0 : i32
    %c0_i32_1 = arith.constant 0 : i32
    return %c0_i32, %c0_i32_0 : i32, i32
  }
  func.func @transform_2(%arg0: i32) -> (i32, i32) {
    %c0_i32 = arith.constant 0 : i32
    %c0_i32_0 = arith.constant 0 : i32
    %c0_i32_1 = arith.constant 0 : i32
    return %c0_i32, %c0_i32_0 : i32, i32
  }
  func.func @transform_3(%arg0: i32) -> (i32, i32) {
    %c0_i32 = arith.constant 0 : i32
    %c0_i32_0 = arith.constant 0 : i32
    %c0_i32_1 = arith.constant 0 : i32
    return %c0_i32, %c0_i32_0 : i32, i32
  }
  func.func @transform_4(%arg0: i32) -> (i32, i32) {
    %c0_i32 = arith.constant 0 : i32
    %c0_i32_0 = arith.constant 0 : i32
    %c0_i32_1 = arith.constant 0 : i32
    return %c0_i32, %c0_i32_0 : i32, i32
  }
  func.func @transform_5(%arg0: i32) -> (i32, i32) {
    %c0_i32 = arith.constant 0 : i32
    %c0_i32_0 = arith.constant 0 : i32
    %c0_i32_1 = arith.constant 0 : i32
    return %c0_i32, %c0_i32_0 : i32, i32
  }
  func.func @transform_6(%arg0: i32) -> (i32, i32) {
    %c0_i32 = arith.constant 0 : i32
    %c0_i32_0 = arith.constant 0 : i32
    %c0_i32_1 = arith.constant 0 : i32
    return %c0_i32, %c0_i32_0 : i32, i32
  }
}

</mosaic_0001>

<bundles_post_ra>
// kernel: decoder_forward.1
= control target key start
LH: loop header
LB: loop body
LE: loop exit
PB: predicated region body
PF: predicated region fallthrough
CT: control target
= control target key end

     0   :  { %v9453_v0 = vmov 0   ;;  %s9446_s1 = inlined_call_operand.vmem [shape: bf16[256,128], index: 1, kind: input, shape index: {}]   ;;  %s9447_s0 = inlined_call_operand.vmem [shape: bf16[304,256], index: 0, kind: input, shape index: {}]   ;;  %s9448_s2 = inlined_call_operand.vmem [shape: bf16[128,256], index: 2, kind: input, shape index: {}]   ;;  %s9449_s3 = inlined_call_operand.vmem [shape: bf16[256,512], index: 3, kind: input, shape index: {}]   ;;  %s9450_s4 = inlined_call_operand.vmem [shape: bf16[512,128], index: 4, kind: input, shape index: {}]   ;;  %s9451_s5 = inlined_call_operand.vmem [shape: f32[1,128], index: 5, kind: input, shape index: {}]   ;;  %s9452_s6 = inlined_call_operand.vmem [shape: f32[304,128], index: 6, kind: output, shape index: {}]  }
   0x1   :  { %533 = vmatprep.subr.bf16.mxu0 %v9453_v0  ;;  %v5369_v1 = vld [vmem:[%s9446_s1 + $0x38] sm:$0xff]   ;;  %1221 = vmatprep.mubr.bf16.mxu1 %v9453_v0  ;;  %v5370_v2 = vld [vmem:[%s9446_s1 + $0x30] sm:$0xff]   ;;  %v5371_v3 = vld [vmem:[%s9446_s1 + $0x28] sm:$0xff]  }
   0x2   :  { %534 = vmatpush1.bf16.msra.mxu0 %v5369_v1  ;;  %v5372_v4 = vld [vmem:[%s9446_s1 + $0x20] sm:$0xff]   ;;  %v5373_v5 = vld [vmem:[%s9446_s1 + $0x18] sm:$0xff]   ;;  %v5374_v7 = vld [vmem:[%s9446_s1 + $0x10] sm:$0xff]  }
   0x3   :  { %535 = vmatprep.subr.bf16.mxu0 %v9453_v0  ;;  %v5387_v6 = vld [vmem:[%s9447_s0 + $0x4] ss:$8 sps:$4 sm:$0xff]   ;;  %v5377_v10 = vld [vmem:[%s9446_s1 + $0x78] sm:$0xff]   ;;  %v5378_v11 = vld [vmem:[%s9446_s1 + $0x70] sm:$0xff]  }
   0x4   :  { %565 = vmatprep.mubr.bf16.mxu0 %v5387_v6  ;;  %v5375_v8 = vld [vmem:[%s9446_s1 + $0x8] sm:$0xff]   ;;  %v5376_v9 = vld [vmem:[%s9446_s1] sm:$0xff]   ;;  %v5381_v14 = vld [vmem:[%s9446_s1 + $0x58] sm:$0xff]  }
   0x5   :  { %v5379_v12 = vld [vmem:[%s9446_s1 + $0x68] sm:$0xff]   ;;  %v5380_v13 = vld [vmem:[%s9446_s1 + $0x60] sm:$0xff]   ;;  %v5382_v15 = vld [vmem:[%s9446_s1 + $0x50] sm:$0xff]  }
   0x6   :  { %536 = vmatpush1.bf16.msra.mxu0 %v5370_v2  ;;  %v5383_v16 = vld [vmem:[%s9446_s1 + $0x48] sm:$0xff]   ;;  %v5384_v17 = vld [vmem:[%s9446_s1 + $0x40] sm:$0xff]   ;;  %v5388_v19 = vld [vmem:[%s9447_s0 + $0x14] ss:$8 sps:$4 sm:$0xff]  }
   0x7   :  { %537 = vmatprep.subr.bf16.mxu0 %v9453_v0  ;;  %v5385_v18 = vld [vmem:[%s9447_s0] ss:$8 sps:$4 sm:$0xff]   ;;  %v5390_v20 = vld [vmem:[%s9447_s0 + $0x10] ss:$8 sps:$4 sm:$0xff]   ;;  %v5391_v21 = vld [vmem:[%s9447_s0 + $0x24] ss:$8 sps:$4 sm:$0xff]  }
   0x8   :  { %v5393_v22 = vld [vmem:[%s9447_s0 + $0x20] ss:$8 sps:$4 sm:$0xff]   ;;  %v5394_v23 = vld [vmem:[%s9447_s0 + $0x34] ss:$8 sps:$4 sm:$0xff]   ;;  %v5396_v24 = vld [vmem:[%s9447_s0 + $0x30] ss:$8 sps:$4 sm:$0xff]  }
   0x9   :  { %v5397_v25 = vld [vmem:[%s9447_s0 + $0x44] ss:$8 sps:$4 sm:$0xff]   ;;  %v5399_v26 = vld [vmem:[%s9447_s0 + $0x40] ss:$8 sps:$4 sm:$0xff]   ;;  %v5400_v27 = vld [vmem:[%s9447_s0 + $0x54] ss:$8 sps:$4 sm:$0xff]  }
   0xa   :  { %538 = vmatpush1.bf16.msra.mxu0 %v5371_v3  ;;  %v5402_v28 = vld [vmem:[%s9447_s0 + $0x50] ss:$8 sps:$4 sm:$0xff]   ;;  %v5403_v29 = vld [vmem:[%s9447_s0 + $0x64] ss:$8 sps:$4 sm:$0xff]   ;;  %v5405_v30 = vld [vmem:[%s9447_s0 + $0x60] ss:$8 sps:$4 sm:$0xff]  }
   0xb   :  { %539 = vmatprep.subr.bf16.mxu0 %v9453_v0  ;;  %v5406_v31 = vld [vmem:[%s9447_s0 + $0x74] ss:$8 sps:$4 sm:$0xff]   ;;  %v5408_v32 = vld [vmem:[%s9447_s0 + $0x70] ss:$8 sps:$4 sm:$0xff]   ;;  %v5409_v33 = vld [vmem:[%s9447_s0 + $0x84] ss:$8 sps:$4 sm:$0xff]  }
   0xc   :  { %v5411_v34 = vld [vmem:[%s9447_s0 + $0x80] ss:$8 sps:$4 sm:$0xff]   ;;  %v5412_v35 = vld [vmem:[%s9447_s0 + $0x94] ss:$8 sps:$4 sm:$0xff]   ;;  %v5414_v36 = vld [vmem:[%s9447_s0 + $0x90] ss:$8 sps:$4 sm:$0xff]  }
   0xd   :  { %v5415_v37 = vld [vmem:[%s9447_s0 + $0xa4] ss:$8 sps:$4 sm:$0xff]   ;;  %v5417_v38 = vld [vmem:[%s9447_s0 + $0xa0] ss:$8 sps:$4 sm:$0xff]   ;;  %v5418_v39 = vld [vmem:[%s9447_s0 + $0xb4] ss:$8 sps:$4 sm:$0xff]  }
   0xe   :  { %540 = vmatpush1.bf16.msra.mxu0 %v5372_v4  ;;  %v5420_v40 = vld [vmem:[%s9447_s0 + $0xb0] ss:$8 sps:$4 sm:$0xff]   ;;  %v5421_v41 = vld [vmem:[%s9447_s0 + $0xc4] ss:$8 sps:$4 sm:$0xff]   ;;  %v5423_v42 = vld [vmem:[%s9447_s0 + $0xc0] ss:$8 sps:$4 sm:$0xff]  }
   0xf   :  { %541 = vmatprep.subr.bf16.mxu0 %v9453_v0  ;;  %v5424_v43 = vld [vmem:[%s9447_s0 + $0xd4] ss:$8 sps:$4 sm:$0xff]   ;;  %v5426_v44 = vld [vmem:[%s9447_s0 + $0xd0] ss:$8 sps:$4 sm:$0xff]   ;;  %v5427_v45 = vld [vmem:[%s9447_s0 + $0xe4] ss:$8 sps:$4 sm:$0xff]  }
  0x10   :  { %v5429_v46 = vld [vmem:[%s9447_s0 + $0xe0] ss:$8 sps:$4 sm:$0xff]   ;;  %v5430_v47 = vld [vmem:[%s9447_s0 + $0xf4] ss:$8 sps:$4 sm:$0xff]   ;;  %v5432_v48 = vld [vmem:[%s9447_s0 + $0xf0] ss:$8 sps:$4 sm:$0xff]  }
  0x11   :  { %v5433_v49 = vld [vmem:[%s9447_s0 + $0x104] ss:$8 sps:$4 sm:$0xff]   ;;  %v5435_v50 = vld [vmem:[%s9447_s0 + $0x100] ss:$8 sps:$4 sm:$0xff]   ;;  %v5436_v51 = vld [vmem:[%s9447_s0 + $0x114] ss:$8 sps:$4 sm:$0xff]  }
  0x12   :  { %542 = vmatpush1.bf16.msra.mxu0 %v5373_v5  ;;  %v5438_v52 = vld [vmem:[%s9447_s0 + $0x110] ss:$8 sps:$4 sm:$0xff]   ;;  %v5439_v53 = vld [vmem:[%s9447_s0 + $0x124] ss:$8 sps:$4 sm:$0xff]   ;;  %v5441_v54 = vld [vmem:[%s9447_s0 + $0x120] ss:$8 sps:$4 sm:$0xff]  }
  0x13   :  { %543 = vmatprep.subr.bf16.mxu0 %v9453_v0 }
  0x16   :  { %544 = vmatpush1.bf16.msra.mxu0 %v5374_v7 }
  0x17   :  { %545 = vmatprep.subr.bf16.mxu0 %v9453_v0 }
  0x1a   :  { %546 = vmatpush1.bf16.msra.mxu0 %v5375_v8 }
  0x1b   :  { %547 = vmatprep.subr.bf16.mxu0 %v9453_v0 }
  0x1e   :  { %548 = vmatpush1.bf16.msra.mxu0 %v5376_v9 }
  0x1f   :  { %549 = vmatprep.subr.bf16.mxu0 %v9453_v0 }
  0x22   :  { %550 = vmatpush2.bf16.msra.mxu0 %v5377_v10 }
  0x23   :  { %551 = vmatprep.subr.bf16.mxu0 %v9453_v0 }
  0x26   :  { %552 = vmatpush2.bf16.msra.mxu0 %v5378_v11 }
  0x27   :  { %553 = vmatprep.subr.bf16.mxu0 %v9453_v0 }
  0x2a   :  { %554 = vmatpush2.bf16.msra.mxu0 %v5379_v12 }
  0x2b   :  { %555 = vmatprep.subr.bf16.mxu0 %v9453_v0 }
  0x2e   :  { %556 = vmatpush2.bf16.msra.mxu0 %v5380_v13 }
  0x2f   :  { %557 = vmatprep.subr.bf16.mxu0 %v9453_v0 }
  0x32   :  { %558 = vmatpush2.bf16.msra.mxu0 %v5381_v14 }
  0x33   :  { %559 = vmatprep.subr.bf16.mxu0 %v9453_v0 }
  0x36   :  { %560 = vmatpush2.bf16.msra.mxu0 %v5382_v15 }
  0x37   :  { %561 = vmatprep.subr.bf16.mxu0 %v9453_v0 }
  0x3a   :  { %562 = vmatpush2.bf16.msra.mxu0 %v5383_v16 }
  0x3b   :  { %563 = vmatprep.subr.bf16.mxu0 %v9453_v0 }
  0x3e   :  { %564 = vmatpush2.bf16.msra.mxu0 %v5384_v17 }
  0x41   :  { %566 = vmatmul.mubr.bf16.vlgmr.msra.gmra.mxu0 %v5385_v18 }
  0x42   :  { %573 = vmatprep.mubr.bf16.mxu0 %v5388_v19 }
  0x49   :  { %574 = vmatmul.mubr.bf16.gmra.mxu0 %v5390_v20 }
  0x4a   :  { %581 = vmatprep.mubr.bf16.mxu0 %v5391_v21 }
  0x51   :  { %582 = vmatmul.mubr.bf16.gmra.mxu0 %v5393_v22 }
  0x52   :  { %589 = vmatprep.mubr.bf16.mxu0 %v5394_v23 }
  0x59   :  { %590 = vmatmul.mubr.bf16.gmra.mxu0 %v5396_v24 }
  0x5a   :  { %597 = vmatprep.mubr.bf16.mxu0 %v5397_v25 }
  0x61   :  { %598 = vmatmul.mubr.bf16.gmra.mxu0 %v5399_v26 }
  0x62   :  { %605 = vmatprep.mubr.bf16.mxu0 %v5400_v27 }
  0x69   :  { %606 = vmatmul.mubr.bf16.gmra.mxu0 %v5402_v28 }
  0x6a   :  { %613 = vmatprep.mubr.bf16.mxu0 %v5403_v29 }
  0x71   :  { %614 = vmatmul.mubr.bf16.gmra.mxu0 %v5405_v30 }
  0x72   :  { %621 = vmatprep.mubr.bf16.mxu0 %v5406_v31 }
  0x79   :  { %622 = vmatmul.mubr.bf16.gmra.mxu0 %v5408_v32 }
  0x7a   :  { %629 = vmatprep.mubr.bf16.mxu0 %v5409_v33 }
  0x81   :  { %630 = vmatmul.mubr.bf16.gmra.mxu0 %v5411_v34 }
  0x82   :  { %637 = vmatprep.mubr.bf16.mxu0 %v5412_v35 }
  0x89   :  { %638 = vmatmul.mubr.bf16.gmra.mxu0 %v5414_v36 }
  0x8a   :  { %645 = vmatprep.mubr.bf16.mxu0 %v5415_v37 }
  0x91   :  { %646 = vmatmul.mubr.bf16.gmra.mxu0 %v5417_v38 }
  0x92   :  { %653 = vmatprep.mubr.bf16.mxu0 %v5418_v39 }
  0x99   :  { %654 = vmatmul.mubr.bf16.gmra.mxu0 %v5420_v40 }
  0x9a   :  { %661 = vmatprep.mubr.bf16.mxu0 %v5421_v41 }
  0xa1   :  { %662 = vmatmul.mubr.bf16.gmra.mxu0 %v5423_v42 }
  0xa2   :  { %669 = vmatprep.mubr.bf16.mxu0 %v5424_v43 }
  0xa9   :  { %670 = vmatmul.mubr.bf16.gmra.mxu0 %v5426_v44 }
  0xaa   :  { %677 = vmatprep.mubr.bf16.mxu0 %v5427_v45 }
  0xb1   :  { %678 = vmatmul.mubr.bf16.gmra.mxu0 %v5429_v46 }
  0xb2   :  { %685 = vmatprep.mubr.bf16.mxu0 %v5430_v47 }
  0xb9   :  { %686 = vmatmul.mubr.bf16.gmra.mxu0 %v5432_v48 }
  0xba   :  { %693 = vmatprep.mubr.bf16.mxu0 %v5433_v49 }
  0xc1   :  { %694 = vmatmul.mubr.bf16.gmra.mxu0 %v5435_v50 }
  0xc2   :  { %701 = vmatprep.mubr.bf16.mxu0 %v5436_v51 }
  0xc9   :  { %702 = vmatmul.mubr.bf16.gmra.mxu0 %v5438_v52 }
  0xca   :  { %709 = vmatprep.mubr.bf16.mxu0 %v5439_v53 }
  0xd1   :  { %710 = vmatmul.mubr.bf16.gmra.mxu0 %v5441_v54 }
 0x101   :  { %v5824_v55 = vpop.f32.mrf.mxu0 }
 0x103   :  { %v569_v56 = vpop.f32.mrf.mxu0 }
 0x105   :  { %v5826_v57 = vpop.f32.mrf.mxu0 }
 0x106   :  { %v718_v31 = vadd.f32 %v5826_v57, %v5824_v55 }
 0x107   :  { %v572_v58 = vpop.f32.mrf.mxu0 }
 0x109   :  { %v5828_v59 = vpop.f32.mrf.mxu0 }
 0x10a   :  { %v719_v33 = vadd.f32 %v718_v31, %v5828_v59 }
 0x10b   :  { %v577_v60 = vpop.f32.mrf.mxu0 }
 0x10d   :  { %v5830_v61 = vpop.f32.mrf.mxu0 }
 0x10e   :  { %v720_v35 = vadd.f32 %v719_v33, %v5830_v61 }
 0x10f   :  { %v580_v62 = vpop.f32.mrf.mxu0 }
 0x111   :  { %v5832_v63 = vpop.f32.mrf.mxu0 }
 0x112   :  { %v721_v37 = vadd.f32 %v720_v35, %v5832_v63 }
 0x113   :  { %v585_v1 = vpop.f32.mrf.mxu0 }
 0x115   :  { %v5834_v2 = vpop.f32.mrf.mxu0 }
 0x116   :  { %v722_v39 = vadd.f32 %v721_v37, %v5834_v2 }
 0x117   :  { %v588_v3 = vpop.f32.mrf.mxu0 }
 0x119   :  { %v5836_v4 = vpop.f32.mrf.mxu0 }
 0x11a   :  { %v723_v41 = vadd.f32 %v722_v39, %v5836_v4 }
 0x11b   :  { %v593_v5 = vpop.f32.mrf.mxu0 }
 0x11d   :  { %v5838_v6 = vpop.f32.mrf.mxu0 }
 0x11e   :  { %v724_v43 = vadd.f32 %v723_v41, %v5838_v6 }
 0x11f   :  { %v596_v7 = vpop.f32.mrf.mxu0 }
 0x121   :  { %v5840_v8 = vpop.f32.mrf.mxu0 }
 0x122   :  { %v725_v45 = vadd.f32 %v724_v43, %v5840_v8 }
 0x123   :  { %v601_v9 = vpop.f32.mrf.mxu0 }
 0x125   :  { %v5842_v10 = vpop.f32.mrf.mxu0 }
 0x126   :  { %v726_v47 = vadd.f32 %v725_v45, %v5842_v10 }
 0x127   :  { %v604_v11 = vpop.f32.mrf.mxu0 }
 0x129   :  { %v5844_v12 = vpop.f32.mrf.mxu0 }
 0x12a   :  { %v727_v49 = vadd.f32 %v726_v47, %v5844_v12 }
 0x12b   :  { %v609_v13 = vpop.f32.mrf.mxu0 }
 0x12d   :  { %v5846_v14 = vpop.f32.mrf.mxu0 }
 0x12e   :  { %v728_v51 = vadd.f32 %v727_v49, %v5846_v14 }
 0x12f   :  { %v612_v15 = vpop.f32.mrf.mxu0 }
 0x131   :  { %v5848_v16 = vpop.f32.mrf.mxu0 }
 0x132   :  { %v729_v53 = vadd.f32 %v728_v51, %v5848_v16 }
 0x133   :  { %v617_v17 = vpop.f32.mrf.mxu0 }
 0x135   :  { %v5850_v18 = vpop.f32.mrf.mxu0 }
 0x136   :  { %v730_v56 = vadd.f32 %v729_v53, %v5850_v18 }
 0x137   :  { %v620_v19 = vpop.f32.mrf.mxu0 }
 0x139   :  { %v5852_v20 = vpop.f32.mrf.mxu0 }
 0x13a   :  { %v731_v60 = vadd.f32 %v730_v56, %v5852_v20 }
 0x13b   :  { %v625_v21 = vpop.f32.mrf.mxu0 }
 0x13d   :  { %v5854_v22 = vpop.f32.mrf.mxu0 }
 0x13e   :  { %v732_v1 = vadd.f32 %v731_v60, %v5854_v22 }
 0x13f   :  { %v628_v23 = vpop.f32.mrf.mxu0 }
 0x141   :  { %v5856_v24 = vpop.f32.mrf.mxu0 }
 0x142   :  { %v733_v5 = vadd.f32 %v732_v1, %v5856_v24 }
 0x143   :  { %v633_v25 = vpop.f32.mrf.mxu0 }
 0x145   :  { %v5858_v26 = vpop.f32.mrf.mxu0 }
 0x146   :  { %v734_v9 = vadd.f32 %v733_v5, %v5858_v26 }
 0x147   :  { %v636_v27 = vpop.f32.mrf.mxu0 }
 0x149   :  { %v5860_v28 = vpop.f32.mrf.mxu0 }
 0x14a   :  { %v735_v13 = vadd.f32 %v734_v9, %v5860_v28 }
 0x14b   :  { %v641_v29 = vpop.f32.mrf.mxu0 }
 0x14d   :  { %v5862_v30 = vpop.f32.mrf.mxu0 }
 0x14e   :  { %v736_v17 = vadd.f32 %v735_v13, %v5862_v30 }
 0x14f   :  { %v644_v32 = vpop.f32.mrf.mxu0 }
 0x151   :  { %v5867_v34 = vpop.f32.mrf.mxu0 }
 0x152   :  { %v737_v21 = vadd.f32 %v736_v17, %v5867_v34 }
 0x153   :  { %v649_v36 = vpop.f32.mrf.mxu0 }
 0x155   :  { %v5871_v38 = vpop.f32.mrf.mxu0 }
 0x156   :  { %v738_v25 = vadd.f32 %v737_v21, %v5871_v38 }
 0x157   :  { %v652_v40 = vpop.f32.mrf.mxu0 }
 0x159   :  { %v5875_v42 = vpop.f32.mrf.mxu0 }
 0x15a   :  { %v739_v29 = vadd.f32 %v738_v25, %v5875_v42 }
 0x15b   :  { %v657_v44 = vpop.f32.mrf.mxu0 }
 0x15d   :  { %v5879_v46 = vpop.f32.mrf.mxu0 }
 0x15e   :  { %v740_v32 = vadd.f32 %v739_v29, %v5879_v46 }
 0x15f   :  { %v660_v48 = vpop.f32.mrf.mxu0 }
 0x161   :  { %v5883_v50 = vpop.f32.mrf.mxu0 }
 0x162   :  { %v741_v35 = vadd.f32 %v740_v32, %v5883_v50 }
 0x163   :  { %v665_v52 = vpop.f32.mrf.mxu0 }
 0x165   :  { %v5887_v54 = vpop.f32.mrf.mxu0 }
 0x166   :  { %v742_v37 = vadd.f32 %v741_v35, %v5887_v54  ;;  %v5442_v35 = vld [vmem:[%s9448_s2 + $0x74] ss:$8 sps:$4 sm:$0xff]  }
 0x167   :  { %v668_v58 = vpop.f32.mrf.mxu0  ;;  %1189 = vmatprep.subr.bf16.mxu1 %v5442_v35  ;;  %v5463_v35 = vld [vmem:[%s9448_s2 + $0x4] ss:$8 sps:$4 sm:$0xff]  }
 0x169   :  { %v5891_v62 = vpop.f32.mrf.mxu0 }
 0x16a   :  { %v743_v40 = vadd.f32 %v742_v37, %v5891_v62  ;;  %v5444_v37 = vld [vmem:[%s9448_s2 + $0x70] ss:$8 sps:$4 sm:$0xff]  }
 0x16b   :  { %v673_v3 = vpop.f32.mrf.mxu0  ;;  %1190 = vmatpush1.bf16.msra.mxu1 %v5444_v37 }
 0x16d   :  { %v5895_v7 = vpop.f32.mrf.mxu0 }
 0x16e   :  { %v744_v43 = vadd.f32 %v743_v40, %v5895_v7  ;;  %v5445_v40 = vld [vmem:[%s9448_s2 + $0x64] ss:$8 sps:$4 sm:$0xff]  }
 0x16f   :  { %v676_v11 = vpop.f32.mrf.mxu0  ;;  %1191 = vmatprep.subr.bf16.mxu1 %v5445_v40 }
 0x171   :  { %v5899_v15 = vpop.f32.mrf.mxu0 }
 0x172   :  { %v745_v45 = vadd.f32 %v744_v43, %v5899_v15  ;;  %v5447_v43 = vld [vmem:[%s9448_s2 + $0x60] ss:$8 sps:$4 sm:$0xff]  }
 0x173   :  { %v681_v19 = vpop.f32.mrf.mxu0  ;;  %1192 = vmatpush1.bf16.msra.mxu1 %v5447_v43 }
 0x175   :  { %v5903_v23 = vpop.f32.mrf.mxu0 }
 0x176   :  { %v746_v48 = vadd.f32 %v745_v45, %v5903_v23  ;;  %v5448_v45 = vld [vmem:[%s9448_s2 + $0x54] ss:$8 sps:$4 sm:$0xff]  }
 0x177   :  { %v684_v27 = vpop.f32.mrf.mxu0  ;;  %1193 = vmatprep.subr.bf16.mxu1 %v5448_v45 }
 0x179   :  { %v5907_v31 = vpop.f32.mrf.mxu0 }
 0x17a   :  { %v747_v51 = vadd.f32 %v746_v48, %v5907_v31  ;;  %v5450_v48 = vld [vmem:[%s9448_s2 + $0x50] ss:$8 sps:$4 sm:$0xff]  }
 0x17b   :  { %v689_v33 = vpop.f32.mrf.mxu0  ;;  %1194 = vmatpush1.bf16.msra.mxu1 %v5450_v48 }
 0x17d   :  { %v5911_v36 = vpop.f32.mrf.mxu0 }
 0x17e   :  { %v748_v53 = vadd.f32 %v747_v51, %v5911_v36  ;;  %v5451_v51 = vld [vmem:[%s9448_s2 + $0x44] ss:$8 sps:$4 sm:$0xff]  }
 0x17f   :  { %v692_v39 = vpop.f32.mrf.mxu0  ;;  %1195 = vmatprep.subr.bf16.mxu1 %v5451_v51 }
 0x181   :  { %v5915_v41 = vpop.f32.mrf.mxu0 }
 0x182   :  { %v749_v58 = vadd.f32 %v748_v53, %v5915_v41  ;;  %v5453_v53 = vld [vmem:[%s9448_s2 + $0x40] ss:$8 sps:$4 sm:$0xff]  }
 0x183   :  { %v697_v44 = vpop.f32.mrf.mxu0  ;;  %1196 = vmatpush1.bf16.msra.mxu1 %v5453_v53 }
 0x185   :  { %v698_v47 = vpop.f32.mrf.mxu0 }
 0x186   :  { %v750_v1 = vadd.f32 %v749_v58, %v698_v47 }
 0x187   :  { %v700_v49 = vpop.f32.mrf.mxu0 }
 0x189   :  { %v703_v52 = vpop.f32.mrf.mxu0 }
 0x18a   :  { %v751_v5 = vadd.f32 %v750_v1, %v703_v52 }
 0x18b   :  { %v705_v56 = vpop.f32.mrf.mxu0 }
 0x18d   :  { %v706_v60 = vpop.f32.mrf.mxu0 }
 0x18e   :  { %v752_v11 = vadd.f32 %v751_v5, %v706_v60 }
 0x18f   :  { %v708_v3 = vpop.f32.mrf.mxu0 }
 0x191   :  { %v711_v9 = vpop.f32.mrf.mxu0 }
 0x192   :  { %v753_v17 = vadd.f32 %v752_v11, %v711_v9  ;;  %v5454_v11 = vld [vmem:[%s9448_s2 + $0x34] ss:$8 sps:$4 sm:$0xff]  }
 0x193   :  { %v713_v13 = vpop.f32.mrf.mxu0  ;;  %1197 = vmatprep.subr.bf16.mxu1 %v5454_v11 }
 0x194   :  { %v5459_v13 = vld [vmem:[%s9448_s2 + $0x20] ss:$8 sps:$4 sm:$0xff]  }
 0x195   :  { %v714_v19 = vpop.f32.mrf.mxu0 }
 0x196   :  { %v754_v21 = vadd.f32 %v753_v17, %v714_v19 }
 0x197   :  { %v716_v25 = vpop.f32.mrf.mxu0 }
 0x198   :  { %v755_v27 = vrot.slane %v754_v21, 4 }
 0x19a   :  { %v756_v29 = vadd.f32 %v755_v27, %v754_v21  ;;  %v5460_v21 = vld [vmem:[%s9448_s2 + $0x14] ss:$8 sps:$4 sm:$0xff]  }
 0x19c   :  { %v757_v32 = vrot.slane %v756_v29, 2 }
 0x19e   :  { %v758_v33 = vadd.f32 %v757_v32, %v756_v29 }
 0x1a0   :  { %v759_v39 = vrot.slane %v758_v33, 1 }
 0x1a2   :  { %v760_v44 = vadd.f32 %v759_v39, %v758_v33 }
 0x1a4   :  { %v5941_v49 = vmul.f32 0.0033333334, %v760_v44 }
 0x1a6   :  { %v5950_v56 = vsub.f32 %v698_v47, %v5941_v49  ;;  %v5953_v58 = vsub.f32 %v703_v52, %v5941_v49  ;;  %v5956_v1 = vsub.f32 %v706_v60, %v5941_v49  ;;  %v5959_v3 = vsub.f32 %v711_v9, %v5941_v49  ;;  %v5456_v47 = vld [vmem:[%s9448_s2 + $0x30] ss:$8 sps:$4 sm:$0xff]   ;;  %v5457_v9 = vld [vmem:[%s9448_s2 + $0x24] ss:$8 sps:$4 sm:$0xff]  }
 0x1a7   :  { %v5962_v5 = vsub.f32 %v714_v19, %v5941_v49  ;;  %v5972_v52 = vsub.f32 %v5824_v55, %v5941_v49  ;;  %v5976_v60 = vsub.f32 %v5826_v57, %v5941_v49  ;;  %1198 = vmatpush1.bf16.msra.mxu1 %v5456_v47  ;;  %v5986_v17 = vsub.f32 %v5828_v59, %v5941_v49  ;;  %v5462_v59 = vld [vmem:[%s9448_s2 + $0x10] ss:$8 sps:$4 sm:$0xff]  }
 0x1a8   :  { %1199 = vmatprep.subr.bf16.mxu1 %v5457_v9  ;;  %v5994_v19 = vsub.f32 %v5830_v61, %v5941_v49  ;;  %v6004_v25 = vsub.f32 %v5832_v63, %v5941_v49  ;;  %v6010_v61 = vsub.f32 %v5834_v2, %v5941_v49  ;;  %v5465_v63 = vld [vmem:[%s9448_s2] ss:$8 sps:$4 sm:$0xff]   ;;  %v6022_v37 = vsub.f32 %v5836_v4, %v5941_v49 }
 0x1a9   :  { %v838_v55 = vmul.f32 %v5972_v52, %v5972_v52  ;;  %v839_v57 = vmul.f32 %v5976_v60, %v5976_v60  ;;  %v840_v27 = vmul.f32 %v5986_v17, %v5986_v17  ;;  %v6028_v40 = vsub.f32 %v5838_v6, %v5941_v49 }
 0x1aa   :  { %v841_v32 = vmul.f32 %v5994_v19, %v5994_v19  ;;  %v842_v2 = vmul.f32 %v6004_v25, %v6004_v25  ;;  %v843_v43 = vmul.f32 %v6010_v61, %v6010_v61  ;;  %v6034_v45 = vsub.f32 %v5840_v8, %v5941_v49 }
 0x1ab   :  { %1200 = vmatpush1.bf16.msra.mxu1 %v5459_v13  ;;  %v876_v29 = vadd.f32 %v839_v57, %v838_v55  ;;  %v844_v4 = vmul.f32 %v6022_v37, %v6022_v37  ;;  %v6040_v51 = vsub.f32 %v5842_v10, %v5941_v49  ;;  %v845_v6 = vmul.f32 %v6028_v40, %v6028_v40 }
 0x1ac   :  { %1201 = vmatprep.subr.bf16.mxu1 %v5460_v21  ;;  %v6046_v11 = vsub.f32 %v5844_v12, %v5941_v49  ;;  %v846_v8 = vmul.f32 %v6034_v45, %v6034_v45  ;;  %v6052_v9 = vsub.f32 %v5846_v14, %v5941_v49  ;;  %v6058_v55 = vsub.f32 %v5848_v16, %v5941_v49 }
 0x1ad   :  { %v877_v33 = vadd.f32 %v876_v29, %v840_v27  ;;  %v847_v10 = vmul.f32 %v6040_v51, %v6040_v51  ;;  %v6064_v21 = vsub.f32 %v5850_v18, %v5941_v49  ;;  %v6070_v27 = vsub.f32 %v5852_v20, %v5941_v49 }
 0x1ae   :  { %v848_v12 = vmul.f32 %v6046_v11, %v6046_v11  ;;  %v849_v14 = vmul.f32 %v6052_v9, %v6052_v9  ;;  %v850_v16 = vmul.f32 %v6058_v55, %v6058_v55 }
 0x1af   :  { %1202 = vmatpush1.bf16.msra.mxu1 %v5462_v59  ;;  %v878_v39 = vadd.f32 %v877_v33, %v841_v32  ;;  %v6076_v32 = vsub.f32 %v5854_v22, %v5941_v49  ;;  %v851_v18 = vmul.f32 %v6064_v21, %v6064_v21  ;;  %v852_v20 = vmul.f32 %v6070_v27, %v6070_v27 }
 0x1b0   :  { %1203 = vmatprep.subr.bf16.mxu1 %v5463_v35  ;;  %v6082_v35 = vsub.f32 %v5856_v24, %v5941_v49 }
 0x1b1   :  { %v879_v44 = vadd.f32 %v878_v39, %v842_v2  ;;  %v6088_v2 = vsub.f32 %v5858_v26, %v5941_v49  ;;  %v853_v22 = vmul.f32 %v6076_v32, %v6076_v32 }
 0x1b2   :  { %v854_v24 = vmul.f32 %v6082_v35, %v6082_v35 }
 0x1b3   :  { %1204 = vmatpush1.bf16.msra.mxu1 %v5465_v63  ;;  %v880_v48 = vadd.f32 %v879_v44, %v843_v43  ;;  %v6094_v43 = vsub.f32 %v5860_v28, %v5941_v49  ;;  %v855_v26 = vmul.f32 %v6088_v2, %v6088_v2 }
 0x1b5   :  { %v881_v53 = vadd.f32 %v880_v48, %v844_v4  ;;  %v6100_v4 = vsub.f32 %v5862_v30, %v5941_v49  ;;  %v856_v28 = vmul.f32 %v6094_v43, %v6094_v43 }
 0x1b7   :  { %v882_v47 = vadd.f32 %v881_v53, %v845_v6  ;;  %v6106_v6 = vsub.f32 %v5867_v34, %v5941_v49  ;;  %v857_v30 = vmul.f32 %v6100_v4, %v6100_v4 }
 0x1b9   :  { %v883_v13 = vadd.f32 %v882_v47, %v846_v8  ;;  %v6112_v8 = vsub.f32 %v5871_v38, %v5941_v49  ;;  %v858_v34 = vmul.f32 %v6106_v6, %v6106_v6 }
 0x1bb   :  { %v884_v57 = vadd.f32 %v883_v13, %v847_v10  ;;  %v6118_v10 = vsub.f32 %v5875_v42, %v5941_v49  ;;  %v859_v38 = vmul.f32 %v6112_v8, %v6112_v8 }
 0x1bd   :  { %v885_v59 = vadd.f32 %v884_v57, %v848_v12  ;;  %v6124_v12 = vsub.f32 %v5879_v46, %v5941_v49  ;;  %v860_v42 = vmul.f32 %v6118_v10, %v6118_v10 }
 0x1bf   :  { %v886_v29 = vadd.f32 %v885_v59, %v849_v14  ;;  %v6130_v14 = vsub.f32 %v5883_v50, %v5941_v49  ;;  %v861_v46 = vmul.f32 %v6124_v12, %v6124_v12 }
 0x1c1   :  { %v887_v33 = vadd.f32 %v886_v29, %v850_v16  ;;  %v6136_v16 = vsub.f32 %v5887_v54, %v5941_v49  ;;  %v862_v50 = vmul.f32 %v6130_v14, %v6130_v14 }
 0x1c3   :  { %v888_v63 = vadd.f32 %v887_v33, %v851_v18  ;;  %v6142_v18 = vsub.f32 %v5891_v62, %v5941_v49  ;;  %v863_v54 = vmul.f32 %v6136_v16, %v6136_v16 }
 0x1c5   :  { %v889_v39 = vadd.f32 %v888_v63, %v852_v20  ;;  %v6148_v20 = vsub.f32 %v5895_v7, %v5941_v49  ;;  %v864_v62 = vmul.f32 %v6142_v18, %v6142_v18 }
 0x1c7   :  { %v890_v44 = vadd.f32 %v889_v39, %v853_v22  ;;  %v24_v22 = vlaneseq  ;;  %v6154_v39 = vsub.f32 %v5899_v15, %v5941_v49  ;;  %v865_v7 = vmul.f32 %v6148_v20, %v6148_v20 }
 0x1c9   :  { %v891_v48 = vadd.f32 %v890_v44, %v854_v24  ;;  %v6160_v44 = vsub.f32 %v5903_v23, %v5941_v49  ;;  %v866_v15 = vmul.f32 %v6154_v39, %v6154_v39 }
 0x1cb   :  { %v892_v53 = vadd.f32 %v891_v48, %v855_v26  ;;  %v25_v48 = vshrl.u32 %v24_v22, 7  ;;  %v867_v23 = vmul.f32 %v6160_v44, %v6160_v44 }
 0x1cd   :  { %v893_v47 = vadd.f32 %v892_v53, %v856_v28  ;;  %v6166_v28 = vsub.f32 %v5907_v31, %v5941_v49 }
 0x1cf   :  { %v894_v13 = vadd.f32 %v893_v47, %v857_v30  ;;  %v6172_v30 = vsub.f32 %v5911_v36, %v5941_v49  ;;  %v868_v31 = vmul.f32 %v6166_v28, %v6166_v28 }
 0x1d1   :  { %v895_v57 = vadd.f32 %v894_v13, %v858_v34  ;;  %v62_v34 = vadd.s32 296, %v25_v48  ;;  %v6178_v13 = vsub.f32 %v5915_v41, %v5941_v49  ;;  %v872_v49 = vmul.f32 %v5953_v58, %v5953_v58 }
 0x1d3   :  { %v896_v59 = vadd.f32 %v895_v57, %v859_v38  ;;  %v869_v57 = vmul.f32 %v6172_v30, %v6172_v30  ;;  %vm100_vm0 = vcmp.lt.s32.totalorder %v62_v34, 300  ;;  %v870_v36 = vmul.f32 %v6178_v13, %v6178_v13 }
 0x1d5   :  { %v897_v29 = vadd.f32 %v896_v59, %v860_v42 }
 0x1d7   :  { %v898_v33 = vadd.f32 %v897_v29, %v861_v46  ;;  %v871_v46 = vmul.f32 %v5950_v56, %v5950_v56 }
 0x1d9   :  { %v899_v63 = vadd.f32 %v898_v33, %v862_v50  ;;  %v5609_v50 = vmov 0.0  }
 0x1da   :  { %v6188_v41 = vsel %vm100_vm0, 1.0, %v5609_v50 }
 0x1db   :  { %v900_v24 = vadd.f32 %v899_v63, %v863_v54  ;;  %9781 = vst [vmem:[#allocation2_spill] sm:$0xff] %v6188_v41  ;;  %v837_v54 = vmul.f32 %v6188_v41, %v5962_v5  ;;  %v873_v63 = vmul.f32 %v5956_v1, %v5956_v1 }
 0x1dd   :  { %v901_v26 = vadd.f32 %v900_v24, %v864_v62  ;;  %v874_v62 = vmul.f32 %v5959_v3, %v5959_v3 }
 0x1df   :  { %v902_v53 = vadd.f32 %v901_v26, %v865_v7  ;;  %v875_v7 = vmul.f32 %v837_v54, %v837_v54 }
 0x1e1   :  { %v903_v47 = vadd.f32 %v902_v53, %v866_v15 }
 0x1e3   :  { %v904_v38 = vadd.f32 %v903_v47, %v867_v23 }
 0x1e5   :  { %v905_v42 = vadd.f32 %v904_v38, %v868_v31 }
 0x1e7   :  { %v906_v59 = vadd.f32 %v905_v42, %v869_v57 }
 0x1e9   :  { %v907_v29 = vadd.f32 %v906_v59, %v870_v36 }
 0x1eb   :  { %v908_v33 = vadd.f32 %v907_v29, %v871_v46 }
 0x1ed   :  { %v909_v22 = vadd.f32 %v908_v33, %v872_v49 }
 0x1ef   :  { %v910_v24 = vadd.f32 %v909_v22, %v873_v63 }
 0x1f1   :  { %v911_v26 = vadd.f32 %v910_v24, %v874_v62 }
 0x1f3   :  { %v912_v48 = vadd.f32 %v911_v26, %v875_v7 }
 0x1f5   :  { %v913_v15 = vrot.slane %v912_v48, 4 }
 0x1f7   :  { %v914_v53 = vadd.f32 %v913_v15, %v912_v48 }
 0x1f9   :  { %v915_v23 = vrot.slane %v914_v53, 2 }
 0x1fb   :  { %v916_v47 = vadd.f32 %v915_v23, %v914_v53 }
 0x1fd   :  { %v917_v34 = vrot.slane %v916_v47, 1 }
 0x1ff   :  { %v918_v31 = vadd.f32 %v917_v34, %v916_v47 }
 0x201   :  { %v919_v38 = vmul.f32 0.0033333334, %v918_v31 }
 0x203   :  { %v920_v57 = vadd.f32 1e-05, %v919_v38 }
 0x205   :  { %5594 = vrsqrt.f32 %v920_v57 }
 0x212   :  { %v6198_v42 = vpop.eup %5594 }
 0x213   :  { %v922_v36 = vmul.f32 %v6198_v42, %v5972_v52  ;;  %v923_v59 = vmul.f32 %v6198_v42, %v5976_v60  ;;  %v924_v50 = vmul.f32 %v6198_v42, %v5986_v17  ;;  %v925_v49 = vmul.f32 %v6198_v42, %v5994_v19 }
 0x214   :  { %v926_v52 = vmul.f32 %v6198_v42, %v6004_v25  ;;  %v927_v60 = vmul.f32 %v6198_v42, %v6010_v61  ;;  %v928_v19 = vmul.f32 %v6198_v42, %v6022_v37  ;;  %v929_v15 = vmul.f32 %v6198_v42, %v6028_v40 }
 0x215   :  { %v960_v46 = vmul.f32 0.01, %v922_v36  ;;  %v961_v29 = vmul.f32 0.01, %v923_v59  ;;  %v962_v63 = vmul.f32 0.01, %v924_v50  ;;  %v930_v61 = vmul.f32 %v6198_v42, %v6034_v45 }
 0x216   :  { %v963_v22 = vmul.f32 0.01, %v925_v49  ;;  %v964_v17 = vmul.f32 0.01, %v926_v52  ;;  %v965_v26 = vmul.f32 0.01, %v927_v60  ;;  %v931_v31 = vmul.f32 %v6198_v42, %v6040_v51 }
 0x217   :  { %v998_v33 = vmax.f32 %v922_v36, %v960_v46  ;;  %v999_v54 = vmax.f32 %v923_v59, %v961_v29  ;;  %v1000_v24 = vmax.f32 %v924_v50, %v962_v63  ;;  %v966_v25 = vmul.f32 0.01, %v928_v19 }
 0x218   :  { %v1001_v7 = vmax.f32 %v925_v49, %v963_v22  ;;  %v1002_v53 = vmax.f32 %v926_v52, %v964_v17  ;;  %v1003_v23 = vmax.f32 %v927_v60, %v965_v26  ;;  %v967_v47 = vmul.f32 0.01, %v929_v15 }
 0x219   :  { %v1074_v62 = vpack.c.bf16 %v999_v54, %v998_v33  ;;  %v1004_v38 = vmax.f32 %v928_v19, %v966_v25  ;;  %v968_v37 = vmul.f32 0.01, %v930_v61  ;;  %v969_v36 = vmul.f32 0.01, %v931_v31 }
 0x21a   :  { %v1075_v48 = vpack.c.bf16 %v1001_v7, %v1000_v24  ;;  %v1076_v34 = vpack.c.bf16 %v1003_v23, %v1002_v53  ;;  %v1005_v57 = vmax.f32 %v929_v15, %v967_v47  ;;  %v932_v40 = vmul.f32 %v6198_v42, %v6046_v11 }
 0x21b   :  { %1222 = vmatmul.mubr.bf16.vlgmr.msra.gmra.mxu1 %v1074_v62  ;;  %v933_v46 = vmul.f32 %v6198_v42, %v6052_v9  ;;  %v1006_v29 = vmax.f32 %v930_v61, %v968_v37  ;;  %v1007_v50 = vmax.f32 %v931_v31, %v969_v36  ;;  %v934_v51 = vmul.f32 %v6198_v42, %v6058_v55 }
 0x21c   :  { %1231 = vmatprep.mubr.bf16.mxu1 %v9453_v0  ;;  %v1077_v59 = vpack.c.bf16 %v1005_v57, %v1004_v38  ;;  %v970_v45 = vmul.f32 0.01, %v932_v40  ;;  %v935_v54 = vmul.f32 %v6198_v42, %v6064_v21  ;;  %v936_v9 = vmul.f32 %v6198_v42, %v6070_v27 }
 0x21d   :  { %v971_v49 = vmul.f32 0.01, %v933_v46  ;;  %v1078_v33 = vpack.c.bf16 %v1007_v50, %v1006_v29  ;;  %v972_v11 = vmul.f32 0.01, %v934_v51  ;;  %v937_v60 = vmul.f32 %v6198_v42, %v6076_v32 }
 0x21e   :  { %v1008_v63 = vmax.f32 %v932_v40, %v970_v45  ;;  %v973_v62 = vmul.f32 0.01, %v935_v54  ;;  %v974_v55 = vmul.f32 0.01, %v936_v9  ;;  %v938_v21 = vmul.f32 %v6198_v42, %v6082_v35 }
 0x21f   :  { %v1009_v22 = vmax.f32 %v933_v46, %v971_v49  ;;  %v1010_v24 = vmax.f32 %v934_v51, %v972_v11  ;;  %v975_v17 = vmul.f32 0.01, %v937_v60  ;;  %v940_v32 = vmul.f32 %v6198_v42, %v6094_v43 }
 0x220   :  { %v1011_v7 = vmax.f32 %v935_v54, %v973_v62  ;;  %v1012_v19 = vmax.f32 %v936_v9, %v974_v55  ;;  %v976_v27 = vmul.f32 0.01, %v938_v21  ;;  %v941_v25 = vmul.f32 %v6198_v42, %v6100_v4 }
 0x221   :  { %v1079_v52 = vpack.c.bf16 %v1009_v22, %v1008_v63  ;;  %v1013_v15 = vmax.f32 %v937_v60, %v975_v17  ;;  %v978_v35 = vmul.f32 0.01, %v940_v32  ;;  %v943_v38 = vmul.f32 %v6198_v42, %v6112_v8 }
 0x222   :  { %v1080_v26 = vpack.c.bf16 %v1011_v7, %v1010_v24  ;;  %v1014_v47 = vmax.f32 %v938_v21, %v976_v27  ;;  %v979_v61 = vmul.f32 0.01, %v941_v25  ;;  %v944_v4 = vmul.f32 %v6198_v42, %v6118_v10 }
 0x223   :  { %1232 = vmatmul.mubr.bf16.gmra.mxu1 %v1075_v48  ;;  %v939_v48 = vmul.f32 %v6198_v42, %v6088_v2  ;;  %v1081_v23 = vpack.c.bf16 %v1013_v15, %v1012_v19  ;;  %v942_v2 = vmul.f32 %v6198_v42, %v6106_v6  ;;  %v1016_v57 = vmax.f32 %v940_v32, %v978_v35 }
 0x224   :  { %1241 = vmatprep.mubr.bf16.mxu1 %v9453_v0  ;;  %v1017_v37 = vmax.f32 %v941_v25, %v979_v61  ;;  %v981_v36 = vmul.f32 0.01, %v943_v38  ;;  %v945_v40 = vmul.f32 %v6198_v42, %v6124_v12  ;;  %v982_v6 = vmul.f32 0.01, %v944_v4 }
 0x225   :  { %v977_v53 = vmul.f32 0.01, %v939_v48  ;;  %v980_v43 = vmul.f32 0.01, %v942_v2  ;;  %v946_v8 = vmul.f32 %v6198_v42, %v6130_v14  ;;  %v947_v49 = vmul.f32 %v6198_v42, %v6136_v16 }
 0x226   :  { %v1019_v29 = vmax.f32 %v943_v38, %v981_v36  ;;  %v983_v50 = vmul.f32 0.01, %v945_v40  ;;  %v948_v12 = vmul.f32 %v6198_v42, %v6142_v18  ;;  %v949_v22 = vmul.f32 %v6198_v42, %v6148_v20 }
 0x227   :  { %v1018_v46 = vmax.f32 %v942_v2, %v980_v43  ;;  %v984_v10 = vmul.f32 0.01, %v946_v8  ;;  %v985_v54 = vmul.f32 0.01, %v947_v49  ;;  %v950_v16 = vmul.f32 %v6198_v42, %v6154_v39 }
 0x228   :  { %v1021_v51 = vmax.f32 %v945_v40, %v983_v50  ;;  %v986_v14 = vmul.f32 0.01, %v948_v12  ;;  %v951_v60 = vmul.f32 %v6198_v42, %v6160_v44  ;;  %v952_v20 = vmul.f32 %v6198_v42, %v6166_v28 }
 0x229   :  { %v1084_v45 = vpack.c.bf16 %v1019_v29, %v1018_v46  ;;  %v1022_v11 = vmax.f32 %v946_v8, %v984_v10  ;;  %v1023_v62 = vmax.f32 %v947_v49, %v985_v54  ;;  %v988_v18 = vmul.f32 0.01, %v950_v16  ;;  %v5469_v8 = vld [vmem:[%s9449_s3 + $0xc0] ss:$16 sps:$4 sm:$0xff]   ;;  %v5471_v49 = vld [vmem:[%s9449_s3 + $0xc4] ss:$16 sps:$4 sm:$0xff]  }
 0x22a   :  { %v1024_v24 = vmax.f32 %v948_v12, %v986_v14  ;;  %v989_v55 = vmul.f32 0.01, %v951_v60  ;;  %v990_v39 = vmul.f32 0.01, %v952_v20  ;;  %v954_v44 = vmul.f32 %v6198_v42, %v6178_v13 }
 0x22b   :  { %1242 = vmatmul.mubr.bf16.gmra.mxu1 %v1076_v34  ;;  %v1015_v34 = vmax.f32 %v939_v48, %v977_v53  ;;  %v1086_v9 = vpack.c.bf16 %v1023_v62, %v1022_v11  ;;  %v1026_v21 = vmax.f32 %v950_v16, %v988_v18  ;;  %v955_v27 = vmul.f32 %v6198_v42, %v5950_v56 }
 0x22c   :  { %1251 = vmatprep.mubr.bf16.mxu1 %v9453_v0  ;;  %v1027_v48 = vmax.f32 %v951_v60, %v989_v55  ;;  %v1028_v53 = vmax.f32 %v952_v20, %v990_v39  ;;  %v992_v28 = vmul.f32 0.01, %v954_v44  ;;  %v959_v13 = vmul.f32 %v6198_v42, %v5962_v5 }
 0x22d   :  { %v1082_v31 = vpack.c.bf16 %v1015_v34, %v1014_v47  ;;  %v993_v32 = vmul.f32 0.01, %v955_v27  ;;  %v957_v47 = vmul.f32 %v6198_v42, %v5956_v1 }
 0x22e   :  { %v1088_v15 = vpack.c.bf16 %v1027_v48, %v1026_v21  ;;  %v1030_v34 = vmax.f32 %v954_v44, %v992_v28  ;;  %v997_v2 = vmul.f32 0.01, %v959_v13 }
 0x22f   :  { %v1031_v35 = vmax.f32 %v955_v27, %v993_v32  ;;  %v995_v61 = vmul.f32 0.01, %v957_v47 }
 0x233   :  { %1252 = vmatmul.mubr.bf16.gmra.mxu1 %v1077_v59  ;;  %v1083_v59 = vpack.c.bf16 %v1017_v37, %v1016_v57  ;;  %v1033_v57 = vmax.f32 %v957_v47, %v995_v61  ;;  %v1035_v37 = vmax.f32 %v959_v13, %v997_v2 }
 0x234   :  { %1261 = vmatprep.mubr.bf16.mxu1 %v9453_v0 }
 0x235   :  { %v1073_v5 = vmul.f32 %v6188_v41, %v1035_v37 }
 0x23b   :  { %1262 = vmatmul.mubr.bf16.gmra.mxu1 %v1078_v33  ;;  %v1020_v33 = vmax.f32 %v944_v4, %v982_v6 }
 0x23c   :  { %1271 = vmatprep.mubr.bf16.mxu1 %v9453_v0 }
 0x23d   :  { %v1085_v63 = vpack.c.bf16 %v1021_v51, %v1020_v33 }
 0x243   :  { %1272 = vmatmul.mubr.bf16.gmra.mxu1 %v1079_v52  ;;  %v987_v52 = vmul.f32 0.01, %v949_v22 }
 0x244   :  { %1281 = vmatprep.mubr.bf16.mxu1 %v9453_v0 }
 0x245   :  { %v1025_v7 = vmax.f32 %v949_v22, %v987_v52 }
 0x247   :  { %v1087_v17 = vpack.c.bf16 %v1025_v7, %v1024_v24 }
 0x24b   :  { %1282 = vmatmul.mubr.bf16.gmra.mxu1 %v1080_v26  ;;  %v953_v26 = vmul.f32 %v6198_v42, %v6172_v30  ;;  %v956_v30 = vmul.f32 %v6198_v42, %v5953_v58  ;;  %v958_v58 = vmul.f32 %v6198_v42, %v5959_v3  ;;  %v5466_v3 = vld [vmem:[%s9449_s3 + $0xe0] ss:$16 sps:$4 sm:$0xff]   ;;  %v5468_v42 = vld [vmem:[%s9449_s3 + $0xe4] ss:$16 sps:$4 sm:$0xff]  }
 0x24c   :  { %1291 = vmatprep.mubr.bf16.mxu1 %v9453_v0  ;;  %2546 = vmatprep.subr.bf16.mxu1 %v5468_v42 }
 0x24d   :  { %v991_v19 = vmul.f32 0.01, %v953_v26  ;;  %v994_v56 = vmul.f32 0.01, %v956_v30  ;;  %v996_v1 = vmul.f32 0.01, %v958_v58  ;;  %2547 = vmatpush1.bf16.msra.mxu1 %v5466_v3 }
 0x24e   :  { %2548 = vmatprep.subr.bf16.mxu1 %v5471_v49 }
 0x24f   :  { %v1032_v38 = vmax.f32 %v956_v30, %v994_v56  ;;  %v1034_v36 = vmax.f32 %v958_v58, %v996_v1 }
 0x251   :  { %v1091_v43 = vpack.c.bf16 %v1033_v57, %v1032_v38  ;;  %2549 = vmatpush1.bf16.msra.mxu1 %v5469_v8 }
 0x253   :  { %1292 = vmatmul.mubr.bf16.gmra.mxu1 %v1081_v23  ;;  %v1029_v23 = vmax.f32 %v953_v26, %v991_v19 }
 0x254   :  { %1301 = vmatprep.mubr.bf16.mxu1 %v9453_v0 }
 0x255   :  { %v1089_v25 = vpack.c.bf16 %v1029_v23, %v1028_v53 }
 0x25b   :  { %1302 = vmatmul.mubr.bf16.gmra.mxu1 %v1082_v31  ;;  %v1090_v31 = vpack.c.bf16 %v1031_v35, %v1030_v34 }
 0x25c   :  { %1311 = vmatprep.mubr.bf16.mxu1 %v9453_v0 }
 0x263   :  { %1312 = vmatmul.mubr.bf16.gmra.mxu1 %v1083_v59  ;;  %v1092_v59 = vpack.c.bf16 %v1073_v5, %v1034_v36 }
 0x264   :  { %1321 = vmatprep.mubr.bf16.mxu1 %v9453_v0 }
 0x26b   :  { %1322 = vmatmul.mubr.bf16.gmra.mxu1 %v1084_v45 }
 0x26c   :  { %1331 = vmatprep.mubr.bf16.mxu1 %v9453_v0 }
 0x273   :  { %1332 = vmatmul.mubr.bf16.gmra.mxu1 %v1085_v63 }
 0x274   :  { %1341 = vmatprep.mubr.bf16.mxu1 %v9453_v0 }
 0x27b   :  { %1342 = vmatmul.mubr.bf16.gmra.mxu1 %v1086_v9 }
 0x27c   :  { %1351 = vmatprep.mubr.bf16.mxu1 %v9453_v0 }
 0x283   :  { %1352 = vmatmul.mubr.bf16.gmra.mxu1 %v1087_v17 }
 0x284   :  { %1361 = vmatprep.mubr.bf16.mxu1 %v9453_v0 }
 0x28b   :  { %1362 = vmatmul.mubr.bf16.gmra.mxu1 %v1088_v15 }
 0x28c   :  { %1371 = vmatprep.mubr.bf16.mxu1 %v9453_v0 }
 0x293   :  { %1372 = vmatmul.mubr.bf16.gmra.mxu1 %v1089_v25 }
 0x294   :  { %1381 = vmatprep.mubr.bf16.mxu1 %v9453_v0 }
 0x29b   :  { %1382 = vmatmul.mubr.bf16.gmra.mxu1 %v1090_v31 }
 0x29c   :  { %1391 = vmatprep.mubr.bf16.mxu1 %v9453_v0 }
 0x2a3   :  { %1392 = vmatmul.mubr.bf16.gmra.mxu1 %v1091_v43 }
 0x2a4   :  { %1401 = vmatprep.mubr.bf16.mxu1 %v9453_v0 }
 0x2ab   :  { %1402 = vmatmul.mubr.bf16.gmra.mxu1 %v1092_v59 }
 0x2db   :  { %v6295_v4 = vpop.f32.mrf.mxu1 }
 0x2dd   :  { %v6297_v40 = vpop.f32.mrf.mxu1 }
 0x2df   :  { %v6299_v46 = vpop.f32.mrf.mxu1 }
 0x2e0   :  { %v1412_v25 = vadd.f32 %v6299_v46, %v6295_v4 }
 0x2e1   :  { %v6307_v29 = vpop.f32.mrf.mxu1 }
 0x2e2   :  { %v1455_v43 = vadd.f32 %v6307_v29, %v6297_v40 }
 0x2e3   :  { %v6309_v6 = vpop.f32.mrf.mxu1 }
 0x2e4   :  { %v1413_v47 = vadd.f32 %v1412_v25, %v6309_v6 }
 0x2e5   :  { %v6311_v50 = vpop.f32.mrf.mxu1 }
 0x2e6   :  { %v1456_v36 = vadd.f32 %v1455_v43, %v6311_v50 }
 0x2e7   :  { %v6313_v45 = vpop.f32.mrf.mxu1 }
 0x2e8   :  { %v1414_v35 = vadd.f32 %v1413_v47, %v6313_v45 }
 0x2e9   :  { %v6321_v33 = vpop.f32.mrf.mxu1 }
 0x2ea   :  { %v1457_v42 = vadd.f32 %v1456_v36, %v6321_v33 }
 0x2eb   :  { %v6323_v51 = vpop.f32.mrf.mxu1 }
 0x2ec   :  { %v1415_v56 = vadd.f32 %v1414_v35, %v6323_v51 }
 0x2ed   :  { %v6325_v10 = vpop.f32.mrf.mxu1 }
 0x2ee   :  { %v1458_v25 = vadd.f32 %v1457_v42, %v6325_v10 }
 0x2ef   :  { %v6327_v54 = vpop.f32.mrf.mxu1 }
 0x2f0   :  { %v1416_v31 = vadd.f32 %v1415_v56, %v6327_v54 }
 0x2f1   :  { %v6329_v63 = vpop.f32.mrf.mxu1 }
 0x2f2   :  { %v1459_v56 = vadd.f32 %v1458_v25, %v6329_v63 }
 0x2f3   :  { %v6331_v12 = vpop.f32.mrf.mxu1 }
 0x2f4   :  { %v1417_v38 = vadd.f32 %v1416_v31, %v6331_v12 }
 0x2f5   :  { %v6333_v22 = vpop.f32.mrf.mxu1 }
 0x2f7   :  { %v6335_v11 = vpop.f32.mrf.mxu1 }
 0x2f8   :  { %v1418_v58 = vadd.f32 %v1417_v38, %v6335_v11 }
 0x2f9   :  { %v6337_v62 = vpop.f32.mrf.mxu1 }
 0x2fa   :  { %9782 = vst [vmem:[#allocation3_spill] sm:$0xff] %v6337_v62 }
 0x2fb   :  { %v6339_v14 = vpop.f32.mrf.mxu1 }
 0x2fc   :  { %v1419_v1 = vadd.f32 %v1418_v58, %v6339_v14  ;;  %v1460_v58 = vadd.f32 %v1459_v56, %v6333_v22 }
 0x2fd   :  { %v6341_v52 = vpop.f32.mrf.mxu1 }
 0x2fe   :  { %9783 = vst [vmem:[#allocation4_spill] sm:$0xff] %v6341_v52  ;;  %v1461_v36 = vadd.f32 %v1460_v58, %v6337_v62 }
 0x2ff   :  { %v6343_v9 = vpop.f32.mrf.mxu1 }
 0x300   :  { %v1420_v59 = vadd.f32 %v1419_v1, %v6343_v9 }
 0x301   :  { %v6345_v16 = vpop.f32.mrf.mxu1 }
 0x302   :  { %9784 = vst [vmem:[#allocation5_spill] sm:$0xff] %v6345_v16 }
 0x303   :  { %v6347_v60 = vpop.f32.mrf.mxu1 }
 0x304   :  { %v1421_v8 = vadd.f32 %v1420_v59, %v6347_v60 }
 0x305   :  { %v6349_v24 = vpop.f32.mrf.mxu1 }
 0x306   :  { %9785 = vst [vmem:[#allocation6_spill] sm:$0xff] %v6349_v24 }
 0x307   :  { %v6351_v7 = vpop.f32.mrf.mxu1 }
 0x308   :  { %v1422_v47 = vadd.f32 %v1421_v8, %v6351_v7  ;;  %v1462_v8 = vadd.f32 %v1461_v36, %v6341_v52 }
 0x309   :  { %v6353_v18 = vpop.f32.mrf.mxu1 }
 0x30a   :  { %9786 = vst [vmem:[#allocation7_spill] sm:$0xff] %v6353_v18 }
 0x30b   :  { %v6355_v55 = vpop.f32.mrf.mxu1 }
 0x30c   :  { %v1423_v31 = vadd.f32 %v1422_v47, %v6355_v55  ;;  %v1463_v47 = vadd.f32 %v1462_v8, %v6345_v16 }
 0x30d   :  { %v6357_v17 = vpop.f32.mrf.mxu1 }
 0x30e   :  { %9787 = vst [vmem:[#allocation8_spill] sm:$0xff] %v6357_v17 }
 0x30f   :  { %v6359_v20 = vpop.f32.mrf.mxu1 }
 0x310   :  { %v1424_v43 = vadd.f32 %v1423_v31, %v6359_v20  ;;  %v1464_v31 = vadd.f32 %v1463_v47, %v6349_v24 }
 0x311   :  { %v6361_v26 = vpop.f32.mrf.mxu1 }
 0x312   :  { %9788 = vst [vmem:[#allocation9_spill] sm:$0xff] %v6361_v26 }
 0x313   :  { %v6363_v21 = vpop.f32.mrf.mxu1 }
 0x314   :  { %v1425_v59 = vadd.f32 %v1424_v43, %v6363_v21  ;;  %v1465_v43 = vadd.f32 %v1464_v31, %v6353_v18 }
 0x315   :  { %v6365_v48 = vpop.f32.mrf.mxu1 }
 0x316   :  { %9789 = vst [vmem:[#allocation10_spill] sm:$0xff] %v6365_v48 }
 0x317   :  { %v6367_v39 = vpop.f32.mrf.mxu1 }
 0x318   :  { %v1426_v25 = vadd.f32 %v1425_v59, %v6367_v39  ;;  %v1466_v59 = vadd.f32 %v1465_v43, %v6357_v17 }
 0x319   :  { %v6369_v19 = vpop.f32.mrf.mxu1 }
 0x31a   :  { %9790 = vst [vmem:[#allocation11_spill] sm:$0xff] %v6369_v19 }
 0x31b   :  { %v6371_v15 = vpop.f32.mrf.mxu1 }
 0x31c   :  { %v1427_v56 = vadd.f32 %v1426_v25, %v6371_v15  ;;  %v1467_v25 = vadd.f32 %v1466_v59, %v6361_v26 }
 0x31d   :  { %v6373_v44 = vpop.f32.mrf.mxu1 }
 0x31e   :  { %9791 = vst [vmem:[#allocation12_spill] sm:$0xff] %v6373_v44 }
 0x31f   :  { %v6375_v27 = vpop.f32.mrf.mxu1 }
 0x320   :  { %v1428_v58 = vadd.f32 %v1427_v56, %v6375_v27  ;;  %v1468_v56 = vadd.f32 %v1467_v25, %v6365_v48 }
 0x321   :  { %v6377_v53 = vpop.f32.mrf.mxu1 }
 0x322   :  { %9792 = vst [vmem:[#allocation13_spill] sm:$0xff] %v6377_v53 }
 0x323   :  { %v6379_v23 = vpop.f32.mrf.mxu1 }
 0x324   :  { %v1429_v36 = vadd.f32 %v1428_v58, %v6379_v23  ;;  %v1469_v58 = vadd.f32 %v1468_v56, %v6369_v19 }
 0x325   :  { %v6381_v28 = vpop.f32.mrf.mxu1 }
 0x326   :  { %9793 = vst [vmem:[#allocation14_spill] sm:$0xff] %v6381_v28 }
 0x327   :  { %v6383_v32 = vpop.f32.mrf.mxu1 }
 0x328   :  { %v1430_v8 = vadd.f32 %v1429_v36, %v6383_v32  ;;  %v1470_v36 = vadd.f32 %v1469_v58, %v6373_v44 }
 0x329   :  { %v6387_v30 = vpop.f32.mrf.mxu1 }
 0x32a   :  { %9794 = vst [vmem:[#allocation15_spill] sm:$0xff] %v6387_v30 }
 0x32b   :  { %v6390_v34 = vpop.f32.mrf.mxu1 }
 0x32c   :  { %v1431_v47 = vadd.f32 %v1430_v8, %v6390_v34  ;;  %v1471_v8 = vadd.f32 %v1470_v36, %v6377_v53 }
 0x32d   :  { %v6393_v13 = vpop.f32.mrf.mxu1 }
 0x32e   :  { %9795 = vst [vmem:[#allocation16_spill] sm:$0xff] %v6393_v13 }
 0x32f   :  { %v6396_v61 = vpop.f32.mrf.mxu1 }
 0x330   :  { %v1432_v31 = vadd.f32 %v1431_v47, %v6396_v61  ;;  %v1472_v47 = vadd.f32 %v1471_v8, %v6381_v28 }
 0x331   :  { %v6399_v2 = vpop.f32.mrf.mxu1 }
 0x333   :  { %v6402_v57 = vpop.f32.mrf.mxu1 }
 0x334   :  { %v1433_v43 = vadd.f32 %v1432_v31, %v6402_v57  ;;  %v1473_v31 = vadd.f32 %v1472_v47, %v6387_v30 }
 0x335   :  { %v6405_v37 = vpop.f32.mrf.mxu1 }
 0x336   :  { %9796 = vst [vmem:[#allocation17_spill] sm:$0xff] %v6405_v37 }
 0x337   :  { %v6410_v5 = vpop.f32.mrf.mxu1 }
 0x338   :  { %v1434_v59 = vadd.f32 %v1433_v43, %v6410_v5  ;;  %v1474_v43 = vadd.f32 %v1473_v31, %v6393_v13 }
 0x339   :  { %v6414_v3 = vpop.f32.mrf.mxu1 }
 0x33b   :  { %v6418_v49 = vpop.f32.mrf.mxu1 }
 0x33c   :  { %v1435_v25 = vadd.f32 %v1434_v59, %v6418_v49  ;;  %v1475_v59 = vadd.f32 %v1474_v43, %v6399_v2 }
 0x33d   :  { %v6422_v35 = vpop.f32.mrf.mxu1 }
 0x33e   :  { %9797 = vst [vmem:[#allocation18_spill] sm:$0xff] %v6422_v35 }
 0x33f   :  { %v6426_v38 = vpop.f32.mrf.mxu1 }
 0x340   :  { %v1436_v56 = vadd.f32 %v1435_v25, %v6426_v38  ;;  %v1476_v25 = vadd.f32 %v1475_v59, %v6405_v37 }
 0x341   :  { %v6430_v1 = vpop.f32.mrf.mxu1 }
 0x342   :  { %9798 = vst [vmem:[#allocation19_spill] sm:$0xff] %v6430_v1 }
 0x343   :  { %v6434_v42 = vpop.f32.mrf.mxu1 }
 0x344   :  { %v1437_v58 = vadd.f32 %v1436_v56, %v6434_v42  ;;  %v1477_v56 = vadd.f32 %v1476_v25, %v6414_v3 }
 0x345   :  { %v6438_v0 = vpop.f32.mrf.mxu1 }
 0x346   :  { %9799 = vst [vmem:[#allocation20_spill] sm:$0xff] %v6438_v0 }
 0x347   :  { %v6442_v41 = vpop.f32.mrf.mxu1 }
 0x348   :  { %9800 = vst [vmem:[#allocation21_spill] sm:$0xff] %v6442_v41  ;;  %v1438_v36 = vadd.f32 %v1437_v58, %v6442_v41  ;;  %v1478_v58 = vadd.f32 %v1477_v56, %v6422_v35 }
 0x349   :  { %v6446_v62 = vpop.f32.mrf.mxu1 }
 0x34a   :  { %9801 = vst [vmem:[#allocation22_spill] sm:$0xff] %v6446_v62 }
 0x34b   :  { %v6450_v52 = vpop.f32.mrf.mxu1 }
 0x34c   :  { %9802 = vst [vmem:[#allocation23_spill] sm:$0xff] %v6450_v52  ;;  %v1439_v8 = vadd.f32 %v1438_v36, %v6450_v52  ;;  %v1479_v36 = vadd.f32 %v1478_v58, %v6430_v1 }
 0x34d   :  { %v6454_v16 = vpop.f32.mrf.mxu1 }
 0x34f   :  { %v6458_v24 = vpop.f32.mrf.mxu1 }
 0x350   :  { %9803 = vst [vmem:[#allocation24_spill] sm:$0xff] %v6458_v24  ;;  %v1440_v47 = vadd.f32 %v1439_v8, %v6458_v24  ;;  %v1480_v8 = vadd.f32 %v1479_v36, %v6438_v0 }
 0x351   :  { %v6462_v18 = vpop.f32.mrf.mxu1 }
 0x352   :  { %v1481_v25 = vadd.f32 %v1480_v8, %v6446_v62 }
 0x353   :  { %v6466_v17 = vpop.f32.mrf.mxu1 }
 0x354   :  { %9804 = vst [vmem:[#allocation25_spill] sm:$0xff] %v6466_v17  ;;  %v1441_v31 = vadd.f32 %v1440_v47, %v6466_v17  ;;  %v1482_v56 = vadd.f32 %v1481_v25, %v6454_v16 }
 0x355   :  { %v6470_v26 = vpop.f32.mrf.mxu1 }
 0x356   :  { %v1483_v58 = vadd.f32 %v1482_v56, %v6462_v18  ;;  %v5480_v56 = vld [vmem:[%s9449_s3 + $0xec] ss:$16 sps:$4 sm:$0xff]  }
 0x357   :  { %v6474_v48 = vpop.f32.mrf.mxu1  ;;  %2769 = vmatprep.subr.bf16.mxu0 %v5480_v56  ;;  %v5490_v56 = vld [vmem:[%s9449_s3 + $0xa8] ss:$16 sps:$4 sm:$0xff]  }
 0x358   :  { %9805 = vst [vmem:[#allocation26_spill] sm:$0xff] %v6474_v48  ;;  %v1442_v41 = vadd.f32 %v1441_v31, %v6474_v48 }
 0x359   :  { %v6478_v19 = vpop.f32.mrf.mxu1 }
 0x35b   :  { %v6482_v44 = vpop.f32.mrf.mxu1 }
 0x35c   :  { %9806 = vst [vmem:[#allocation27_spill] sm:$0xff] %v6482_v44  ;;  %v1443_v52 = vadd.f32 %v1442_v41, %v6482_v44  ;;  %v1484_v44 = vadd.f32 %v1483_v58, %v6470_v26  ;;  %v5484_v58 = vld [vmem:[%s9449_s3 + $0xc8] ss:$16 sps:$4 sm:$0xff]  }
 0x35d   :  { %v6486_v53 = vpop.f32.mrf.mxu1 }
 0x35f   :  { %v6490_v28 = vpop.f32.mrf.mxu1 }
 0x360   :  { %v1444_v24 = vadd.f32 %v1443_v52, %v6490_v28  ;;  %v1485_v52 = vadd.f32 %v1484_v44, %v6478_v19 }
 0x361   :  { %v6494_v30 = vpop.f32.mrf.mxu1 }
 0x362   :  { %v1486_v35 = vadd.f32 %v1485_v52, %v6486_v53 }
 0x363   :  { %v1393_v13 = vpop.f32.mrf.mxu1 }
 0x364   :  { %v1445_v47 = vadd.f32 %v1444_v24, %v1393_v13  ;;  %v1487_v24 = vadd.f32 %v1486_v35, %v6494_v30 }
 0x365   :  { %v6500_v43 = vpop.f32.mrf.mxu1 }
 0x366   :  { %v1488_v25 = vadd.f32 %v1487_v24, %v6500_v43  ;;  %v5492_v24 = vld [vmem:[%s9449_s3 + $0xac] ss:$16 sps:$4 sm:$0xff]  }
 0x367   :  { %v1397_v59 = vpop.f32.mrf.mxu1 }
 0x368   :  { %v1446_v31 = vadd.f32 %v1445_v47, %v1397_v59 }
 0x369   :  { %v6506_v37 = vpop.f32.mrf.mxu1 }
 0x36a   :  { %v1489_v44 = vadd.f32 %v1488_v25, %v6506_v37  ;;  %v5472_v25 = vld [vmem:[%s9449_s3 + $0xa0] ss:$16 sps:$4 sm:$0xff]  }
 0x36b   :  { %v1403_v17 = vpop.f32.mrf.mxu1 }
 0x36c   :  { %v1447_v1 = vadd.f32 %v1446_v31, %v1403_v17 }
 0x36d   :  { %v6510_v48 = vpop.f32.mrf.mxu1 }
 0x36f   :  { %v1407_v41 = vpop.f32.mrf.mxu1 }
 0x370   :  { %v1448_v36 = vadd.f32 %v1447_v1, %v1407_v41  ;;  %v5478_v1 = vld [vmem:[%s9449_s3 + $0xe8] ss:$16 sps:$4 sm:$0xff]  }
 0x371   :  { %v6525_v31 = vpop.f32.mrf.mxu1  ;;  %2770 = vmatpush1.bf16.msra.mxu0 %v5478_v1 }
 0x372   :  { %v1449_v0 = vrot.slane %v1448_v36, 4 }
 0x374   :  { %v1450_v8 = vadd.f32 %v1449_v0, %v1448_v36  ;;  %v1490_v0 = vadd.f32 %v1489_v44, %v6510_v48  ;;  %v5477_v44 = vld [vmem:[%s9449_s3 + $0x84] ss:$16 sps:$4 sm:$0xff]  }
 0x376   :  { %v1451_v62 = vrot.slane %v1450_v8, 2  ;;  %v1491_v36 = vadd.f32 %v1490_v0, %v6525_v31  ;;  %v5498_v0 = vld [vmem:[%s9449_s3 + $0x8c] ss:$16 sps:$4 sm:$0xff]  }
 0x378   :  { %v1452_v47 = vadd.f32 %v1451_v62, %v1450_v8  ;;  %v5486_v62 = vld [vmem:[%s9449_s3 + $0xcc] ss:$16 sps:$4 sm:$0xff]   ;;  %v5474_v8 = vld [vmem:[%s9449_s3 + $0xa4] ss:$16 sps:$4 sm:$0xff]   ;;  %v1492_v1 = vrot.slane %v1491_v36, 4 }
 0x379   :  { %2771 = vmatprep.subr.bf16.mxu0 %v5486_v62  ;;  %2550 = vmatprep.subr.bf16.mxu1 %v5474_v8  ;;  %v5496_v62 = vld [vmem:[%s9449_s3 + $0x88] ss:$16 sps:$4 sm:$0xff]  }
 0x37a   :  { %v1453_v35 = vrot.slane %v1452_v47, 1  ;;  %2772 = vmatpush1.bf16.msra.mxu0 %v5484_v58  ;;  %2551 = vmatpush1.bf16.msra.mxu1 %v5472_v25  ;;  %v1493_v58 = vadd.f32 %v1492_v1, %v1491_v36  ;;  %v5483_v25 = vld [vmem:[%s9449_s3 + $0x64] ss:$16 sps:$4 sm:$0xff]   ;;  %v5504_v36 = vld [vmem:[%s9449_s3 + $0x6c] ss:$16 sps:$4 sm:$0xff]  }
 0x37b   :  { %2773 = vmatprep.subr.bf16.mxu0 %v5492_v24  ;;  %2552 = vmatprep.subr.bf16.mxu1 %v5477_v44 }
 0x37c   :  { %v1454_v52 = vadd.f32 %v1453_v35, %v1452_v47  ;;  %v5475_v35 = vld [vmem:[%s9449_s3 + $0x80] ss:$16 sps:$4 sm:$0xff]   ;;  %v1494_v1 = vrot.slane %v1493_v58, 2 }
 0x37e   :  { %v6547_v47 = vmul.f32 0.0033333334, %v1454_v52  ;;  %2774 = vmatpush1.bf16.msra.mxu0 %v5490_v56  ;;  %2553 = vmatpush1.bf16.msra.mxu1 %v5475_v35  ;;  %v5487_v35 = vld [vmem:[%s9449_s3 + $0x40] ss:$16 sps:$4 sm:$0xff]  }
 0x37f   :  { %2775 = vmatprep.subr.bf16.mxu0 %v5498_v0  ;;  %2554 = vmatprep.subr.bf16.mxu1 %v5483_v25  ;;  %v5510_v0 = vld [vmem:[%s9449_s3 + $0x4c] ss:$16 sps:$4 sm:$0xff]  }
 0x380   :  { %v6563_v52 = vsub.f32 %v6490_v28, %v6547_v47  ;;  %v6566_v8 = vsub.f32 %v1393_v13, %v6547_v47  ;;  %v6569_v24 = vsub.f32 %v1397_v59, %v6547_v47  ;;  %v6578_v56 = vsub.f32 %v1403_v17, %v6547_v47  ;;  %v5481_v13 = vld [vmem:[%s9449_s3 + $0x60] ss:$16 sps:$4 sm:$0xff]   ;;  %v5502_v59 = vld [vmem:[%s9449_s3 + $0x68] ss:$16 sps:$4 sm:$0xff]  }
 0x381   :  { %v6581_v28 = vsub.f32 %v1407_v41, %v6547_v47  ;;  %v6591_v44 = vsub.f32 %v6295_v4, %v6547_v47  ;;  %v6595_v17 = vsub.f32 %v6299_v46, %v6547_v47  ;;  %v5489_v41 = vld [vmem:[%s9449_s3 + $0x44] ss:$16 sps:$4 sm:$0xff]   ;;  %v5508_v4 = vld [vmem:[%s9449_s3 + $0x48] ss:$16 sps:$4 sm:$0xff]   ;;  %v1495_v46 = vadd.f32 %v1494_v1, %v1493_v58  ;;  %v5516_v58 = vld [vmem:[%s9449_s3 + $0x2c] ss:$16 sps:$4 sm:$0xff]  }
 0x382   :  { %9807 = vst [vmem:[#allocation28_spill] sm:$0xff] %v6563_v52  ;;  %9808 = vst [vmem:[#allocation29_spill] sm:$0xff] %v6566_v8  ;;  %2776 = vmatpush1.bf16.msra.mxu0 %v5496_v62  ;;  %2555 = vmatpush1.bf16.msra.mxu1 %v5481_v13  ;;  %v6611_v62 = vsub.f32 %v6309_v6, %v6547_v47  ;;  %v5495_v13 = vld [vmem:[%s9449_s3 + $0x24] ss:$16 sps:$4 sm:$0xff]   ;;  %v6625_v6 = vsub.f32 %v6313_v45, %v6547_v47  ;;  %v5514_v1 = vld [vmem:[%s9449_s3 + $0x28] ss:$16 sps:$4 sm:$0xff]  }
 0x383   :  { %9809 = vst [vmem:[#allocation30_spill] sm:$0xff] %v6569_v24  ;;  %9810 = vst [vmem:[#allocation31_spill] sm:$0xff] %v6578_v56  ;;  %2777 = vmatprep.subr.bf16.mxu0 %v5504_v36  ;;  %2556 = vmatprep.subr.bf16.mxu1 %v5489_v41  ;;  %v1652_v25 = vmul.f32 %v6591_v44, %v6591_v44  ;;  %v1654_v36 = vmul.f32 %v6595_v17, %v6595_v17  ;;  %v1496_v41 = vrot.slane %v1495_v46, 1 }
 0x384   :  { %9811 = vst [vmem:[#allocation32_spill] sm:$0xff] %v6581_v28  ;;  %9812 = vst [vmem:[#allocation33_spill] sm:$0xff] %v6591_v44 }
 0x385   :  { %9813 = vst [vmem:[#allocation34_spill] sm:$0xff] %v6595_v17  ;;  %9814 = vst [vmem:[#allocation35_spill] sm:$0xff] %v6625_v6  ;;  %v1728_v45 = vadd.f32 %v1654_v36, %v1652_v25  ;;  %v5522_v17 = vld [vmem:[%s9449_s3 + $0xc] ss:$16 sps:$4 sm:$0xff]   ;;  %v5499_v25 = vld [vmem:[%s9449_s3] ss:$16 sps:$4 sm:$0xff]  }
 0x386   :  { %2778 = vmatpush1.bf16.msra.mxu0 %v5502_v59  ;;  %2557 = vmatpush1.bf16.msra.mxu1 %v5487_v35  ;;  %v5493_v59 = vld [vmem:[%s9449_s3 + $0x20] ss:$16 sps:$4 sm:$0xff]   ;;  %v1656_v35 = vmul.f32 %v6611_v62, %v6611_v62  ;;  %v5520_v36 = vld [vmem:[%s9449_s3 + $0x8] ss:$16 sps:$4 sm:$0xff]  }
 0x387   :  { %2779 = vmatprep.subr.bf16.mxu0 %v5510_v0  ;;  %2558 = vmatprep.subr.bf16.mxu1 %v5495_v13  ;;  %v6635_v0 = vsub.f32 %v6323_v51, %v6547_v47  ;;  %v6647_v13 = vsub.f32 %v6327_v54, %v6547_v47  ;;  %v1658_v51 = vmul.f32 %v6625_v6, %v6625_v6 }
 0x388   :  { %v1729_v44 = vadd.f32 %v1728_v45, %v1656_v35  ;;  %v5507_v35 = vld [vmem:[%s9449_s3 + $0x1e4] ss:$16 sps:$4 sm:$0xff]  }
 0x389   :  { %v1660_v54 = vmul.f32 %v6635_v0, %v6635_v0 }
 0x38a   :  { %2780 = vmatpush1.bf16.msra.mxu0 %v5508_v4  ;;  %2559 = vmatpush1.bf16.msra.mxu1 %v5493_v59  ;;  %v5501_v4 = vld [vmem:[%s9449_s3 + $0x4] ss:$16 sps:$4 sm:$0xff]   ;;  %v6659_v59 = vsub.f32 %v6331_v12, %v6547_v47  ;;  %v1730_v6 = vadd.f32 %v1729_v44, %v1658_v51  ;;  %v1662_v12 = vmul.f32 %v6647_v13, %v6647_v13  ;;  %v5505_v44 = vld [vmem:[%s9449_s3 + $0x1e0] ss:$16 sps:$4 sm:$0xff]  }
 0x38b   :  { %2781 = vmatprep.subr.bf16.mxu0 %v5516_v58  ;;  %v1497_v58 = vadd.f32 %v1496_v41, %v1495_v46  ;;  %2560 = vmatprep.subr.bf16.mxu1 %v5501_v4  ;;  %v6671_v46 = vsub.f32 %v6335_v11, %v6547_v47  ;;  %v6685_v11 = vsub.f32 %v6339_v14, %v6547_v47  ;;  %v5513_v51 = vld [vmem:[%s9449_s3 + $0x1c4] ss:$16 sps:$4 sm:$0xff]  }
 0x38c   :  { %v1731_v41 = vadd.f32 %v1730_v6, %v1660_v54  ;;  %v1664_v4 = vmul.f32 %v6659_v59, %v6659_v59  ;;  %v5511_v54 = vld [vmem:[%s9449_s3 + $0x1c0] ss:$16 sps:$4 sm:$0xff]  }
 0x38d   :  { %v6681_v45 = vmul.f32 0.0033333334, %v1497_v58  ;;  %v1666_v14 = vmul.f32 %v6671_v46, %v6671_v46 }
 0x38e   :  { %2782 = vmatpush1.bf16.msra.mxu0 %v5514_v1  ;;  %2561 = vmatpush1.bf16.msra.mxu1 %v5499_v25  ;;  %v5528_v1 = vld [vmem:[%s9449_s3 + $0x1ec] ss:$16 sps:$4 sm:$0xff]   ;;  %v1732_v6 = vadd.f32 %v1731_v41, %v1662_v12  ;;  %v1668_v12 = vmul.f32 %v6685_v11, %v6685_v11 }
 0x38f   :  { %2783 = vmatprep.subr.bf16.mxu0 %v5522_v17  ;;  %v5526_v17 = vld [vmem:[%s9449_s3 + $0x1e8] ss:$16 sps:$4 sm:$0xff]   ;;  %2562 = vmatprep.subr.bf16.mxu1 %v5507_v35  ;;  %v5534_v25 = vld [vmem:[%s9449_s3 + $0x1cc] ss:$16 sps:$4 sm:$0xff]  }
 0x390   :  { %v1733_v58 = vadd.f32 %v1732_v6, %v1664_v4  ;;  %v5532_v35 = vld [vmem:[%s9449_s3 + $0x1c8] ss:$16 sps:$4 sm:$0xff]  }
 0x392   :  { %2784 = vmatpush1.bf16.msra.mxu0 %v5520_v36  ;;  %2563 = vmatpush2.bf16.msra.mxu1 %v5505_v44  ;;  %v6697_v36 = vsub.f32 %v6343_v9, %v6547_v47  ;;  %v6713_v9 = vsub.f32 %v6347_v60, %v6547_v47  ;;  %v1734_v41 = vadd.f32 %v1733_v58, %v1666_v14 }
 0x393   :  { %2785 = vmatprep.subr.bf16.mxu0 %v5528_v1  ;;  %v6709_v1 = vsub.f32 %v6500_v43, %v6681_v45  ;;  %2564 = vmatprep.subr.bf16.mxu1 %v5513_v51  ;;  %v6719_v44 = vsub.f32 %v6510_v48, %v6681_v45  ;;  %v5540_v43 = vld [vmem:[%s9449_s3 + $0x1ac] ss:$16 sps:$4 sm:$0xff]   ;;  %v6729_v60 = vsub.f32 %v6351_v7, %v6547_v47  ;;  %v5517_v48 = vld [vmem:[%s9449_s3 + $0x1a0] ss:$16 sps:$4 sm:$0xff]   ;;  %v5538_v51 = vld [vmem:[%s9449_s3 + $0x1a8] ss:$16 sps:$4 sm:$0xff]  }
 0x394   :  { %v1670_v4 = vmul.f32 %v6697_v36, %v6697_v36  ;;  %v1735_v6 = vadd.f32 %v1734_v41, %v1668_v12  ;;  %v1672_v7 = vmul.f32 %v6713_v9, %v6713_v9  ;;  %v6747_v58 = vsub.f32 %v6297_v40, %v6681_v45 }
 0x395   :  { %9815 = vst [vmem:[#allocation36_spill] sm:$0xff] %v6709_v1  ;;  %9816 = vst [vmem:[#allocation37_spill] sm:$0xff] %v6719_v44  ;;  %v6761_v12 = vsub.f32 %v6359_v20, %v6547_v47  ;;  %v1674_v40 = vmul.f32 %v6729_v60, %v6729_v60 }
 0x396   :  { %2786 = vmatpush2.bf16.msra.mxu0 %v5526_v17  ;;  %2565 = vmatpush2.bf16.msra.mxu1 %v5511_v54  ;;  %v5519_v17 = vld [vmem:[%s9449_s3 + $0x1a4] ss:$16 sps:$4 sm:$0xff]   ;;  %v1736_v14 = vadd.f32 %v1735_v6, %v1670_v4  ;;  %v6751_v54 = vsub.f32 %v6307_v29, %v6681_v45  ;;  %v5523_v29 = vld [vmem:[%s9449_s3 + $0x180] ss:$16 sps:$4 sm:$0xff]   ;;  %v6779_v6 = vsub.f32 %v6311_v50, %v6681_v45  ;;  %v5549_v50 = vld [vmem:[%s9449_s3 + $0x16c] ss:$16 sps:$4 sm:$0xff]  }
 0x397   :  { %2787 = vmatprep.subr.bf16.mxu0 %v5534_v25  ;;  %v6741_v25 = vsub.f32 %v6355_v55, %v6547_v47  ;;  %2566 = vmatprep.subr.bf16.mxu1 %v5519_v17  ;;  %v5546_v55 = vld [vmem:[%s9449_s3 + $0x18c] ss:$16 sps:$4 sm:$0xff]   ;;  %9817 = vst [vmem:[#allocation38_spill] sm:$0xff] %v6761_v12  ;;  %v5544_v17 = vld [vmem:[%s9449_s3 + $0x188] ss:$16 sps:$4 sm:$0xff]  }
 0x398   :  { %v1737_v41 = vadd.f32 %v1736_v14, %v1672_v7  ;;  %v5531_v7 = vld [vmem:[%s9449_s3 + $0x164] ss:$16 sps:$4 sm:$0xff]   ;;  %v1678_v14 = vmul.f32 %v6761_v12, %v6761_v12  ;;  %v6821_v12 = vsub.f32 %v6375_v27, %v6547_v47 }
 0x399   :  { %v1676_v20 = vmul.f32 %v6741_v25, %v6741_v25 }
 0x39a   :  { %2788 = vmatpush2.bf16.msra.mxu0 %v5532_v35  ;;  %2567 = vmatpush2.bf16.msra.mxu1 %v5517_v48  ;;  %v5525_v35 = vld [vmem:[%s9449_s3 + $0x184] ss:$16 sps:$4 sm:$0xff]   ;;  %v1738_v4 = vadd.f32 %v1737_v41, %v1674_v40  ;;  %v1653_v48 = vmul.f32 %v6747_v58, %v6747_v58  ;;  %v6799_v40 = vsub.f32 %v6321_v33, %v6681_v45 }
 0x39b   :  { %2789 = vmatprep.subr.bf16.mxu0 %v5540_v43  ;;  %v6773_v43 = vsub.f32 %v6363_v21, %v6547_v47  ;;  %2568 = vmatprep.subr.bf16.mxu1 %v5525_v35  ;;  %v6787_v21 = vsub.f32 %v6367_v39, %v6547_v47  ;;  %v5529_v39 = vld [vmem:[%s9449_s3 + $0x160] ss:$16 sps:$4 sm:$0xff]   ;;  %v6809_v41 = vsub.f32 %v6371_v15, %v6547_v47 }
 0x39c   :  { %v1739_v35 = vadd.f32 %v1738_v4, %v1676_v20  ;;  %v6815_v33 = vsub.f32 %v6325_v10, %v6681_v45  ;;  %9821 = vst [vmem:[#allocation42_spill] sm:$0xff] %v6821_v12  ;;  %v5537_v10 = vld [vmem:[%s9449_s3 + $0x144] ss:$16 sps:$4 sm:$0xff]   ;;  %v1659_v27 = vmul.f32 %v6799_v40, %v6799_v40 }
 0x39d   :  { %9818 = vst [vmem:[#allocation39_spill] sm:$0xff] %v6773_v43  ;;  %9819 = vst [vmem:[#allocation40_spill] sm:$0xff] %v6787_v21  ;;  %v1682_v15 = vmul.f32 %v6787_v21, %v6787_v21 }
 0x39e   :  { %2790 = vmatpush2.bf16.msra.mxu0 %v5538_v51  ;;  %v1655_v51 = vmul.f32 %v6751_v54, %v6751_v54  ;;  %2569 = vmatpush2.bf16.msra.mxu1 %v5523_v29  ;;  %9820 = vst [vmem:[#allocation41_spill] sm:$0xff] %v6809_v41  ;;  %v1680_v29 = vmul.f32 %v6773_v43, %v6773_v43  ;;  %v9849_v43 = vld [vmem:[#allocation16_spill] sm:$0xff] }
 0x39f   :  { %2791 = vmatprep.subr.bf16.mxu0 %v5546_v55  ;;  %v5547_v55 = vld [vmem:[%s9449_s3 + $0x168] ss:$16 sps:$4 sm:$0xff]   ;;  %2570 = vmatprep.subr.bf16.mxu1 %v5531_v7  ;;  %v1740_v20 = vadd.f32 %v1739_v35, %v1678_v14  ;;  %v5552_v7 = vld [vmem:[%s9449_s3 + $0x14c] ss:$16 sps:$4 sm:$0xff]  }
 0x3a0   :  { %v1771_v4 = vadd.f32 %v1655_v51, %v1653_v48  ;;  %v6833_v48 = vsub.f32 %v6329_v63, %v6681_v45  ;;  %v5550_v35 = vld [vmem:[%s9449_s3 + $0x148] ss:$16 sps:$4 sm:$0xff]   ;;  %v1684_v63 = vmul.f32 %v6809_v41, %v6809_v41  ;;  %v6893_v41 = vsub.f32 %v6396_v61, %v6547_v47 }
 0x3a1   :  { %v1741_v14 = vadd.f32 %v1740_v20, %v1680_v29  ;;  %v6851_v20 = vsub.f32 %v6333_v22, %v6681_v45  ;;  %v5558_v22 = vld [vmem:[%s9449_s3 + $0x12c] ss:$16 sps:$4 sm:$0xff]  }
 0x3a2   :  { %2792 = vmatpush2.bf16.msra.mxu0 %v5544_v17  ;;  %v1657_v17 = vmul.f32 %v6779_v6, %v6779_v6  ;;  %2571 = vmatpush2.bf16.msra.mxu1 %v5529_v39  ;;  %v6845_v39 = vsub.f32 %v6379_v23, %v6547_v47  ;;  %v1686_v23 = vmul.f32 %v6821_v12, %v6821_v12 }
 0x3a3   :  { %2793 = vmatprep.subr.bf16.mxu0 %v5549_v50  ;;  %v5535_v50 = vld [vmem:[%s9449_s3 + $0x140] ss:$16 sps:$4 sm:$0xff]   ;;  %2572 = vmatprep.subr.bf16.mxu1 %v5537_v10  ;;  %v1742_v29 = vadd.f32 %v1741_v14, %v1682_v15  ;;  %v5543_v15 = vld [vmem:[%s9449_s3 + $0x124] ss:$16 sps:$4 sm:$0xff]  }
 0x3a4   :  { %v1772_v51 = vadd.f32 %v1771_v4, %v1657_v17  ;;  %9822 = vst [vmem:[#allocation43_spill] sm:$0xff] %v6845_v39  ;;  %v6857_v4 = vsub.f32 %v6383_v32, %v6547_v47  ;;  %v1663_v32 = vmul.f32 %v6833_v48, %v6833_v48 }
 0x3a5   :  { %v1743_v10 = vadd.f32 %v1742_v29, %v1684_v63  ;;  %v6881_v63 = vsub.f32 %v6390_v34, %v6547_v47  ;;  %v1688_v29 = vmul.f32 %v6845_v39, %v6845_v39  ;;  %v1694_v39 = vmul.f32 %v6893_v41, %v6893_v41 }
 0x3a6   :  { %2794 = vmatpush2.bf16.msra.mxu0 %v5547_v55  ;;  %v1661_v55 = vmul.f32 %v6815_v33, %v6815_v33  ;;  %v1773_v17 = vadd.f32 %v1772_v51, %v1659_v27  ;;  %2573 = vmatpush2.bf16.msra.mxu1 %v5535_v50  ;;  %9823 = vst [vmem:[#allocation44_spill] sm:$0xff] %v6857_v4  ;;  %v5541_v51 = vld [vmem:[%s9449_s3 + $0x120] ss:$16 sps:$4 sm:$0xff]   ;;  %v5556_v50 = vld [vmem:[%s9449_s3 + $0x128] ss:$16 sps:$4 sm:$0xff]  }
 0x3a7   :  { %2795 = vmatprep.subr.bf16.mxu0 %v5552_v7  ;;  %v9824_v7 = vld [vmem:[#allocation3_spill] sm:$0xff]  ;;  %2574 = vmatprep.subr.bf16.mxu1 %v5543_v15  ;;  %v1690_v34 = vmul.f32 %v6857_v4, %v6857_v4 }
 0x3a8   :  { %v6869_v14 = vsub.f32 %v9824_v7, %v6681_v45  ;;  %v1774_v27 = vadd.f32 %v1773_v17, %v1661_v55  ;;  %9825 = vst [vmem:[#allocation3_spill] sm:$0xff] %v6881_v63  ;;  %v1744_v7 = vadd.f32 %v1743_v10, %v1686_v23  ;;  %v9826_v55 = vld [vmem:[#allocation4_spill] sm:$0xff]  ;;  %v5561_v15 = vld [vmem:[%s9449_s3 + $0x10c] ss:$16 sps:$4 sm:$0xff]  }
 0x3a9   :  { %v6887_v17 = vsub.f32 %v9826_v55, %v6681_v45  ;;  %9827 = vst [vmem:[#allocation4_spill] sm:$0xff] %v6893_v41  ;;  %v5555_v23 = vld [vmem:[%s9449_s3 + $0x104] ss:$16 sps:$4 sm:$0xff]   ;;  %v9828_v10 = vld [vmem:[#allocation5_spill] sm:$0xff] }
 0x3aa   :  { %2796 = vmatpush2.bf16.msra.mxu0 %v5550_v35  ;;  %v1665_v35 = vmul.f32 %v6851_v20, %v6851_v20  ;;  %v1775_v12 = vadd.f32 %v1774_v27, %v1663_v32  ;;  %2575 = vmatpush2.bf16.msra.mxu1 %v5541_v51  ;;  %v6905_v32 = vsub.f32 %v9828_v10, %v6681_v45  ;;  %v5553_v51 = vld [vmem:[%s9449_s3 + $0x100] ss:$16 sps:$4 sm:$0xff]   ;;  %v5559_v55 = vld [vmem:[%s9449_s3 + $0x108] ss:$16 sps:$4 sm:$0xff]  }
 0x3ab   :  { %2797 = vmatprep.subr.bf16.mxu0 %v5558_v22  ;;  %v1745_v22 = vadd.f32 %v1744_v7, %v1688_v29  ;;  %v1667_v61 = vmul.f32 %v6869_v14, %v6869_v14  ;;  %v6917_v29 = vsub.f32 %v6402_v57, %v6547_v47  ;;  %v1692_v7 = vmul.f32 %v6881_v63, %v6881_v63  ;;  %v9832_v63 = vld [vmem:[#allocation7_spill] sm:$0xff] }
 0x3ac   :  { %v1776_v27 = vadd.f32 %v1775_v12, %v1665_v35  ;;  %2576 = vmatprep.subr.bf16.mxu1 %v5555_v23  ;;  %v9830_v12 = vld [vmem:[#allocation6_spill] sm:$0xff]  ;;  %v9831_v57 = vmov 0   ;;  %v6932_v23 = vsub.f32 %v9832_v63, %v6681_v45 }
 0x3ad   :  { %9829 = vst [vmem:[#allocation5_spill] sm:$0xff] %v6917_v29  ;;  %v1746_v10 = vadd.f32 %v1745_v22, %v1690_v34  ;;  %v6923_v35 = vsub.f32 %v9830_v12, %v6681_v45  ;;  %v1671_v34 = vmul.f32 %v6905_v32, %v6905_v32  ;;  %v6938_v22 = vsub.f32 %v6410_v5, %v6547_v47 }
 0x3ae   :  { %2798 = vmatpush2.bf16.msra.mxu0 %v5556_v50  ;;  %v1669_v50 = vmul.f32 %v6887_v17, %v6887_v17  ;;  %v1777_v4 = vadd.f32 %v1776_v27, %v1667_v61  ;;  %2577 = vmatpush2.bf16.msra.mxu1 %v5553_v51  ;;  %v1696_v61 = vmul.f32 %v6917_v29, %v6917_v29  ;;  %v9834_v51 = vld [vmem:[#allocation8_spill] sm:$0xff] }
 0x3af   :  { %2799 = vmatprep.subr.bf16.mxu0 %v5561_v15  ;;  %4755 = vmatprep.subr.bf16.mxu1 %v9831_v57  ;;  %v1747_v21 = vadd.f32 %v1746_v10, %v1692_v7  ;;  %9833 = vst [vmem:[#allocation6_spill] sm:$0xff] %v6938_v22  ;;  %v6945_v7 = vsub.f32 %v9834_v51, %v6681_v45  ;;  %v9837_v51 = vld [vmem:[#allocation10_spill] sm:$0xff] }
 0x3b0   :  { %v1778_v15 = vadd.f32 %v1777_v4, %v1669_v50  ;;  %v1673_v63 = vmul.f32 %v6923_v35, %v6923_v35  ;;  %v1675_v5 = vmul.f32 %v6932_v23, %v6932_v23 }
 0x3b1   :  { %v1748_v27 = vadd.f32 %v1747_v21, %v1694_v39  ;;  %v6957_v21 = vsub.f32 %v6418_v49, %v6547_v47  ;;  %v1698_v39 = vmul.f32 %v6938_v22, %v6938_v22  ;;  %v9840_v22 = vld [vmem:[#allocation12_spill] sm:$0xff] }
 0x3b2   :  { %2800 = vmatpush2.bf16.msra.mxu0 %v5559_v55  ;;  %v1779_v10 = vadd.f32 %v1778_v15, %v1671_v34  ;;  %v9835_v55 = vld [vmem:[#allocation9_spill] sm:$0xff]  ;;  %v1677_v34 = vmul.f32 %v6945_v7, %v6945_v7  ;;  %v6981_v29 = vsub.f32 %v9840_v22, %v6681_v45 }
 0x3b3   :  { %4940 = vmatprep.subr.bf16.mxu0 %v9831_v57  ;;  %v1749_v4 = vadd.f32 %v1748_v27, %v1696_v61  ;;  %v6951_v12 = vsub.f32 %v9835_v55, %v6681_v45  ;;  %9836 = vst [vmem:[#allocation7_spill] sm:$0xff] %v6957_v21  ;;  %v6963_v57 = vsub.f32 %v9837_v51, %v6681_v45  ;;  %v9838_v27 = vld [vmem:[#allocation11_spill] sm:$0xff] }
 0x3b4   :  { %v1780_v50 = vadd.f32 %v1779_v10, %v1673_v63  ;;  %v6969_v55 = vsub.f32 %v9838_v27, %v6681_v45  ;;  %v6975_v10 = vsub.f32 %v6426_v38, %v6547_v47  ;;  %v1700_v51 = vmul.f32 %v6957_v21, %v6957_v21  ;;  %9841 = vst [vmem:[#allocation9_spill] sm:$0xff] %v6981_v29  ;;  %v9844_v21 = vld [vmem:[#allocation14_spill] sm:$0xff] }
 0x3b5   :  { %v1750_v61 = vadd.f32 %v1749_v4, %v1698_v39  ;;  %v1679_v49 = vmul.f32 %v6951_v12, %v6951_v12  ;;  %v1681_v4 = vmul.f32 %v6963_v57, %v6963_v57  ;;  %v9842_v39 = vld [vmem:[#allocation13_spill] sm:$0xff]  ;;  %v6999_v41 = vsub.f32 %v9844_v21, %v6681_v45 }
 0x3b6   :  { %v1781_v15 = vadd.f32 %v1780_v50, %v1675_v5  ;;  %9839 = vst [vmem:[#allocation8_spill] sm:$0xff] %v6975_v10  ;;  %v6987_v27 = vsub.f32 %v9842_v39, %v6681_v45  ;;  %v1683_v38 = vmul.f32 %v6969_v55, %v6969_v55  ;;  %v1702_v22 = vmul.f32 %v6975_v10, %v6975_v10 }
 0x3b7   :  { %v1751_v50 = vadd.f32 %v1750_v61, %v1700_v51  ;;  %9845 = vst [vmem:[#allocation11_spill] sm:$0xff] %v6999_v41  ;;  %v1685_v61 = vmul.f32 %v6981_v29, %v6981_v29  ;;  %v9846_v51 = vld [vmem:[#allocation15_spill] sm:$0xff]  ;;  %v7017_v29 = vsub.f32 %v9849_v43, %v6681_v45 }
 0x3b8   :  { %v1782_v63 = vadd.f32 %v1781_v15, %v1677_v34  ;;  %v6993_v15 = vsub.f32 %v6434_v42, %v6547_v47  ;;  %v7005_v39 = vsub.f32 %v9846_v51, %v6681_v45  ;;  %v1687_v42 = vmul.f32 %v6987_v27, %v6987_v27  ;;  %v9852_v51 = vld [vmem:[#allocation23_spill] sm:$0xff] }
 0x3b9   :  { %9850 = vst [vmem:[#allocation13_spill] sm:$0xff] %v7017_v29 }
 0x3ba   :  { %v1783_v5 = vadd.f32 %v1782_v63, %v1679_v49  ;;  %9843 = vst [vmem:[#allocation10_spill] sm:$0xff] %v6993_v15  ;;  %v1752_v63 = vadd.f32 %v1751_v50, %v1702_v22  ;;  %v1704_v21 = vmul.f32 %v6993_v15, %v6993_v15  ;;  %v1689_v50 = vmul.f32 %v6999_v41, %v6999_v41  ;;  %v9854_v15 = vld [vmem:[#allocation17_spill] sm:$0xff] }
 0x3bb   :  { %v7023_v22 = vsub.f32 %v6399_v2, %v6681_v45  ;;  %v7035_v41 = vsub.f32 %v9854_v15, %v6681_v45 }
 0x3bc   :  { %v1784_v34 = vadd.f32 %v1783_v5, %v1681_v4  ;;  %v9847_v5 = vld [vmem:[#allocation21_spill] sm:$0xff] }
 0x3bd   :  { %v7011_v10 = vsub.f32 %v9847_v5, %v6547_v47  ;;  %9851 = vst [vmem:[#allocation14_spill] sm:$0xff] %v7023_v22  ;;  %v7029_v5 = vsub.f32 %v9852_v51, %v6547_v47  ;;  %9855 = vst [vmem:[#allocation21_spill] sm:$0xff] %v7035_v41 }
 0x3be   :  { %v1785_v49 = vadd.f32 %v1784_v34, %v1683_v38  ;;  %v1753_v34 = vadd.f32 %v1752_v63, %v1704_v21  ;;  %v1693_v63 = vmul.f32 %v7017_v29, %v7017_v29  ;;  %v1695_v21 = vmul.f32 %v7023_v22, %v7023_v22  ;;  %v9863_v22 = vld [vmem:[#allocation20_spill] sm:$0xff] }
 0x3bf   :  { %9848 = vst [vmem:[#allocation12_spill] sm:$0xff] %v7011_v10  ;;  %9853 = vst [vmem:[#allocation15_spill] sm:$0xff] %v7029_v5  ;;  %v1706_v43 = vmul.f32 %v7011_v10, %v7011_v10  ;;  %v1708_v15 = vmul.f32 %v7029_v5, %v7029_v5  ;;  %v9858_v10 = vld [vmem:[#allocation18_spill] sm:$0xff] }
 0x3c0   :  { %v1786_v4 = vadd.f32 %v1785_v49, %v1685_v61  ;;  %v1691_v61 = vmul.f32 %v7005_v39, %v7005_v39  ;;  %v7053_v29 = vsub.f32 %v9858_v10, %v6681_v45 }
 0x3c2   :  { %v1787_v38 = vadd.f32 %v1786_v4, %v1687_v42  ;;  %v1754_v42 = vadd.f32 %v1753_v34, %v1706_v43  ;;  %v7041_v4 = vsub.f32 %v6414_v3, %v6681_v45  ;;  %9859 = vst [vmem:[#allocation23_spill] sm:$0xff] %v7053_v29  ;;  %v1697_v34 = vmul.f32 %v7035_v41, %v7035_v41 }
 0x3c3   :  { %v7071_v41 = vsub.f32 %v9863_v22, %v6681_v45 }
 0x3c4   :  { %v1788_v49 = vadd.f32 %v1787_v38, %v1689_v50  ;;  %v9856_v38 = vld [vmem:[#allocation24_spill] sm:$0xff] }
 0x3c5   :  { %v7047_v51 = vsub.f32 %v9856_v38, %v6547_v47  ;;  %v9861_v38 = vld [vmem:[#allocation25_spill] sm:$0xff] }
 0x3c6   :  { %v1789_v2 = vadd.f32 %v1788_v49, %v1691_v61  ;;  %v1755_v61 = vadd.f32 %v1754_v42, %v1708_v15  ;;  %v9860_v49 = vld [vmem:[#allocation19_spill] sm:$0xff]  ;;  %v7065_v5 = vsub.f32 %v9861_v38, %v6547_v47  ;;  %v1701_v42 = vmul.f32 %v7053_v29, %v7053_v29  ;;  %v9864_v15 = vld [vmem:[#allocation22_spill] sm:$0xff] }
 0x3c7   :  { %9857 = vst [vmem:[#allocation16_spill] sm:$0xff] %v7047_v51  ;;  %v7059_v43 = vsub.f32 %v9860_v49, %v6681_v45  ;;  %v1710_v10 = vmul.f32 %v7047_v51, %v7047_v51  ;;  %v7077_v49 = vsub.f32 %v9864_v15, %v6681_v45  ;;  %v9865_v38 = vld [vmem:[#allocation26_spill] sm:$0xff]  ;;  %v7089_v29 = vsub.f32 %v6454_v16, %v6681_v45  ;;  %v9866_v15 = vld [vmem:[#allocation27_spill] sm:$0xff] }
 0x3c8   :  { %v1790_v50 = vadd.f32 %v1789_v2, %v1693_v63  ;;  %v1699_v63 = vmul.f32 %v7041_v4, %v7041_v4  ;;  %9862 = vst [vmem:[#allocation17_spill] sm:$0xff] %v7065_v5  ;;  %v7083_v51 = vsub.f32 %v9865_v38, %v6547_v47  ;;  %v1712_v22 = vmul.f32 %v7065_v5, %v7065_v5 }
 0x3c9   :  { %v7101_v38 = vsub.f32 %v9866_v15, %v6547_v47  ;;  %v7107_v5 = vsub.f32 %v6470_v26, %v6681_v45  ;;  %v7121_v26 = vsub.f32 %v6486_v53, %v6681_v45 }
 0x3ca   :  { %v1791_v3 = vadd.f32 %v1790_v50, %v1695_v21  ;;  %v1756_v50 = vadd.f32 %v1755_v61, %v1710_v10  ;;  %v1705_v61 = vmul.f32 %v7071_v41, %v7071_v41  ;;  %v7095_v10 = vsub.f32 %v6462_v18, %v6681_v45 }
 0x3cb   :  { %9867 = vst [vmem:[#allocation24_spill] sm:$0xff] %v7101_v38  ;;  %v1714_v16 = vmul.f32 %v7083_v51, %v7083_v51  ;;  %v1717_v53 = vmul.f32 %v7121_v26, %v7121_v26 }
 0x3cc   :  { %v1792_v2 = vadd.f32 %v1791_v3, %v1697_v34  ;;  %v1703_v34 = vmul.f32 %v7059_v43, %v7059_v43  ;;  %v1711_v47 = vmul.f32 %v7095_v10, %v7095_v10 }
 0x3ce   :  { %v1793_v21 = vadd.f32 %v1792_v2, %v1699_v63  ;;  %v1757_v2 = vadd.f32 %v1756_v50, %v1712_v22  ;;  %v1709_v50 = vmul.f32 %v7089_v29, %v7089_v29 }
 0x3d0   :  { %v1794_v3 = vadd.f32 %v1793_v21, %v1701_v42  ;;  %v1707_v42 = vmul.f32 %v7077_v49, %v7077_v49 }
 0x3d2   :  { %v1795_v63 = vadd.f32 %v1794_v3, %v1703_v34  ;;  %v1758_v34 = vadd.f32 %v1757_v2, %v1714_v16  ;;  %v7113_v3 = vsub.f32 %v6478_v19, %v6681_v45  ;;  %v7127_v19 = vsub.f32 %v6494_v30, %v6681_v45 }
 0x3d3   :  { %v1718_v16 = vmul.f32 %v6563_v52, %v6563_v52 }
 0x3d4   :  { %v1796_v21 = vadd.f32 %v1795_v63, %v1705_v61  ;;  %v1716_v61 = vmul.f32 %v7101_v38, %v7101_v38  ;;  %v1713_v63 = vmul.f32 %v7107_v5, %v7107_v5  ;;  %9868 = vst [vmem:[#allocation18_spill] sm:$0xff] %v7127_v19  ;;  %v1719_v30 = vmul.f32 %v7127_v19, %v7127_v19 }
 0x3d6   :  { %v1797_v18 = vadd.f32 %v1796_v21, %v1707_v42  ;;  %v1759_v2 = vadd.f32 %v1758_v34, %v1716_v61  ;;  %v1715_v21 = vmul.f32 %v7113_v3, %v7113_v3  ;;  %v1721_v61 = vmul.f32 %v6709_v1, %v6709_v1 }
 0x3d8   :  { %v1798_v22 = vadd.f32 %v1797_v18, %v1709_v50  ;;  %v1760_v18 = vadd.f32 %v1759_v2, %v1718_v16 }
 0x3da   :  { %v1799_v42 = vadd.f32 %v1798_v22, %v1711_v47  ;;  %v7137_v47 = vsub.f32 %v6506_v37, %v6681_v45  ;;  %v1720_v22 = vmul.f32 %v6566_v8, %v6566_v8 }
 0x3dc   :  { %v1800_v15 = vadd.f32 %v1799_v42, %v1713_v63  ;;  %9869 = vst [vmem:[#allocation19_spill] sm:$0xff] %v7137_v47  ;;  %v1761_v42 = vadd.f32 %v1760_v18, %v1720_v22  ;;  %v1723_v37 = vmul.f32 %v7137_v47, %v7137_v47 }
 0x3de   :  { %v1801_v50 = vadd.f32 %v1800_v15, %v1715_v21  ;;  %v7147_v21 = vsub.f32 %v6525_v31, %v6681_v45  ;;  %v1722_v15 = vmul.f32 %v6569_v24, %v6569_v24  ;;  %v1724_v31 = vmul.f32 %v6578_v56, %v6578_v56 }
 0x3e0   :  { %v1802_v34 = vadd.f32 %v1801_v50, %v1717_v53  ;;  %9870 = vst [vmem:[#allocation25_spill] sm:$0xff] %v7147_v21  ;;  %v1762_v53 = vadd.f32 %v1761_v42, %v1722_v15  ;;  %v9871_v50 = vld [vmem:[#allocation2_spill] sm:$0xff] }
 0x3e1   :  { %v1651_v8 = vmul.f32 %v9871_v50, %v7147_v21  ;;  %v1650_v18 = vmul.f32 %v9871_v50, %v6581_v28 }
 0x3e2   :  { %v1803_v63 = vadd.f32 %v1802_v34, %v1719_v30  ;;  %v1725_v30 = vmul.f32 %v6719_v44, %v6719_v44  ;;  %v1763_v34 = vadd.f32 %v1762_v53, %v1724_v31 }
 0x3e3   :  { %v1727_v22 = vmul.f32 %v1651_v8, %v1651_v8 }
 0x3e4   :  { %v1804_v2 = vadd.f32 %v1803_v63, %v1721_v61  ;;  %v1726_v61 = vmul.f32 %v1650_v18, %v1650_v18  ;;  %v9872_v18 = vld [vmem:[#allocation33_spill] sm:$0xff] }
 0x3e6   :  { %v1805_v16 = vadd.f32 %v1804_v2, %v1723_v37  ;;  %v1764_v24 = vadd.f32 %v1763_v34, %v1726_v61 }
 0x3e8   :  { %v1806_v45 = vadd.f32 %v1805_v16, %v1725_v30  ;;  %v1765_v42 = vrot.slane %v1764_v24, 4 }
 0x3ea   :  { %v1807_v63 = vadd.f32 %v1806_v45, %v1727_v22  ;;  %v1766_v15 = vadd.f32 %v1765_v42, %v1764_v24  ;;  %v9874_v22 = vld [vmem:[#allocation35_spill] sm:$0xff] }
 0x3ec   :  { %v1808_v37 = vrot.slane %v1807_v63, 4  ;;  %v1767_v47 = vrot.slane %v1766_v15, 2 }
 0x3ee   :  { %v1809_v2 = vadd.f32 %v1808_v37, %v1807_v63  ;;  %v1768_v44 = vadd.f32 %v1767_v47, %v1766_v15 }
 0x3f0   :  { %v1810_v21 = vrot.slane %v1809_v2, 2  ;;  %v1769_v38 = vrot.slane %v1768_v44, 1 }
 0x3f2   :  { %v1811_v1 = vadd.f32 %v1810_v21, %v1809_v2  ;;  %v1770_v28 = vadd.f32 %v1769_v38, %v1768_v44  ;;  %v9873_v21 = vld [vmem:[#allocation34_spill] sm:$0xff] }
 0x3f4   :  { %v1812_v52 = vrot.slane %v1811_v1, 1  ;;  %v1814_v56 = vmul.f32 0.0033333334, %v1770_v28 }
 0x3f6   :  { %v1813_v50 = vadd.f32 %v1812_v52, %v1811_v1  ;;  %v1816_v53 = vadd.f32 1e-05, %v1814_v56 }
 0x3f8   :  { %v1815_v19 = vmul.f32 0.0033333334, %v1813_v50 }
 0x3fa   :  { %v1817_v16 = vadd.f32 1e-05, %v1815_v19 }
 0x3fc   :  { %5596 = vrsqrt.f32 %v1817_v16 }
 0x3fd   :  { %5598 = vrsqrt.f32 %v1816_v53 }
 0x409   :  { %v7161_v8 = vpop.eup %5596 }
 0x40a   :  { %v7163_v30 = vpop.eup %5598  ;;  %v1821_v24 = vmul.f32 %v7161_v8, %v6747_v58  ;;  %v1823_v28 = vmul.f32 %v7161_v8, %v6751_v54  ;;  %v1825_v56 = vmul.f32 %v7161_v8, %v6779_v6  ;;  %v1827_v1 = vmul.f32 %v7161_v8, %v6799_v40 }
 0x40b   :  { %v1820_v47 = vmul.f32 %v7163_v30, %v9872_v18  ;;  %v1822_v52 = vmul.f32 %v7163_v30, %v9873_v21  ;;  %v1824_v45 = vmul.f32 %v7163_v30, %v6611_v62  ;;  %v1826_v61 = vmul.f32 %v7163_v30, %v9874_v22 }
 0x40c   :  { %v1897_v44 = vmul.f32 0.01, %v1821_v24  ;;  %v1899_v50 = vmul.f32 0.01, %v1823_v28  ;;  %v1901_v58 = vmul.f32 0.01, %v1825_v56  ;;  %v1829_v54 = vmul.f32 %v7161_v8, %v6815_v33 }
 0x40d   :  { %v1896_v38 = vmul.f32 0.01, %v1820_v47  ;;  %v1898_v19 = vmul.f32 0.01, %v1822_v52  ;;  %v1903_v31 = vmul.f32 0.01, %v1827_v1  ;;  %v1831_v40 = vmul.f32 %v7161_v8, %v6833_v48 }
 0x40e   :  { %v1973_v34 = vmax.f32 %v1821_v24, %v1897_v44  ;;  %v1977_v37 = vmax.f32 %v1825_v56, %v1901_v58  ;;  %v1975_v42 = vmax.f32 %v1823_v28, %v1899_v50  ;;  %v1900_v16 = vmul.f32 0.01, %v1824_v45 }
 0x40f   :  { %v1972_v6 = vmax.f32 %v1820_v47, %v1896_v38  ;;  %v1974_v63 = vmax.f32 %v1822_v52, %v1898_v19  ;;  %v1979_v2 = vmax.f32 %v1827_v1, %v1903_v31  ;;  %v1902_v53 = vmul.f32 0.01, %v1826_v61 }
 0x410   :  { %v2125_v15 = vpack.c.bf16 %v1975_v42, %v1973_v34  ;;  %v1905_v62 = vmul.f32 0.01, %v1829_v54  ;;  %v1907_v24 = vmul.f32 0.01, %v1831_v40  ;;  %v1828_v33 = vmul.f32 %v7163_v30, %v6635_v0 }
 0x411   :  { %v2124_v18 = vpack.c.bf16 %v1974_v63, %v1972_v6  ;;  %v2127_v21 = vpack.c.bf16 %v1979_v2, %v1977_v37  ;;  %v1830_v48 = vmul.f32 %v7163_v30, %v6647_v13  ;;  %v1976_v47 = vmax.f32 %v1824_v45, %v1900_v16 }
 0x412   :  { %2578 = vmatprep.mubr.bf16.mxu1 %v2125_v15  ;;  %2801 = vmatprep.mubr.bf16.mxu0 %v2125_v15  ;;  %v1978_v52 = vmax.f32 %v1826_v61, %v1902_v53  ;;  %v1833_v28 = vmul.f32 %v7161_v8, %v6851_v20  ;;  %v1835_v56 = vmul.f32 %v7161_v8, %v6869_v14  ;;  %v1904_v38 = vmul.f32 0.01, %v1828_v33 }
 0x413   :  { %2579 = vmatmul.mubr.bf16.vlgmr.msra.gmra.mxu1 %v2124_v18  ;;  %2802 = vmatmul.mubr.bf16.vlgmr.msra.gmra.mxu0 %v2124_v18  ;;  %v1981_v1 = vmax.f32 %v1829_v54, %v1905_v62  ;;  %v1983_v44 = vmax.f32 %v1831_v40, %v1907_v24  ;;  %v1906_v19 = vmul.f32 0.01, %v1830_v48  ;;  %v1832_v0 = vmul.f32 %v7163_v30, %v6659_v59 }
 0x414   :  { %2588 = vmatprep.mubr.bf16.mxu1 %v2127_v21  ;;  %2811 = vmatprep.mubr.bf16.mxu0 %v2127_v21  ;;  %v2126_v50 = vpack.c.bf16 %v1978_v52, %v1976_v47  ;;  %v1909_v58 = vmul.f32 0.01, %v1833_v28  ;;  %v1911_v31 = vmul.f32 0.01, %v1835_v56  ;;  %v1834_v13 = vmul.f32 %v7163_v30, %v6671_v46 }
 0x415   :  { %v2129_v34 = vpack.c.bf16 %v1983_v44, %v1981_v1  ;;  %v1980_v20 = vmax.f32 %v1828_v33, %v1904_v38  ;;  %v1982_v14 = vmax.f32 %v1830_v48, %v1906_v19  ;;  %v1837_v45 = vmul.f32 %v7161_v8, %v6887_v17 }
 0x416   :  { %v1839_v22 = vmul.f32 %v7161_v8, %v6905_v32  ;;  %v1985_v61 = vmax.f32 %v1833_v28, %v1909_v58  ;;  %v1987_v54 = vmax.f32 %v1835_v56, %v1911_v31  ;;  %v1908_v6 = vmul.f32 0.01, %v1832_v0 }
 0x417   :  { %v1910_v63 = vmul.f32 0.01, %v1834_v13  ;;  %v2128_v40 = vpack.c.bf16 %v1982_v14, %v1980_v20  ;;  %v1913_v37 = vmul.f32 0.01, %v1837_v45  ;;  %v1836_v59 = vmul.f32 %v7163_v30, %v6685_v11 }
 0x418   :  { %v1915_v42 = vmul.f32 0.01, %v1839_v22  ;;  %v2131_v2 = vpack.c.bf16 %v1987_v54, %v1985_v61  ;;  %v1838_v46 = vmul.f32 %v7163_v30, %v6697_v36  ;;  %v1984_v17 = vmax.f32 %v1832_v0, %v1908_v6 }
 0x419   :  { %v1986_v32 = vmax.f32 %v1834_v13, %v1910_v63  ;;  %v1841_v15 = vmul.f32 %v7161_v8, %v6923_v35  ;;  %v1843_v16 = vmul.f32 %v7161_v8, %v6932_v23  ;;  %v1989_v53 = vmax.f32 %v1837_v45, %v1913_v37  ;;  %v9877_v37 = vld [vmem:[#allocation40_spill] sm:$0xff] }
 0x41a   :  { %v1991_v18 = vmax.f32 %v1839_v22, %v1915_v42  ;;  %v1912_v62 = vmul.f32 0.01, %v1836_v59  ;;  %v1914_v24 = vmul.f32 0.01, %v1838_v46  ;;  %v1840_v11 = vmul.f32 %v7163_v30, %v6713_v9 }
 0x41b   :  { %2589 = vmatmul.mubr.bf16.gmra.mxu1 %v2126_v50  ;;  %2812 = vmatmul.mubr.bf16.gmra.mxu0 %v2126_v50  ;;  %v2130_v21 = vpack.c.bf16 %v1986_v32, %v1984_v17  ;;  %v1917_v33 = vmul.f32 0.01, %v1841_v15  ;;  %v1919_v48 = vmul.f32 0.01, %v1843_v16  ;;  %v1842_v36 = vmul.f32 %v7163_v30, %v6729_v60  ;;  %v9875_v60 = vld [vmem:[#allocation38_spill] sm:$0xff] }
 0x41c   :  { %2598 = vmatprep.mubr.bf16.mxu1 %v2129_v34  ;;  %2821 = vmatprep.mubr.bf16.mxu0 %v2129_v34  ;;  %v2133_v47 = vpack.c.bf16 %v1991_v18, %v1989_v53  ;;  %v1988_v35 = vmax.f32 %v1836_v59, %v1912_v62  ;;  %v1990_v23 = vmax.f32 %v1838_v46, %v1914_v24  ;;  %v1916_v44 = vmul.f32 0.01, %v1840_v11 }
 0x41d   :  { %v1845_v52 = vmul.f32 %v7161_v8, %v6945_v7  ;;  %v1847_v28 = vmul.f32 %v7161_v8, %v6951_v12  ;;  %v1993_v56 = vmax.f32 %v1841_v15, %v1917_v33  ;;  %v1995_v1 = vmax.f32 %v1843_v16, %v1919_v48  ;;  %v9880_v48 = vld [vmem:[#allocation42_spill] sm:$0xff] }
 0x41e   :  { %v1918_v38 = vmul.f32 0.01, %v1842_v36  ;;  %v2132_v19 = vpack.c.bf16 %v1990_v23, %v1988_v35  ;;  %v1844_v9 = vmul.f32 %v7163_v30, %v6741_v25  ;;  %v1846_v7 = vmul.f32 %v7163_v30, %v9875_v60  ;;  %v9876_v25 = vld [vmem:[#allocation39_spill] sm:$0xff] }
 0x41f   :  { %v1921_v50 = vmul.f32 0.01, %v1845_v52  ;;  %v1923_v58 = vmul.f32 0.01, %v1847_v28  ;;  %v2135_v31 = vpack.c.bf16 %v1995_v1, %v1993_v56  ;;  %v1992_v34 = vmax.f32 %v1840_v11, %v1916_v44 }
 0x420   :  { %v1994_v12 = vmax.f32 %v1842_v36, %v1918_v38  ;;  %v1849_v0 = vmul.f32 %v7161_v8, %v6963_v57  ;;  %v1851_v13 = vmul.f32 %v7161_v8, %v6969_v55  ;;  %v1920_v45 = vmul.f32 0.01, %v1844_v9  ;;  %v9881_v36 = vld [vmem:[#allocation11_spill] sm:$0xff] }
 0x421   :  { %v1997_v20 = vmax.f32 %v1845_v52, %v1921_v50  ;;  %v1999_v14 = vmax.f32 %v1847_v28, %v1923_v58  ;;  %v1922_v22 = vmul.f32 0.01, %v1846_v7  ;;  %v1850_v57 = vmul.f32 %v7163_v30, %v9877_v37  ;;  %v9882_v58 = vld [vmem:[#allocation43_spill] sm:$0xff]  ;;  %v9887_v37 = vld [vmem:[#allocation4_spill] sm:$0xff] }
 0x422   :  { %v2134_v61 = vpack.c.bf16 %v1994_v12, %v1992_v34  ;;  %v1925_v54 = vmul.f32 0.01, %v1849_v0  ;;  %v1927_v6 = vmul.f32 0.01, %v1851_v13  ;;  %v1996_v42 = vmax.f32 %v1844_v9, %v1920_v45  ;;  %v9883_v9 = vld [vmem:[#allocation44_spill] sm:$0xff]  ;;  %v9884_v34 = vld [vmem:[#allocation13_spill] sm:$0xff] }
 0x423   :  { %2599 = vmatmul.mubr.bf16.gmra.mxu1 %v2128_v40  ;;  %2822 = vmatmul.mubr.bf16.gmra.mxu0 %v2128_v40  ;;  %v2137_v63 = vpack.c.bf16 %v1999_v14, %v1997_v20  ;;  %v1848_v40 = vmul.f32 %v7163_v30, %v9876_v25  ;;  %v1998_v55 = vmax.f32 %v1846_v7, %v1922_v22  ;;  %v1926_v16 = vmul.f32 0.01, %v1850_v57  ;;  %v9886_v25 = vld [vmem:[#allocation3_spill] sm:$0xff] }
 0x424   :  { %2608 = vmatprep.mubr.bf16.mxu1 %v2131_v2  ;;  %2831 = vmatprep.mubr.bf16.mxu0 %v2131_v2  ;;  %v9878_v2 = vld [vmem:[#allocation9_spill] sm:$0xff]  ;;  %v1855_v46 = vmul.f32 %v7161_v8, %v6987_v27  ;;  %v2001_v17 = vmax.f32 %v1849_v0, %v1925_v54  ;;  %v2003_v32 = vmax.f32 %v1851_v13, %v1927_v6  ;;  %v9885_v0 = vld [vmem:[#allocation14_spill] sm:$0xff] }
 0x425   :  { %v1853_v59 = vmul.f32 %v7161_v8, %v9878_v2  ;;  %v1924_v15 = vmul.f32 0.01, %v1848_v40  ;;  %v2136_v53 = vpack.c.bf16 %v1998_v55, %v1996_v42  ;;  %v2002_v27 = vmax.f32 %v1850_v57, %v1926_v16  ;;  %v9888_v2 = vld [vmem:[#allocation21_spill] sm:$0xff] }
 0x426   :  { %v1931_v62 = vmul.f32 0.01, %v1855_v46  ;;  %v2139_v24 = vpack.c.bf16 %v2003_v32, %v2001_v17  ;;  %v1857_v35 = vmul.f32 %v7161_v8, %v9881_v36  ;;  %v1859_v23 = vmul.f32 %v7161_v8, %v7005_v39 }
 0x427   :  { %v1929_v18 = vmul.f32 0.01, %v1853_v59  ;;  %v2000_v11 = vmax.f32 %v1848_v40, %v1924_v15  ;;  %v1858_v60 = vmul.f32 %v7163_v30, %v9883_v9  ;;  %v1861_v12 = vmul.f32 %v7161_v8, %v9884_v34 }
 0x428   :  { %v2007_v28 = vmax.f32 %v1855_v46, %v1931_v62  ;;  %v1933_v38 = vmul.f32 0.01, %v1857_v35  ;;  %v1863_v13 = vmul.f32 %v7161_v8, %v9885_v0  ;;  %v1860_v40 = vmul.f32 %v7163_v30, %v9886_v25 }
 0x429   :  { %v2005_v52 = vmax.f32 %v1853_v59, %v1929_v18  ;;  %v2138_v44 = vpack.c.bf16 %v2002_v27, %v2000_v11  ;;  %v1934_v22 = vmul.f32 0.01, %v1858_v60  ;;  %v1937_v54 = vmul.f32 0.01, %v1861_v12  ;;  %v9891_v27 = vld [vmem:[#allocation23_spill] sm:$0xff] }
 0x42a   :  { %v2009_v20 = vmax.f32 %v1857_v35, %v1933_v38  ;;  %v1939_v6 = vmul.f32 0.01, %v1863_v13  ;;  %v1862_v57 = vmul.f32 %v7163_v30, %v9887_v37  ;;  %v1865_v59 = vmul.f32 %v7161_v8, %v9888_v2 }
 0x42b   :  { %2609 = vmatmul.mubr.bf16.gmra.mxu1 %v2130_v21  ;;  %2832 = vmatmul.mubr.bf16.gmra.mxu0 %v2130_v21  ;;  %v9879_v21 = vld [vmem:[#allocation41_spill] sm:$0xff]  ;;  %v2141_v50 = vpack.c.bf16 %v2007_v28, %v2005_v52  ;;  %v2010_v55 = vmax.f32 %v1858_v60, %v1934_v22  ;;  %v1867_v46 = vmul.f32 %v7161_v8, %v7041_v4  ;;  %v1936_v15 = vmul.f32 0.01, %v1860_v40 }
 0x42c   :  { %2618 = vmatprep.mubr.bf16.mxu1 %v2133_v47  ;;  %2841 = vmatprep.mubr.bf16.mxu0 %v2133_v47  ;;  %v1852_v33 = vmul.f32 %v7163_v30, %v9879_v21  ;;  %v1854_v47 = vmul.f32 %v7163_v30, %v9880_v48  ;;  %v2013_v17 = vmax.f32 %v1861_v12, %v1937_v54  ;;  %v1938_v16 = vmul.f32 0.01, %v1862_v57  ;;  %v9889_v21 = vld [vmem:[#allocation5_spill] sm:$0xff]  ;;  %v9890_v48 = vld [vmem:[#allocation6_spill] sm:$0xff] }
 0x42d   :  { %v2015_v32 = vmax.f32 %v1863_v13, %v1939_v6  ;;  %v1941_v18 = vmul.f32 0.01, %v1865_v59  ;;  %v1943_v62 = vmul.f32 0.01, %v1867_v46  ;;  %v2012_v11 = vmax.f32 %v1860_v40, %v1936_v15  ;;  %v9895_v6 = vld [vmem:[#allocation12_spill] sm:$0xff] }
 0x42e   :  { %v1928_v56 = vmul.f32 0.01, %v1852_v33  ;;  %v1930_v1 = vmul.f32 0.01, %v1854_v47  ;;  %v2014_v4 = vmax.f32 %v1862_v57, %v1938_v16  ;;  %v1869_v36 = vmul.f32 %v7161_v8, %v9891_v27  ;;  %v9897_v16 = vld [vmem:[#allocation16_spill] sm:$0xff] }
 0x42f   :  { %v1871_v35 = vmul.f32 %v7161_v8, %v7059_v43  ;;  %v2019_v52 = vmax.f32 %v1867_v46, %v1943_v62  ;;  %v1877_v25 = vmul.f32 %v7161_v8, %v7089_v29  ;;  %v1879_v40 = vmul.f32 %v7161_v8, %v7095_v10 }
 0x430   :  { %v2004_v7 = vmax.f32 %v1852_v33, %v1928_v56  ;;  %v2006_v39 = vmax.f32 %v1854_v47, %v1930_v1  ;;  %v1864_v33 = vmul.f32 %v7163_v30, %v9889_v21  ;;  %v1866_v47 = vmul.f32 %v7163_v30, %v9890_v48 }
 0x431   :  { %v2144_v1 = vpack.c.bf16 %v2014_v4, %v2012_v11  ;;  %v1947_v38 = vmul.f32 0.01, %v1871_v35  ;;  %v1955_v46 = vmul.f32 0.01, %v1879_v40  ;;  %v1878_v29 = vmul.f32 %v7163_v30, %v9897_v16 }
 0x432   :  { %v1940_v28 = vmul.f32 0.01, %v1864_v33  ;;  %v1942_v56 = vmul.f32 0.01, %v1866_v47  ;;  %v1883_v62 = vmul.f32 %v7161_v8, %v7113_v3 }
 0x433   :  { %2619 = vmatmul.mubr.bf16.gmra.mxu1 %v2132_v19  ;;  %2842 = vmatmul.mubr.bf16.gmra.mxu0 %v2132_v19  ;;  %v1935_v19 = vmul.f32 0.01, %v1859_v23  ;;  %v2023_v12 = vmax.f32 %v1871_v35, %v1947_v38  ;;  %v2031_v21 = vmax.f32 %v1879_v40, %v1955_v46  ;;  %v1954_v48 = vmul.f32 0.01, %v1878_v29 }
 0x434   :  { %2628 = vmatprep.mubr.bf16.mxu1 %v2135_v31  ;;  %2851 = vmatprep.mubr.bf16.mxu0 %v2135_v31  ;;  %v1856_v31 = vmul.f32 %v7163_v30, %v9882_v58  ;;  %v2016_v60 = vmax.f32 %v1864_v33, %v1940_v28  ;;  %v2018_v43 = vmax.f32 %v1866_v47, %v1942_v56  ;;  %v1959_v4 = vmul.f32 0.01, %v1883_v62  ;;  %v9899_v28 = vld [vmem:[#allocation18_spill] sm:$0xff] }
 0x435   :  { %v2011_v14 = vmax.f32 %v1859_v23, %v1935_v19  ;;  %v2017_v23 = vmax.f32 %v1865_v59, %v1941_v18  ;;  %v1953_v59 = vmul.f32 0.01, %v1877_v25  ;;  %v1881_v18 = vmul.f32 %v7161_v8, %v7107_v5 }
 0x436   :  { %v1932_v45 = vmul.f32 0.01, %v1856_v31  ;;  %v1882_v5 = vmul.f32 %v7163_v30, %v7083_v51  ;;  %v2030_v3 = vmax.f32 %v1878_v29, %v1954_v48  ;;  %v1887_v56 = vmul.f32 %v7161_v8, %v9899_v28  ;;  %v9900_v51 = vld [vmem:[#allocation24_spill] sm:$0xff] }
 0x437   :  { %v2147_v19 = vpack.c.bf16 %v2019_v52, %v2017_v23  ;;  %v1957_v11 = vmul.f32 0.01, %v1881_v18  ;;  %v1885_v52 = vmul.f32 %v7161_v8, %v7121_v26 }
 0x438   :  { %v2008_v42 = vmax.f32 %v1856_v31, %v1932_v45  ;;  %v9893_v31 = vld [vmem:[#allocation8_spill] sm:$0xff] }
 0x439   :  { %v1870_v9 = vmul.f32 %v7163_v30, %v9893_v31  ;;  %v1963_v31 = vmul.f32 0.01, %v1887_v56 }
 0x43b   :  { %2629 = vmatmul.mubr.bf16.gmra.mxu1 %v2134_v61  ;;  %2852 = vmatmul.mubr.bf16.gmra.mxu0 %v2134_v61  ;;  %v2140_v61 = vpack.c.bf16 %v2006_v39, %v2004_v7  ;;  %v1873_v7 = vmul.f32 %v7161_v8, %v7071_v41  ;;  %v1875_v39 = vmul.f32 %v7161_v8, %v7077_v49  ;;  %v1946_v13 = vmul.f32 0.01, %v1870_v9 }
 0x43c   :  { %2638 = vmatprep.mubr.bf16.mxu1 %v2137_v63  ;;  %2861 = vmatprep.mubr.bf16.mxu0 %v2137_v63  ;;  %v2143_v63 = vpack.c.bf16 %v2011_v14, %v2009_v20  ;;  %v2146_v20 = vpack.c.bf16 %v2018_v43, %v2016_v60  ;;  %v1874_v41 = vmul.f32 %v7163_v30, %v9895_v6  ;;  %v9901_v43 = vld [vmem:[#allocation28_spill] sm:$0xff] }
 0x43d   :  { %v1949_v14 = vmul.f32 0.01, %v1873_v7  ;;  %v1951_v45 = vmul.f32 0.01, %v1875_v39  ;;  %v2022_v49 = vmax.f32 %v1870_v9, %v1946_v13  ;;  %v1884_v60 = vmul.f32 %v7163_v30, %v9900_v51 }
 0x43e   :  { %v1886_v26 = vmul.f32 %v7163_v30, %v9901_v43 }
 0x43f   :  { %v2025_v37 = vmax.f32 %v1873_v7, %v1949_v14  ;;  %v2027_v57 = vmax.f32 %v1875_v39, %v1951_v45  ;;  %v2039_v14 = vmax.f32 %v1887_v56, %v1963_v31  ;;  %v1960_v45 = vmul.f32 0.01, %v1884_v60  ;;  %v5562_v31 = vld [vmem:[%s9450_s4 + $0x38] sm:$0xff]  }
 0x440   :  { %4756 = vmatpush1.bf16.msra.mxu1 %v5562_v31 }
 0x443   :  { %2639 = vmatmul.mubr.bf16.gmra.mxu1 %v2136_v53  ;;  %2862 = vmatmul.mubr.bf16.gmra.mxu0 %v2136_v53  ;;  %v2142_v53 = vpack.c.bf16 %v2010_v55, %v2008_v42  ;;  %v1950_v55 = vmul.f32 0.01, %v1874_v41 }
 0x444   :  { %2648 = vmatprep.mubr.bf16.mxu1 %v2139_v24  ;;  %2871 = vmatprep.mubr.bf16.mxu0 %v2139_v24  ;;  %v2145_v24 = vpack.c.bf16 %v2015_v32, %v2013_v17  ;;  %v2151_v17 = vpack.c.bf16 %v2027_v57, %v2025_v37  ;;  %v9896_v32 = vld [vmem:[#allocation15_spill] sm:$0xff]  ;;  %v9906_v37 = vld [vmem:[#allocation30_spill] sm:$0xff] }
 0x445   :  { %v1876_v15 = vmul.f32 %v7163_v30, %v9896_v32  ;;  %v2026_v10 = vmax.f32 %v1874_v41, %v1950_v55  ;;  %v1890_v57 = vmul.f32 %v7163_v30, %v9906_v37 }
 0x447   :  { %v1952_v33 = vmul.f32 0.01, %v1876_v15 }
 0x449   :  { %v2028_v23 = vmax.f32 %v1876_v15, %v1952_v33  ;;  %v9908_v15 = vld [vmem:[#allocation32_spill] sm:$0xff] }
 0x44a   :  { %v1894_v16 = vmul.f32 %v7163_v30, %v9908_v15 }
 0x44b   :  { %2649 = vmatmul.mubr.bf16.gmra.mxu1 %v2138_v44  ;;  %2872 = vmatmul.mubr.bf16.gmra.mxu0 %v2138_v44  ;;  %v1945_v44 = vmul.f32 0.01, %v1869_v36 }
 0x44c   :  { %2658 = vmatprep.mubr.bf16.mxu1 %v2141_v50  ;;  %2881 = vmatprep.mubr.bf16.mxu0 %v2141_v50  ;;  %v9892_v50 = vld [vmem:[#allocation7_spill] sm:$0xff] }
 0x44d   :  { %v1868_v58 = vmul.f32 %v7163_v30, %v9892_v50  ;;  %v2021_v34 = vmax.f32 %v1869_v36, %v1945_v44  ;;  %v9898_v36 = vld [vmem:[#allocation17_spill] sm:$0xff]  ;;  %v2035_v44 = vmax.f32 %v1883_v62, %v1959_v4  ;;  %v2152_v50 = vpack.c.bf16 %v2030_v3, %v2028_v23  ;;  %v9910_v4 = vld [vmem:[#allocation31_spill] sm:$0xff] }
 0x44e   :  { %v1880_v35 = vmul.f32 %v7163_v30, %v9898_v36 }
 0x44f   :  { %v1944_v0 = vmul.f32 0.01, %v1868_v58  ;;  %v2149_v22 = vpack.c.bf16 %v2023_v12, %v2021_v34  ;;  %v9902_v34 = vld [vmem:[#allocation36_spill] sm:$0xff] }
 0x450   :  { %v1956_v38 = vmul.f32 0.01, %v1880_v35  ;;  %v1889_v12 = vmul.f32 %v7161_v8, %v9902_v34 }
 0x452   :  { %v2032_v7 = vmax.f32 %v1880_v35, %v1956_v38  ;;  %v1965_v41 = vmul.f32 0.01, %v1889_v12 }
 0x453   :  { %2659 = vmatmul.mubr.bf16.gmra.mxu1 %v2140_v61  ;;  %2882 = vmatmul.mubr.bf16.gmra.mxu0 %v2140_v61  ;;  %v9894_v61 = vld [vmem:[#allocation10_spill] sm:$0xff] }
 0x454   :  { %2668 = vmatprep.mubr.bf16.mxu1 %v2143_v63  ;;  %2891 = vmatprep.mubr.bf16.mxu0 %v2143_v63  ;;  %v1872_v54 = vmul.f32 %v7163_v30, %v9894_v61  ;;  %v2020_v63 = vmax.f32 %v1868_v58, %v1944_v0  ;;  %v1961_v58 = vmul.f32 0.01, %v1885_v52  ;;  %v9903_v0 = vld [vmem:[#allocation19_spill] sm:$0xff] }
 0x455   :  { %v1891_v13 = vmul.f32 %v7161_v8, %v9903_v0  ;;  %v5563_v0 = vld [vmem:[%s9450_s4 + $0x30] sm:$0xff]  }
 0x456   :  { %v1948_v42 = vmul.f32 0.01, %v1872_v54  ;;  %v2148_v2 = vpack.c.bf16 %v2022_v49, %v2020_v63 }
 0x457   :  { %v1967_v63 = vmul.f32 0.01, %v1891_v13 }
 0x459   :  { %v2043_v46 = vmax.f32 %v1891_v13, %v1967_v63 }
 0x45b   :  { %2669 = vmatmul.mubr.bf16.gmra.mxu1 %v2142_v53  ;;  %2892 = vmatmul.mubr.bf16.gmra.mxu0 %v2142_v53  ;;  %v2024_v53 = vmax.f32 %v1872_v54, %v1948_v42  ;;  %v9904_v54 = vld [vmem:[#allocation25_spill] sm:$0xff]  ;;  %v2036_v42 = vmax.f32 %v1884_v60, %v1960_v45  ;;  %v9919_v60 = vmov 0  }
 0x45c   :  { %2678 = vmatprep.mubr.bf16.mxu1 %v2145_v24  ;;  %2901 = vmatprep.mubr.bf16.mxu0 %v2145_v24  ;;  %v2029_v24 = vmax.f32 %v1877_v25, %v1953_v59  ;;  %v1895_v6 = vmul.f32 %v7161_v8, %v9904_v54  ;;  %v9905_v25 = vld [vmem:[#allocation29_spill] sm:$0xff]  ;;  %v2041_v59 = vmax.f32 %v1889_v12, %v1965_v41 }
 0x45d   :  { %v2150_v47 = vpack.c.bf16 %v2026_v10, %v2024_v53  ;;  %v1888_v40 = vmul.f32 %v7163_v30, %v9905_v25  ;;  %v1966_v53 = vmul.f32 0.01, %v1890_v57  ;;  %4757 = vmatprep.subr.bf16.mxu1 %v9919_v60 }
 0x45e   :  { %v2153_v27 = vpack.c.bf16 %v2031_v21, %v2029_v24  ;;  %v2159_v62 = vpack.c.bf16 %v2043_v46, %v2041_v59  ;;  %v1970_v21 = vmul.f32 0.01, %v1894_v16  ;;  %4758 = vmatpush1.bf16.msra.mxu1 %v5563_v0 }
 0x45f   :  { %v1964_v29 = vmul.f32 0.01, %v1888_v40  ;;  %v2042_v48 = vmax.f32 %v1890_v57, %v1966_v53  ;;  %4759 = vmatprep.subr.bf16.mxu1 %v9919_v60 }
 0x460   :  { %v2046_v36 = vmax.f32 %v1894_v16, %v1970_v21 }
 0x461   :  { %v2040_v33 = vmax.f32 %v1888_v40, %v1964_v29 }
 0x463   :  { %2679 = vmatmul.mubr.bf16.gmra.mxu1 %v2144_v1  ;;  %2902 = vmatmul.mubr.bf16.gmra.mxu0 %v2144_v1  ;;  %v2033_v1 = vmax.f32 %v1881_v18, %v1957_v11  ;;  %v2158_v35 = vpack.c.bf16 %v2042_v48, %v2040_v33 }
 0x464   :  { %2688 = vmatprep.mubr.bf16.mxu1 %v2147_v19  ;;  %2911 = vmatprep.mubr.bf16.mxu0 %v2147_v19  ;;  %v1958_v19 = vmul.f32 0.01, %v1882_v5 }
 0x465   :  { %v2155_v9 = vpack.c.bf16 %v2035_v44, %v2033_v1 }
 0x466   :  { %v2034_v39 = vmax.f32 %v1882_v5, %v1958_v19 }
 0x468   :  { %v2154_v61 = vpack.c.bf16 %v2034_v39, %v2032_v7 }
 0x46b   :  { %2689 = vmatmul.mubr.bf16.gmra.mxu1 %v2146_v20  ;;  %2912 = vmatmul.mubr.bf16.gmra.mxu0 %v2146_v20  ;;  %v2037_v20 = vmax.f32 %v1885_v52, %v1961_v58 }
 0x46c   :  { %2698 = vmatprep.mubr.bf16.mxu1 %v2149_v22  ;;  %2921 = vmatprep.mubr.bf16.mxu0 %v2149_v22  ;;  %v1962_v22 = vmul.f32 0.01, %v1886_v26 }
 0x46d   :  { %v2157_v49 = vpack.c.bf16 %v2039_v14, %v2037_v20 }
 0x46e   :  { %v2038_v55 = vmax.f32 %v1886_v26, %v1962_v22 }
 0x470   :  { %v2156_v10 = vpack.c.bf16 %v2038_v55, %v2036_v42 }
 0x473   :  { %2699 = vmatmul.mubr.bf16.gmra.mxu1 %v2148_v2  ;;  %2922 = vmatmul.mubr.bf16.gmra.mxu0 %v2148_v2  ;;  %v1971_v2 = vmul.f32 0.01, %v1895_v6 }
 0x474   :  { %2708 = vmatprep.mubr.bf16.mxu1 %v2151_v17  ;;  %2931 = vmatprep.mubr.bf16.mxu0 %v2151_v17  ;;  %v9907_v17 = vld [vmem:[#allocation37_spill] sm:$0xff] }
 0x475   :  { %v1893_v32 = vmul.f32 %v7161_v8, %v9907_v17  ;;  %v2047_v18 = vmax.f32 %v1895_v6, %v1971_v2  ;;  %v1892_v8 = vmul.f32 %v7163_v30, %v9910_v4 }
 0x477   :  { %v1969_v24 = vmul.f32 0.01, %v1893_v32  ;;  %v1968_v23 = vmul.f32 0.01, %v1892_v8 }
 0x479   :  { %v2044_v52 = vmax.f32 %v1892_v8, %v1968_v23 }
 0x47b   :  { %2709 = vmatmul.mubr.bf16.gmra.mxu1 %v2150_v47  ;;  %2932 = vmatmul.mubr.bf16.gmra.mxu0 %v2150_v47  ;;  %v9909_v47 = vld [vmem:[#allocation2_spill] sm:$0xff] }
 0x47c   :  { %2718 = vmatprep.mubr.bf16.mxu1 %v2153_v27  ;;  %2941 = vmatprep.mubr.bf16.mxu0 %v2153_v27  ;;  %v2123_v11 = vmul.f32 %v9909_v47, %v2047_v18  ;;  %v2045_v27 = vmax.f32 %v1893_v32, %v1969_v24  ;;  %v2122_v3 = vmul.f32 %v9909_v47, %v2046_v36 }
 0x47e   :  { %v2161_v5 = vpack.c.bf16 %v2123_v11, %v2045_v27  ;;  %v2160_v28 = vpack.c.bf16 %v2122_v3, %v2044_v52 }
 0x483   :  { %2719 = vmatmul.mubr.bf16.gmra.mxu1 %v2152_v50  ;;  %2942 = vmatmul.mubr.bf16.gmra.mxu0 %v2152_v50 }
 0x484   :  { %2728 = vmatprep.mubr.bf16.mxu1 %v2155_v9  ;;  %2951 = vmatprep.mubr.bf16.mxu0 %v2155_v9 }
 0x48b   :  { %2729 = vmatmul.mubr.bf16.gmra.mxu1 %v2154_v61  ;;  %2952 = vmatmul.mubr.bf16.gmra.mxu0 %v2154_v61 }
 0x48c   :  { %2738 = vmatprep.mubr.bf16.mxu1 %v2157_v49  ;;  %2961 = vmatprep.mubr.bf16.mxu0 %v2157_v49 }
 0x493   :  { %2739 = vmatmul.mubr.bf16.gmra.mxu1 %v2156_v10  ;;  %2962 = vmatmul.mubr.bf16.gmra.mxu0 %v2156_v10 }
 0x494   :  { %2748 = vmatprep.mubr.bf16.mxu1 %v2159_v62  ;;  %2971 = vmatprep.mubr.bf16.mxu0 %v2159_v62 }
 0x49b   :  { %2749 = vmatmul.mubr.bf16.gmra.mxu1 %v2158_v35  ;;  %2972 = vmatmul.mubr.bf16.gmra.mxu0 %v2158_v35 }
 0x49c   :  { %2758 = vmatprep.mubr.bf16.mxu1 %v2161_v5  ;;  %2981 = vmatprep.mubr.bf16.mxu0 %v2161_v5 }
 0x4a3   :  { %2759 = vmatmul.mubr.bf16.gmra.mxu1 %v2160_v28  ;;  %2982 = vmatmul.mubr.bf16.gmra.mxu0 %v2160_v28 }
 0x4d3   :  { %v7319_v56 = vpop.f32.mrf.mxu1  ;;  %v7321_v1 = vpop.f32.mrf.mxu0 }
 0x4d4   :  { %9911 = vst [vmem:[#allocation20_spill] sm:$0xff] %v7319_v56  ;;  %9912 = vst [vmem:[#allocation22_spill] sm:$0xff] %v7321_v1 }
 0x4d5   :  { %v7323_v30 = vpop.f32.mrf.mxu1  ;;  %v7325_v44 = vpop.f32.mrf.mxu0 }
 0x4d6   :  { %9913 = vst [vmem:[#allocation26_spill] sm:$0xff] %v7325_v44 }
 0x4d7   :  { %v7327_v38 = vpop.f32.mrf.mxu1  ;;  %v7329_v19 = vpop.f32.mrf.mxu0 }
 0x4d8   :  { %9914 = vst [vmem:[#allocation27_spill] sm:$0xff] %v7327_v38  ;;  %9915 = vst [vmem:[#allocation33_spill] sm:$0xff] %v7329_v19 }
 0x4d9   :  { %v7331_v50 = vpop.f32.mrf.mxu1  ;;  %v7333_v58 = vpop.f32.mrf.mxu0 }
 0x4da   :  { %9916 = vst [vmem:[#allocation34_spill] sm:$0xff] %v7333_v58 }
 0x4db   :  { %v7338_v9 = vpop.f32.mrf.mxu1  ;;  %v7340_v51 = vpop.f32.mrf.mxu0 }
 0x4dc   :  { %9917 = vst [vmem:[#allocation35_spill] sm:$0xff] %v7338_v9  ;;  %9918 = vst [vmem:[#allocation38_spill] sm:$0xff] %v7340_v51 }
 0x4dd   :  { %v7343_v43 = vpop.f32.mrf.mxu1  ;;  %v7345_v26 = vpop.f32.mrf.mxu0 }
 0x4de   :  { %9920 = vst [vmem:[#allocation39_spill] sm:$0xff] %v7345_v26 }
 0x4df   :  { %v7347_v7 = vpop.f32.mrf.mxu1  ;;  %v7349_v39 = vpop.f32.mrf.mxu0 }
 0x4e0   :  { %9921 = vst [vmem:[#allocation40_spill] sm:$0xff] %v7347_v7  ;;  %9922 = vst [vmem:[#allocation9_spill] sm:$0xff] %v7349_v39 }
 0x4e1   :  { %v7351_v34 = vpop.f32.mrf.mxu1  ;;  %v7353_v12 = vpop.f32.mrf.mxu0 }
 0x4e2   :  { %9923 = vst [vmem:[#allocation41_spill] sm:$0xff] %v7353_v12 }
 0x4e3   :  { %v7358_v13 = vpop.f32.mrf.mxu1  ;;  %v7360_v20 = vpop.f32.mrf.mxu0 }
 0x4e4   :  { %9924 = vst [vmem:[#allocation42_spill] sm:$0xff] %v7358_v13  ;;  %9925 = vst [vmem:[#allocation11_spill] sm:$0xff] %v7360_v20 }
 0x4e5   :  { %v7362_v14 = vpop.f32.mrf.mxu1  ;;  %v7364_v45 = vpop.f32.mrf.mxu0 }
 0x4e6   :  { %9926 = vst [vmem:[#allocation43_spill] sm:$0xff] %v7364_v45 }
 0x4e7   :  { %v7367_v22 = vpop.f32.mrf.mxu1  ;;  %v7369_v61 = vpop.f32.mrf.mxu0 }
 0x4e8   :  { %9927 = vst [vmem:[#allocation44_spill] sm:$0xff] %v7367_v22  ;;  %9928 = vst [vmem:[#allocation13_spill] sm:$0xff] %v7369_v61 }
 0x4e9   :  { %v7371_v54 = vpop.f32.mrf.mxu1  ;;  %v7373_v6 = vpop.f32.mrf.mxu0 }
 0x4ea   :  { %9929 = vst [vmem:[#allocation14_spill] sm:$0xff] %v7373_v6 }
 0x4eb   :  { %v7375_v41 = vpop.f32.mrf.mxu1  ;;  %v7377_v63 = vpop.f32.mrf.mxu0 }
 0x4ec   :  { %9930 = vst [vmem:[#allocation3_spill] sm:$0xff] %v7375_v41  ;;  %9931 = vst [vmem:[#allocation4_spill] sm:$0xff] %v7377_v63 }
 0x4ed   :  { %v7379_v49 = vpop.f32.mrf.mxu1  ;;  %v7381_v25 = vpop.f32.mrf.mxu0 }
 0x4ee   :  { %9932 = vst [vmem:[#allocation21_spill] sm:$0xff] %v7381_v25 }
 0x4ef   :  { %v7383_v40 = vpop.f32.mrf.mxu1  ;;  %v7385_v37 = vpop.f32.mrf.mxu0 }
 0x4f0   :  { %9933 = vst [vmem:[#allocation5_spill] sm:$0xff] %v7385_v37 }
 0x4f1   :  { %v7387_v57 = vpop.f32.mrf.mxu1  ;;  %v7389_v42 = vpop.f32.mrf.mxu0 }
 0x4f2   :  { %9934 = vst [vmem:[#allocation6_spill] sm:$0xff] %v7387_v57  ;;  %9935 = vst [vmem:[#allocation23_spill] sm:$0xff] %v7389_v42 }
 0x4f3   :  { %v7391_v55 = vpop.f32.mrf.mxu1  ;;  %v7393_v2 = vpop.f32.mrf.mxu0 }
 0x4f4   :  { %9936 = vst [vmem:[#allocation7_spill] sm:$0xff] %v7391_v55  ;;  %9937 = vst [vmem:[#allocation8_spill] sm:$0xff] %v7393_v2 }
 0x4f5   :  { %v7395_v59 = vpop.f32.mrf.mxu1  ;;  %v7397_v46 = vpop.f32.mrf.mxu0 }
 0x4f6   :  { %9938 = vst [vmem:[#allocation10_spill] sm:$0xff] %v7395_v59  ;;  %9939 = vst [vmem:[#allocation12_spill] sm:$0xff] %v7397_v46 }
 0x4f7   :  { %v7399_v17 = vpop.f32.mrf.mxu1  ;;  %v7401_v32 = vpop.f32.mrf.mxu0 }
 0x4f8   :  { %9940 = vst [vmem:[#allocation15_spill] sm:$0xff] %v7401_v32 }
 0x4f9   :  { %v7403_v15 = vpop.f32.mrf.mxu1  ;;  %v7405_v16 = vpop.f32.mrf.mxu0 }
 0x4fa   :  { %9941 = vst [vmem:[#allocation16_spill] sm:$0xff] %v7403_v15  ;;  %9942 = vst [vmem:[#allocation17_spill] sm:$0xff] %v7405_v16 }
 0x4fb   :  { %v7407_v29 = vpop.f32.mrf.mxu1  ;;  %v7409_v53 = vpop.f32.mrf.mxu0 }
 0x4fc   :  { %9943 = vst [vmem:[#allocation18_spill] sm:$0xff] %v7407_v29  ;;  %9944 = vst [vmem:[#allocation24_spill] sm:$0xff] %v7409_v53 }
 0x4fd   :  { %v7411_v10 = vpop.f32.mrf.mxu1  ;;  %v7413_v18 = vpop.f32.mrf.mxu0 }
 0x4fe   :  { %9945 = vst [vmem:[#allocation28_spill] sm:$0xff] %v7411_v10  ;;  %9946 = vst [vmem:[#allocation36_spill] sm:$0xff] %v7413_v18 }
 0x4ff   :  { %v7415_v62 = vpop.f32.mrf.mxu1  ;;  %v7417_v24 = vpop.f32.mrf.mxu0 }
 0x500   :  { %9947 = vst [vmem:[#allocation19_spill] sm:$0xff] %v7417_v24 }
 0x501   :  { %v7419_v21 = vpop.f32.mrf.mxu1  ;;  %v7421_v33 = vpop.f32.mrf.mxu0 }
 0x502   :  { %9948 = vst [vmem:[#allocation25_spill] sm:$0xff] %v7419_v21  ;;  %9949 = vst [vmem:[#allocation29_spill] sm:$0xff] %v7421_v33 }
 0x503   :  { %v7423_v48 = vpop.f32.mrf.mxu1  ;;  %v7425_v11 = vpop.f32.mrf.mxu0 }
 0x504   :  { %9950 = vst [vmem:[#allocation30_spill] sm:$0xff] %v7423_v48  ;;  %9951 = vst [vmem:[#allocation37_spill] sm:$0xff] %v7425_v11 }
 0x505   :  { %v7427_v4 = vpop.f32.mrf.mxu1  ;;  %v7429_v8 = vpop.f32.mrf.mxu0 }
 0x506   :  { %9952 = vst [vmem:[#allocation32_spill] sm:$0xff] %v7427_v4  ;;  %9953 = vst [vmem:[#allocation31_spill] sm:$0xff] %v7429_v8 }
 0x507   :  { %v7431_v27 = vpop.f32.mrf.mxu1  ;;  %v7433_v36 = vpop.f32.mrf.mxu0 }
 0x508   :  { %9954 = vst [vmem:[#allocation45_spill] sm:$0xff] %v7433_v36 }
 0x509   :  { %v7435_v35 = vpop.f32.mrf.mxu1  ;;  %v7437_v5 = vpop.f32.mrf.mxu0 }
 0x50a   :  { %9955 = vst [vmem:[#allocation46_spill] sm:$0xff] %v7435_v35  ;;  %9956 = vst [vmem:[#allocation47_spill] sm:$0xff] %v7437_v5 }
 0x50b   :  { %v7439_v23 = vpop.f32.mrf.mxu1  ;;  %v7441_v3 = vpop.f32.mrf.mxu0 }
 0x50c   :  { %9957 = vst [vmem:[#allocation48_spill] sm:$0xff] %v7439_v23  ;;  %9958 = vst [vmem:[#allocation49_spill] sm:$0xff] %v7441_v3 }
 0x50d   :  { %v7443_v52 = vpop.f32.mrf.mxu1  ;;  %v7445_v28 = vpop.f32.mrf.mxu0 }
 0x50e   :  { %9959 = vst [vmem:[#allocation50_spill] sm:$0xff] %v7443_v52  ;;  %9960 = vst [vmem:[#allocation51_spill] sm:$0xff] %v7445_v28 }
 0x50f   :  { %v7447_v31 = vpop.f32.mrf.mxu1  ;;  %v7449_v0 = vpop.f32.mrf.mxu0 }
 0x510   :  { %9961 = vst [vmem:[#allocation52_spill] sm:$0xff] %v7447_v31  ;;  %9962 = vst [vmem:[#allocation53_spill] sm:$0xff] %v7449_v0 }
 0x511   :  { %v7451_v47 = vpop.f32.mrf.mxu1  ;;  %v7453_v60 = vpop.f32.mrf.mxu0 }
 0x512   :  { %9963 = vst [vmem:[#allocation54_spill] sm:$0xff] %v7451_v47  ;;  %9964 = vst [vmem:[#allocation55_spill] sm:$0xff] %v7453_v60 }
 0x513   :  { %v7455_v8 = vpop.f32.mrf.mxu1  ;;  %v7457_v33 = vpop.f32.mrf.mxu0 }
 0x514   :  { %9965 = vst [vmem:[#allocation56_spill] sm:$0xff] %v7455_v8  ;;  %9966 = vst [vmem:[#allocation57_spill] sm:$0xff] %v7457_v33 }
 0x515   :  { %v7459_v5 = vpop.f32.mrf.mxu1  ;;  %v7461_v18 = vpop.f32.mrf.mxu0 }
 0x516   :  { %9967 = vst [vmem:[#allocation58_spill] sm:$0xff] %v7459_v5  ;;  %9968 = vst [vmem:[#allocation59_spill] sm:$0xff] %v7461_v18  ;;  %v2992_v18 = vadd.f32 %v7327_v38, %v7319_v56 }
 0x517   :  { %v7463_v16 = vpop.f32.mrf.mxu1  ;;  %v7465_v46 = vpop.f32.mrf.mxu0 }
 0x518   :  { %9969 = vst [vmem:[#allocation60_spill] sm:$0xff] %v7463_v16  ;;  %9970 = vst [vmem:[#allocation61_spill] sm:$0xff] %v7465_v46 }
 0x519   :  { %v7467_v28 = vpop.f32.mrf.mxu1  ;;  %v7469_v42 = vpop.f32.mrf.mxu0 }
 0x51a   :  { %9971 = vst [vmem:[#allocation62_spill] sm:$0xff] %v7467_v28  ;;  %9972 = vst [vmem:[#allocation63_spill] sm:$0xff] %v7469_v42  ;;  %v2993_v42 = vadd.f32 %v2992_v18, %v7338_v9 }
 0x51b   :  { %v7471_v25 = vpop.f32.mrf.mxu1  ;;  %v7473_v6 = vpop.f32.mrf.mxu0 }
 0x51c   :  { %9973 = vst [vmem:[#allocation64_spill] sm:$0xff] %v7471_v25  ;;  %9974 = vst [vmem:[#allocation65_spill] sm:$0xff] %v7473_v6 }
 0x51d   :  { %v7475_v60 = vpop.f32.mrf.mxu1  ;;  %v7477_v45 = vpop.f32.mrf.mxu0 }
 0x51e   :  { %9975 = vst [vmem:[#allocation66_spill] sm:$0xff] %v7475_v60  ;;  %9976 = vst [vmem:[#allocation67_spill] sm:$0xff] %v7477_v45  ;;  %v2994_v60 = vadd.f32 %v2993_v42, %v7347_v7 }
 0x51f   :  { %v7479_v12 = vpop.f32.mrf.mxu1  ;;  %v7481_v26 = vpop.f32.mrf.mxu0 }
 0x520   :  { %9977 = vst [vmem:[#allocation68_spill] sm:$0xff] %v7479_v12  ;;  %9978 = vst [vmem:[#allocation69_spill] sm:$0xff] %v7481_v26  ;;  %v2995_v52 = vadd.f32 %v2994_v60, %v7358_v13 }
 0x521   :  { %v7485_v58 = vpop.f32.mrf.mxu1  ;;  %v7487_v44 = vpop.f32.mrf.mxu0 }
 0x522   :  { %9979 = vst [vmem:[#allocation70_spill] sm:$0xff] %v7485_v58  ;;  %9980 = vst [vmem:[#allocation71_spill] sm:$0xff] %v7487_v44  ;;  %v2996_v44 = vadd.f32 %v2995_v52, %v7367_v22 }
 0x523   :  { %v7490_v28 = vpop.f32.mrf.mxu1  ;;  %v7492_v5 = vpop.f32.mrf.mxu0 }
 0x524   :  { %9981 = vst [vmem:[#allocation72_spill] sm:$0xff] %v7490_v28  ;;  %9982 = vst [vmem:[#allocation73_spill] sm:$0xff] %v7492_v5  ;;  %v2997_v9 = vadd.f32 %v2996_v44, %v7375_v41 }
 0x525   :  { %v7495_v45 = vpop.f32.mrf.mxu1  ;;  %v7497_v47 = vpop.f32.mrf.mxu0 }
 0x526   :  { %9983 = vst [vmem:[#allocation74_spill] sm:$0xff] %v7495_v45  ;;  %9984 = vst [vmem:[#allocation75_spill] sm:$0xff] %v7497_v47  ;;  %v3078_v47 = vadd.f32 %v7329_v19, %v7321_v1  ;;  %v2998_v60 = vadd.f32 %v2997_v9, %v7383_v40 }
 0x527   :  { %v7500_v35 = vpop.f32.mrf.mxu1  ;;  %v7502_v38 = vpop.f32.mrf.mxu0 }
 0x528   :  { %9985 = vst [vmem:[#allocation76_spill] sm:$0xff] %v7500_v35  ;;  %9986 = vst [vmem:[#allocation77_spill] sm:$0xff] %v7502_v38  ;;  %v3079_v52 = vadd.f32 %v3078_v47, %v7340_v51  ;;  %v2999_v22 = vadd.f32 %v2998_v60, %v7391_v55 }
 0x529   :  { %v7505_v56 = vpop.f32.mrf.mxu1  ;;  %v7507_v18 = vpop.f32.mrf.mxu0 }
 0x52a   :  { %9987 = vst [vmem:[#allocation78_spill] sm:$0xff] %v7505_v56  ;;  %9988 = vst [vmem:[#allocation79_spill] sm:$0xff] %v7507_v18  ;;  %v3080_v41 = vadd.f32 %v3079_v52, %v7349_v39  ;;  %v3000_v56 = vadd.f32 %v2999_v22, %v7399_v17 }
 0x52b   :  { %v7510_v58 = vpop.f32.mrf.mxu1  ;;  %v7512_v42 = vpop.f32.mrf.mxu0 }
 0x52c   :  { %9989 = vst [vmem:[#allocation80_spill] sm:$0xff] %v7510_v58  ;;  %9990 = vst [vmem:[#allocation81_spill] sm:$0xff] %v7512_v42  ;;  %v3081_v9 = vadd.f32 %v3080_v41, %v7360_v20  ;;  %v3001_v1 = vadd.f32 %v3000_v56, %v7407_v29 }
 0x52d   :  { %v7517_v13 = vpop.f32.mrf.mxu1  ;;  %v7519_v7 = vpop.f32.mrf.mxu0 }
 0x52e   :  { %9991 = vst [vmem:[#allocation82_spill] sm:$0xff] %v7519_v7  ;;  %v3082_v60 = vadd.f32 %v3081_v9, %v7369_v61  ;;  %v3002_v51 = vadd.f32 %v3001_v1, %v7415_v62 }
 0x52f   :  { %v7523_v18 = vpop.f32.mrf.mxu1  ;;  %v7525_v44 = vpop.f32.mrf.mxu0 }
 0x530   :  { %9992 = vst [vmem:[#allocation83_spill] sm:$0xff] %v7523_v18  ;;  %9993 = vst [vmem:[#allocation84_spill] sm:$0xff] %v7525_v44  ;;  %v3083_v22 = vadd.f32 %v3082_v60, %v7377_v63  ;;  %v3003_v39 = vadd.f32 %v3002_v51, %v7423_v48 }
 0x531   :  { %v7529_v45 = vpop.f32.mrf.mxu1  ;;  %v7531_v19 = vpop.f32.mrf.mxu0 }
 0x532   :  { %9994 = vst [vmem:[#allocation85_spill] sm:$0xff] %v7531_v19  ;;  %v3084_v56 = vadd.f32 %v3083_v22, %v7385_v37  ;;  %v3004_v20 = vadd.f32 %v3003_v39, %v7431_v27 }
 0x533   :  { %v7535_v7 = vpop.f32.mrf.mxu1  ;;  %v7537_v47 = vpop.f32.mrf.mxu0 }
 0x534   :  { %9995 = vst [vmem:[#allocation86_spill] sm:$0xff] %v7535_v7  ;;  %9996 = vst [vmem:[#allocation87_spill] sm:$0xff] %v7537_v47  ;;  %v3085_v1 = vadd.f32 %v3084_v56, %v7393_v2  ;;  %v3005_v61 = vadd.f32 %v3004_v20, %v7439_v23 }
 0x535   :  { %v7541_v55 = vpop.f32.mrf.mxu1  ;;  %v7543_v52 = vpop.f32.mrf.mxu0 }
 0x536   :  { %9997 = vst [vmem:[#allocation88_spill] sm:$0xff] %v7543_v52  ;;  %v3086_v51 = vadd.f32 %v3085_v1, %v7401_v32  ;;  %v3006_v63 = vadd.f32 %v3005_v61, %v7447_v31 }
 0x537   :  { %v7547_v19 = vpop.f32.mrf.mxu1  ;;  %v7549_v41 = vpop.f32.mrf.mxu0 }
 0x538   :  { %9998 = vst [vmem:[#allocation89_spill] sm:$0xff] %v7547_v19  ;;  %9999 = vst [vmem:[#allocation90_spill] sm:$0xff] %v7549_v41  ;;  %v3087_v39 = vadd.f32 %v3086_v51, %v7409_v53  ;;  %v3007_v37 = vadd.f32 %v3006_v63, %v7455_v8 }
 0x539   :  { %v7553_v29 = vpop.f32.mrf.mxu1  ;;  %v7555_v9 = vpop.f32.mrf.mxu0 }
 0x53a   :  { %10000 = vst [vmem:[#allocation91_spill] sm:$0xff] %v7555_v9  ;;  %v3088_v20 = vadd.f32 %v3087_v39, %v7417_v24  ;;  %v3008_v2 = vadd.f32 %v3007_v37, %v7463_v16 }
 0x53b   :  { %v7559_v52 = vpop.f32.mrf.mxu1  ;;  %v7561_v60 = vpop.f32.mrf.mxu0 }
 0x53c   :  { %10001 = vst [vmem:[#allocation92_spill] sm:$0xff] %v7559_v52  ;;  %10002 = vst [vmem:[#allocation93_spill] sm:$0xff] %v7561_v60  ;;  %v3089_v61 = vadd.f32 %v3088_v20, %v7425_v11  ;;  %v3009_v32 = vadd.f32 %v3008_v2, %v7471_v25 }
 0x53d   :  { %v7565_v48 = vpop.f32.mrf.mxu1  ;;  %v7567_v22 = vpop.f32.mrf.mxu0 }
 0x53e   :  { %v3090_v63 = vadd.f32 %v3089_v61, %v7433_v36  ;;  %v3010_v53 = vadd.f32 %v3009_v32, %v7479_v12 }
 0x53f   :  { %v7571_v9 = vpop.f32.mrf.mxu1  ;;  %v7573_v56 = vpop.f32.mrf.mxu0 }
 0x540   :  { %10003 = vst [vmem:[#allocation94_spill] sm:$0xff] %v7571_v9  ;;  %10004 = vst [vmem:[#allocation95_spill] sm:$0xff] %v7573_v56  ;;  %v3091_v37 = vadd.f32 %v3090_v63, %v7441_v3  ;;  %v3011_v24 = vadd.f32 %v3010_v53, %v7490_v28  ;;  %v3035_v63 = vadd.f32 %v7331_v50, %v7323_v30 }
 0x541   :  { %v7577_v23 = vpop.f32.mrf.mxu1  ;;  %v7579_v1 = vpop.f32.mrf.mxu0 }
 0x542   :  { %10005 = vst [vmem:[#allocation96_spill] sm:$0xff] %v7577_v23  ;;  %v3092_v2 = vadd.f32 %v3091_v37, %v7449_v0  ;;  %v3012_v11 = vadd.f32 %v3011_v24, %v7500_v35  ;;  %v3036_v24 = vadd.f32 %v3035_v63, %v7343_v43 }
 0x543   :  { %v7583_v31 = vpop.f32.mrf.mxu1  ;;  %v7585_v51 = vpop.f32.mrf.mxu0 }
 0x544   :  { %10006 = vst [vmem:[#allocation97_spill] sm:$0xff] %v7583_v31  ;;  %10007 = vst [vmem:[#allocation98_spill] sm:$0xff] %v7585_v51  ;;  %v3093_v32 = vadd.f32 %v3092_v2, %v7457_v33  ;;  %v3013_v36 = vadd.f32 %v3012_v11, %v7510_v58  ;;  %v3037_v33 = vadd.f32 %v3036_v24, %v7351_v34 }
 0x545   :  { %v7589_v8 = vpop.f32.mrf.mxu1  ;;  %v7591_v39 = vpop.f32.mrf.mxu0 }
 0x546   :  { %10008 = vst [vmem:[#allocation99_spill] sm:$0xff] %v7589_v8  ;;  %v3094_v28 = vadd.f32 %v3093_v32, %v7465_v46  ;;  %v3014_v37 = vadd.f32 %v3013_v36, %v7523_v18  ;;  %v3038_v63 = vadd.f32 %v3037_v33, %v7362_v14 }
 0x547   :  { %v7595_v16 = vpop.f32.mrf.mxu1  ;;  %v7597_v20 = vpop.f32.mrf.mxu0 }
 0x548   :  { %10009 = vst [vmem:[#allocation100_spill] sm:$0xff] %v7595_v16  ;;  %10010 = vst [vmem:[#allocation101_spill] sm:$0xff] %v7597_v20  ;;  %v3095_v2 = vadd.f32 %v3094_v28, %v7473_v6  ;;  %v3015_v11 = vadd.f32 %v3014_v37, %v7535_v7  ;;  %v3039_v24 = vadd.f32 %v3038_v63, %v7371_v54 }
 0x549   :  { %v7601_v25 = vpop.f32.mrf.mxu1  ;;  %v7603_v61 = vpop.f32.mrf.mxu0 }
 0x54a   :  { %10011 = vst [vmem:[#allocation102_spill] sm:$0xff] %v7601_v25  ;;  %v3096_v32 = vadd.f32 %v3095_v2, %v7481_v26  ;;  %v3016_v36 = vadd.f32 %v3015_v11, %v7547_v19  ;;  %v3040_v33 = vadd.f32 %v3039_v24, %v7379_v49 }
 0x54b   :  { %v7609_v53 = vpop.f32.mrf.mxu1  ;;  %v7611_v3 = vpop.f32.mrf.mxu0 }
 0x54c   :  { %10012 = vst [vmem:[#allocation103_spill] sm:$0xff] %v7609_v53  ;;  %10013 = vst [vmem:[#allocation104_spill] sm:$0xff] %v7611_v3  ;;  %v3097_v28 = vadd.f32 %v3096_v32, %v7492_v5  ;;  %v3017_v37 = vadd.f32 %v3016_v36, %v7559_v52  ;;  %v3041_v63 = vadd.f32 %v3040_v33, %v7387_v57 }
 0x54d   :  { %v7616_v0 = vpop.f32.mrf.mxu1  ;;  %v7618_v35 = vpop.f32.mrf.mxu0 }
 0x54e   :  { %10014 = vst [vmem:[#allocation105_spill] sm:$0xff] %v7616_v0  ;;  %v3098_v2 = vadd.f32 %v3097_v28, %v7502_v38  ;;  %v3018_v11 = vadd.f32 %v3017_v37, %v7571_v9  ;;  %v3042_v24 = vadd.f32 %v3041_v63, %v7395_v59 }
 0x54f   :  { %v7623_v58 = vpop.f32.mrf.mxu1  ;;  %v7625_v12 = vpop.f32.mrf.mxu0 }
 0x550   :  { %10015 = vst [vmem:[#allocation106_spill] sm:$0xff] %v7623_v58  ;;  %10016 = vst [vmem:[#allocation107_spill] sm:$0xff] %v7625_v12  ;;  %v3099_v32 = vadd.f32 %v3098_v2, %v7512_v42  ;;  %v3019_v36 = vadd.f32 %v3018_v11, %v7583_v31  ;;  %v3043_v33 = vadd.f32 %v3042_v24, %v7403_v15 }
 0x551   :  { %v7630_v46 = vpop.f32.mrf.mxu1  ;;  %v7632_v18 = vpop.f32.mrf.mxu0 }
 0x552   :  { %10017 = vst [vmem:[#allocation108_spill] sm:$0xff] %v7630_v46  ;;  %v3100_v28 = vadd.f32 %v3099_v32, %v7525_v44  ;;  %v3020_v37 = vadd.f32 %v3019_v36, %v7595_v16  ;;  %v3044_v36 = vadd.f32 %v3043_v33, %v7411_v10  ;;  %v10022_v10 = vld [vmem:[#allocation46_spill] sm:$0xff] }
 0x553   :  { %v7637_v6 = vpop.f32.mrf.mxu1  ;;  %v7639_v7 = vpop.f32.mrf.mxu0 }
 0x554   :  { %10018 = vst [vmem:[#allocation109_spill] sm:$0xff] %v7637_v6  ;;  %10019 = vst [vmem:[#allocation110_spill] sm:$0xff] %v7639_v7  ;;  %v3101_v2 = vadd.f32 %v3100_v28, %v7537_v47  ;;  %v3021_v11 = vadd.f32 %v3020_v37, %v7609_v53  ;;  %v3045_v37 = vadd.f32 %v3044_v36, %v7419_v21 }
 0x555   :  { %v7644_v26 = vpop.f32.mrf.mxu1  ;;  %v7646_v19 = vpop.f32.mrf.mxu0 }
 0x556   :  { %10020 = vst [vmem:[#allocation111_spill] sm:$0xff] %v7644_v26  ;;  %v3102_v57 = vadd.f32 %v3101_v2, %v7549_v41  ;;  %v3022_v32 = vadd.f32 %v3021_v11, %v7623_v58  ;;  %v3046_v2 = vadd.f32 %v3045_v37, %v7427_v4  ;;  %v10025_v4 = vld [vmem:[#allocation54_spill] sm:$0xff] }
 0x557   :  { %v7651_v5 = vpop.f32.mrf.mxu1  ;;  %v7653_v52 = vpop.f32.mrf.mxu0 }
 0x558   :  { %v3103_v16 = vadd.f32 %v3102_v57, %v7561_v60  ;;  %v3023_v28 = vadd.f32 %v3022_v32, %v7637_v6  ;;  %v3047_v57 = vadd.f32 %v3046_v2, %v10022_v10  ;;  %v10023_v6 = vld [vmem:[#allocation50_spill] sm:$0xff] }
 0x559   :  { %v7658_v38 = vpop.f32.mrf.mxu1  ;;  %v7660_v9 = vpop.f32.mrf.mxu0  ;;  %v10026_v2 = vld [vmem:[#allocation58_spill] sm:$0xff] }
 0x55a   :  { %v3104_v47 = vadd.f32 %v3103_v16, %v7573_v56  ;;  %v3024_v53 = vadd.f32 %v3023_v28, %v7651_v5  ;;  %v3048_v21 = vadd.f32 %v3047_v57, %v10023_v6  ;;  %v10027_v57 = vld [vmem:[#allocation62_spill] sm:$0xff] }
 0x55b   :  { %v2750_v42 = vpop.f32.mrf.mxu1  ;;  %v7665_v31 = vpop.f32.mrf.mxu0 }
 0x55c   :  { %v3105_v41 = vadd.f32 %v3104_v47, %v7585_v51  ;;  %v3025_v58 = vadd.f32 %v3024_v53, %v2750_v42  ;;  %v3049_v15 = vadd.f32 %v3048_v21, %v10025_v4  ;;  %v10031_v4 = vld [vmem:[#allocation74_spill] sm:$0xff] }
 0x55d   :  { %v7670_v63 = vpop.f32.mrf.mxu1  ;;  %v7672_v44 = vpop.f32.mrf.mxu0 }
 0x55e   :  { %10021 = vst [vmem:[#allocation112_spill] sm:$0xff] %v7672_v44  ;;  %v3106_v32 = vadd.f32 %v3105_v41, %v7597_v20  ;;  %v3050_v51 = vadd.f32 %v3049_v15, %v10026_v2 }
 0x55f   :  { %v2754_v24 = vpop.f32.mrf.mxu1  ;;  %v7680_v11 = vpop.f32.mrf.mxu0 }
 0x560   :  { %v3026_v36 = vadd.f32 %v3025_v58, %v2754_v24  ;;  %v3107_v37 = vadd.f32 %v3106_v32, %v7611_v3  ;;  %v3051_v20 = vadd.f32 %v3050_v51, %v10027_v57  ;;  %v10028_v32 = vld [vmem:[#allocation66_spill] sm:$0xff] }
 0x561   :  { %v7682_v33 = vpop.f32.mrf.mxu1  ;;  %v7688_v16 = vpop.f32.mrf.mxu0 }
 0x562   :  { %10024 = vst [vmem:[#allocation113_spill] sm:$0xff] %v7688_v16  ;;  %v3108_v47 = vadd.f32 %v3107_v37, %v7625_v12 }
 0x563   :  { %v2760_v60 = vpop.f32.mrf.mxu1  ;;  %v7696_v10 = vpop.f32.mrf.mxu0 }
 0x564   :  { %v3027_v56 = vadd.f32 %v3026_v36, %v2760_v60  ;;  %v3109_v58 = vadd.f32 %v3108_v47, %v7639_v7  ;;  %v3052_v36 = vadd.f32 %v3051_v20, %v10028_v32 }
 0x565   :  { %v7690_v28 = vpop.f32.mrf.mxu1  ;;  %v7702_v3 = vpop.f32.mrf.mxu0 }
 0x566   :  { %v3110_v6 = vadd.f32 %v3109_v58, %v7653_v52  ;;  %10029 = vst [vmem:[#allocation114_spill] sm:$0xff] %v7702_v3  ;;  %v10032_v58 = vld [vmem:[#allocation78_spill] sm:$0xff] }
 0x567   :  { %v2764_v59 = vpop.f32.mrf.mxu1  ;;  %v7708_v7 = vpop.f32.mrf.mxu0 }
 0x568   :  { %v3028_v53 = vadd.f32 %v3027_v56, %v2764_v59  ;;  %v3111_v21 = vadd.f32 %v3110_v6, %v7665_v31  ;;  %v10030_v56 = vld [vmem:[#allocation70_spill] sm:$0xff] }
 0x569   :  { %v3053_v12 = vadd.f32 %v3052_v36, %v10030_v56 }
 0x56a   :  { %v3029_v41 = vrot.slane %v3028_v53, 4  ;;  %v3112_v15 = vadd.f32 %v3111_v21, %v7680_v11 }
 0x56b   :  { %v3054_v47 = vadd.f32 %v3053_v12, %v10031_v4 }
 0x56c   :  { %v3030_v16 = vadd.f32 %v3029_v41, %v3028_v53  ;;  %v3113_v51 = vadd.f32 %v3112_v15, %v7696_v10 }
 0x56d   :  { %v3055_v53 = vadd.f32 %v3054_v47, %v10032_v58 }
 0x56e   :  { %v3031_v37 = vrot.slane %v3030_v16, 2  ;;  %v3114_v20 = vadd.f32 %v3113_v51, %v7708_v7 }
 0x56f   :  { %v3056_v32 = vadd.f32 %v3055_v53, %v7517_v13 }
 0x570   :  { %v3032_v2 = vadd.f32 %v3031_v37, %v3030_v16  ;;  %v3115_v36 = vrot.slane %v3114_v20, 4 }
 0x571   :  { %v3057_v6 = vadd.f32 %v3056_v32, %v7529_v45 }
 0x572   :  { %v3033_v41 = vrot.slane %v3032_v2, 1  ;;  %v3116_v37 = vadd.f32 %v3115_v36, %v3114_v20 }
 0x573   :  { %v3058_v21 = vadd.f32 %v3057_v6, %v7541_v55  ;;  %v10037_v6 = vld [vmem:[#allocation34_spill] sm:$0xff] }
 0x574   :  { %v3034_v57 = vadd.f32 %v3033_v41, %v3032_v2  ;;  %v3117_v32 = vrot.slane %v3116_v37, 2  ;;  %v10036_v41 = vld [vmem:[#allocation26_spill] sm:$0xff] }
 0x575   :  { %v3059_v16 = vadd.f32 %v3058_v21, %v7553_v29 }
 0x576   :  { %v7717_v12 = vmul.f32 0.0033333334, %v3034_v57  ;;  %v3121_v57 = vadd.f32 %v10037_v6, %v10036_v41 }
 0x577   :  { %v3060_v15 = vadd.f32 %v3059_v16, %v7565_v48 }
 0x578   :  { %v7723_v51 = vsub.f32 %v7651_v5, %v7717_v12  ;;  %v7726_v53 = vsub.f32 %v2750_v42, %v7717_v12  ;;  %v7729_v2 = vsub.f32 %v2754_v24, %v7717_v12  ;;  %v7734_v20 = vsub.f32 %v2760_v60, %v7717_v12  ;;  %v10040_v5 = vld [vmem:[#allocation39_spill] sm:$0xff]  ;;  %v10041_v42 = vld [vmem:[#allocation20_spill] sm:$0xff]  ;;  %v10045_v60 = vld [vmem:[#allocation41_spill] sm:$0xff] }
 0x579   :  { %v3061_v47 = vadd.f32 %v3060_v15, %v7577_v23  ;;  %v7737_v36 = vsub.f32 %v2764_v59, %v7717_v12  ;;  %v3122_v16 = vadd.f32 %v3121_v57, %v10040_v5  ;;  %v7743_v15 = vsub.f32 %v10041_v42, %v7717_v12  ;;  %v10043_v24 = vld [vmem:[#allocation27_spill] sm:$0xff] }
 0x57a   :  { %10033 = vst [vmem:[#allocation70_spill] sm:$0xff] %v7723_v51  ;;  %10034 = vst [vmem:[#allocation74_spill] sm:$0xff] %v7726_v53  ;;  %v3118_v51 = vadd.f32 %v3117_v32, %v3116_v37  ;;  %v10049_v37 = vld [vmem:[#allocation14_spill] sm:$0xff] }
 0x57b   :  { %10035 = vst [vmem:[#allocation78_spill] sm:$0xff] %v7729_v2  ;;  %10038 = vst [vmem:[#allocation26_spill] sm:$0xff] %v7734_v20  ;;  %v3062_v21 = vadd.f32 %v3061_v47, %v7589_v8  ;;  %v7747_v2 = vsub.f32 %v10043_v24, %v7717_v12  ;;  %v3123_v20 = vadd.f32 %v3122_v16, %v10045_v60  ;;  %v10047_v47 = vld [vmem:[#allocation35_spill] sm:$0xff]  ;;  %v10050_v16 = vld [vmem:[#allocation40_spill] sm:$0xff] }
 0x57c   :  { %10039 = vst [vmem:[#allocation34_spill] sm:$0xff] %v7737_v36  ;;  %10042 = vst [vmem:[#allocation39_spill] sm:$0xff] %v7743_v15  ;;  %v10046_v36 = vld [vmem:[#allocation43_spill] sm:$0xff]  ;;  %v7755_v57 = vsub.f32 %v10047_v47, %v7717_v12  ;;  %v3472_v42 = vmul.f32 %v7743_v15, %v7743_v15 }
 0x57d   :  { %10044 = vst [vmem:[#allocation20_spill] sm:$0xff] %v7747_v2  ;;  %v3063_v53 = vadd.f32 %v3062_v21, %v7601_v25  ;;  %v3124_v23 = vadd.f32 %v3123_v20, %v10046_v36  ;;  %v3476_v24 = vmul.f32 %v7747_v2, %v7747_v2  ;;  %v3119_v21 = vrot.slane %v3118_v51, 1  ;;  %v10053_v2 = vld [vmem:[#allocation42_spill] sm:$0xff] }
 0x57e   :  { %10048 = vst [vmem:[#allocation27_spill] sm:$0xff] %v7755_v57  ;;  %v3480_v36 = vmul.f32 %v7755_v57, %v7755_v57 }
 0x57f   :  { %v3064_v59 = vadd.f32 %v3063_v53, %v7616_v0  ;;  %v3125_v32 = vadd.f32 %v3124_v23, %v10049_v37  ;;  %v7765_v53 = vsub.f32 %v10050_v16, %v7717_v12  ;;  %v10052_v0 = vld [vmem:[#allocation21_spill] sm:$0xff]  ;;  %v3624_v15 = vadd.f32 %v3476_v24, %v3472_v42  ;;  %v10055_v23 = vld [vmem:[#allocation23_spill] sm:$0xff]  ;;  %v10057_v24 = vld [vmem:[#allocation44_spill] sm:$0xff] }
 0x581   :  { %v3065_v8 = vadd.f32 %v3064_v59, %v7630_v46  ;;  %10051 = vst [vmem:[#allocation35_spill] sm:$0xff] %v7765_v53  ;;  %v3126_v47 = vadd.f32 %v3125_v32, %v10052_v0  ;;  %v7774_v59 = vsub.f32 %v10053_v2, %v7717_v12  ;;  %v3120_v46 = vadd.f32 %v3119_v21, %v3118_v51  ;;  %v10056_v32 = vld [vmem:[#allocation12_spill] sm:$0xff]  ;;  %v10059_v21 = vld [vmem:[#allocation17_spill] sm:$0xff] }
 0x582   :  { %v3484_v16 = vmul.f32 %v7765_v53, %v7765_v53  ;;  %v3625_v60 = vadd.f32 %v3624_v15, %v3480_v36  ;;  %v7791_v53 = vpop.f32.mrf.mxu1  ;;  %v10060_v15 = vld [vmem:[#allocation36_spill] sm:$0xff] }
 0x583   :  { %v3066_v20 = vadd.f32 %v3065_v8, %v7644_v26  ;;  %10054 = vst [vmem:[#allocation40_spill] sm:$0xff] %v7774_v59  ;;  %v3127_v37 = vadd.f32 %v3126_v47, %v10055_v23  ;;  %v3488_v51 = vmul.f32 %v7774_v59, %v7774_v59  ;;  %v7788_v2 = vmul.f32 0.0033333334, %v3120_v46 }
 0x584   :  { %v3626_v26 = vadd.f32 %v3625_v60, %v3484_v16 }
 0x585   :  { %v3067_v25 = vadd.f32 %v3066_v20, %v7658_v38  ;;  %v3128_v0 = vadd.f32 %v3127_v37, %v10056_v32  ;;  %v7784_v20 = vsub.f32 %v10057_v24, %v7717_v12  ;;  %v10061_v37 = vld [vmem:[#allocation3_spill] sm:$0xff]  ;;  %v7803_v46 = vsub.f32 %v7653_v52, %v7788_v2  ;;  %v10064_v24 = vld [vmem:[#allocation29_spill] sm:$0xff] }
 0x586   :  { %v3627_v36 = vadd.f32 %v3626_v26, %v3488_v51  ;;  %v7797_v16 = vsub.f32 %v10061_v37, %v7717_v12  ;;  %v7809_v26 = vsub.f32 %v7665_v31, %v7788_v2  ;;  %v7817_v51 = vsub.f32 %v7696_v10, %v7788_v2  ;;  %v10072_v10 = vld [vmem:[#allocation51_spill] sm:$0xff] }
 0x587   :  { %v3068_v8 = vadd.f32 %v3067_v25, %v7670_v63  ;;  %10058 = vst [vmem:[#allocation42_spill] sm:$0xff] %v7784_v20  ;;  %v3129_v47 = vadd.f32 %v3128_v0, %v10059_v21  ;;  %10063 = vst [vmem:[#allocation12_spill] sm:$0xff] %v7803_v46  ;;  %v7821_v52 = vsub.f32 %v7708_v7, %v7788_v2  ;;  %v10076_v46 = vld [vmem:[#allocation59_spill] sm:$0xff] }
 0x588   :  { %10062 = vst [vmem:[#allocation23_spill] sm:$0xff] %v7797_v16  ;;  %10065 = vst [vmem:[#allocation44_spill] sm:$0xff] %v7809_v26  ;;  %v3496_v31 = vmul.f32 %v7797_v16, %v7797_v16  ;;  %v10075_v26 = vld [vmem:[#allocation55_spill] sm:$0xff]  ;;  %v7842_v16 = vsub.f32 %v7399_v17, %v7717_v12 }
 0x589   :  { %v3069_v42 = vadd.f32 %v3068_v8, %v7682_v33  ;;  %v3130_v60 = vadd.f32 %v3129_v47, %v10060_v15  ;;  %v3492_v8 = vmul.f32 %v7784_v20, %v7784_v20  ;;  %10067 = vst [vmem:[#allocation36_spill] sm:$0xff] %v7817_v51  ;;  %10068 = vst [vmem:[#allocation3_spill] sm:$0xff] %v7821_v52  ;;  %v10071_v20 = vld [vmem:[#allocation47_spill] sm:$0xff] }
 0x58a   :  { %10077 = vst [vmem:[#allocation55_spill] sm:$0xff] %v7842_v16 }
 0x58b   :  { %v3070_v25 = vadd.f32 %v3069_v42, %v7690_v28  ;;  %v3131_v59 = vadd.f32 %v3130_v60, %v10064_v24  ;;  %v7813_v42 = vsub.f32 %v7680_v11, %v7788_v2  ;;  %v3628_v47 = vadd.f32 %v3627_v36, %v3492_v8  ;;  %v10073_v36 = vld [vmem:[#allocation7_spill] sm:$0xff] }
 0x58c   :  { %v7826_v60 = vsub.f32 %v7383_v40, %v7717_v12  ;;  %v7834_v8 = vsub.f32 %v10073_v36, %v7717_v12 }
 0x58d   :  { %v3071_v0 = vadd.f32 %v3070_v25, %v7791_v53  ;;  %10066 = vst [vmem:[#allocation17_spill] sm:$0xff] %v7813_v42  ;;  %v10069_v25 = vld [vmem:[#allocation31_spill] sm:$0xff]  ;;  %v3629_v42 = vadd.f32 %v3628_v47, %v3496_v31 }
 0x58e   :  { %v3132_v37 = vadd.f32 %v3131_v59, %v10069_v25  ;;  %10070 = vst [vmem:[#allocation29_spill] sm:$0xff] %v7826_v60  ;;  %10074 = vst [vmem:[#allocation7_spill] sm:$0xff] %v7834_v8  ;;  %v3500_v7 = vmul.f32 %v7826_v60, %v7826_v60  ;;  %v10083_v60 = vld [vmem:[#allocation75_spill] sm:$0xff] }
 0x58f   :  { %v3072_v11 = vrot.slane %v3071_v0, 4 }
 0x590   :  { %v3133_v57 = vadd.f32 %v3132_v37, %v10071_v20  ;;  %v3630_v52 = vadd.f32 %v3629_v42, %v3500_v7  ;;  %v10078_v37 = vld [vmem:[#allocation63_spill] sm:$0xff]  ;;  %v3508_v42 = vmul.f32 %v7842_v16, %v7842_v16  ;;  %v10090_v16 = vld [vmem:[#allocation88_spill] sm:$0xff] }
 0x591   :  { %v3073_v59 = vadd.f32 %v3072_v11, %v3071_v0  ;;  %v10080_v0 = vld [vmem:[#allocation18_spill] sm:$0xff]  ;;  %v10082_v7 = vld [vmem:[#allocation71_spill] sm:$0xff] }
 0x592   :  { %v3134_v51 = vadd.f32 %v3133_v57, %v10072_v10  ;;  %v3504_v57 = vmul.f32 %v7834_v8, %v7834_v8  ;;  %v10079_v10 = vld [vmem:[#allocation67_spill] sm:$0xff]  ;;  %v7850_v11 = vsub.f32 %v10080_v0, %v7717_v12  ;;  %v7858_v8 = vsub.f32 %v7415_v62, %v7717_v12 }
 0x593   :  { %v3074_v47 = vrot.slane %v3073_v59, 2 }
 0x594   :  { %v3135_v40 = vadd.f32 %v3134_v51, %v10075_v26  ;;  %v3631_v36 = vadd.f32 %v3630_v52, %v3504_v57  ;;  %10081 = vst [vmem:[#allocation18_spill] sm:$0xff] %v7850_v11  ;;  %10084 = vst [vmem:[#allocation71_spill] sm:$0xff] %v7858_v8  ;;  %v3512_v52 = vmul.f32 %v7850_v11, %v7850_v11  ;;  %v10085_v57 = vld [vmem:[#allocation79_spill] sm:$0xff] }
 0x595   :  { %v3075_v51 = vadd.f32 %v3074_v47, %v3073_v59  ;;  %v10087_v59 = vld [vmem:[#allocation30_spill] sm:$0xff]  ;;  %v7874_v11 = vsub.f32 %v7431_v27, %v7717_v12 }
 0x596   :  { %v3136_v25 = vadd.f32 %v3135_v40, %v10076_v46  ;;  %v3632_v40 = vadd.f32 %v3631_v36, %v3508_v42  ;;  %v7866_v47 = vsub.f32 %v10087_v59, %v7717_v12  ;;  %v10089_v42 = vld [vmem:[#allocation85_spill] sm:$0xff] }
 0x598   :  { %v3137_v31 = vadd.f32 %v3136_v25, %v10078_v37  ;;  %v3076_v25 = vrot.slane %v3075_v51, 1  ;;  %v3633_v0 = vadd.f32 %v3632_v40, %v3512_v52  ;;  %10088 = vst [vmem:[#allocation79_spill] sm:$0xff] %v7866_v47  ;;  %v10092_v52 = vld [vmem:[#allocation91_spill] sm:$0xff] }
 0x59a   :  { %v3138_v20 = vadd.f32 %v3137_v31, %v10079_v10  ;;  %v10086_v10 = vld [vmem:[#allocation82_spill] sm:$0xff]  ;;  %v3077_v36 = vadd.f32 %v3076_v25, %v3075_v51  ;;  %v10093_v51 = vld [vmem:[#allocation48_spill] sm:$0xff]  ;;  %v3524_v25 = vmul.f32 %v7874_v11, %v7874_v11 }
 0x59b   :  { %10091 = vst [vmem:[#allocation82_spill] sm:$0xff] %v7874_v11 }
 0x59c   :  { %v3139_v17 = vadd.f32 %v3138_v20, %v10082_v7  ;;  %v3516_v20 = vmul.f32 %v7858_v8, %v7858_v8  ;;  %v7878_v40 = vmul.f32 0.0033333334, %v3077_v36 }
 0x59e   :  { %v3140_v46 = vadd.f32 %v3139_v17, %v10083_v60  ;;  %v3634_v17 = vadd.f32 %v3633_v0, %v3516_v20  ;;  %v7890_v27 = vsub.f32 %v7323_v30, %v7878_v40  ;;  %v7894_v0 = vsub.f32 %v7331_v50, %v7878_v40 }
 0x59f   :  { %v7906_v30 = vsub.f32 %v7343_v43, %v7878_v40 }
 0x5a0   :  { %v3141_v31 = vadd.f32 %v3140_v46, %v10085_v57  ;;  %v3520_v46 = vmul.f32 %v7866_v47, %v7866_v47  ;;  %10095 = vst [vmem:[#allocation85_spill] sm:$0xff] %v7894_v0  ;;  %v3473_v50 = vmul.f32 %v7890_v27, %v7890_v27 }
 0x5a1   :  { %10098 = vst [vmem:[#allocation91_spill] sm:$0xff] %v7906_v30 }
 0x5a2   :  { %v3142_v37 = vadd.f32 %v3141_v31, %v10086_v10  ;;  %v3635_v59 = vadd.f32 %v3634_v17, %v3520_v46 }
 0x5a4   :  { %v3143_v62 = vadd.f32 %v3142_v37, %v10089_v42  ;;  %v7884_v37 = vsub.f32 %v10093_v51, %v7717_v12  ;;  %v3636_v20 = vadd.f32 %v3635_v59, %v3524_v25  ;;  %v7915_v51 = vsub.f32 %v7351_v34, %v7878_v40 }
 0x5a6   :  { %v3144_v60 = vadd.f32 %v3143_v62, %v10090_v16  ;;  %10094 = vst [vmem:[#allocation30_spill] sm:$0xff] %v7884_v37  ;;  %v10096_v62 = vld [vmem:[#allocation52_spill] sm:$0xff]  ;;  %v3528_v46 = vmul.f32 %v7884_v37, %v7884_v37  ;;  %10099 = vst [vmem:[#allocation48_spill] sm:$0xff] %v7915_v51  ;;  %v7926_v37 = vsub.f32 %v7362_v14, %v7878_v40 }
 0x5a7   :  { %v7900_v17 = vsub.f32 %v10096_v62, %v7717_v12  ;;  %v10104_v14 = vld [vmem:[#allocation60_spill] sm:$0xff] }
 0x5a8   :  { %v3145_v31 = vadd.f32 %v3144_v60, %v10092_v52  ;;  %v3637_v59 = vadd.f32 %v3636_v20, %v3528_v46  ;;  %v3481_v20 = vmul.f32 %v7906_v30, %v7906_v30  ;;  %v7940_v47 = vsub.f32 %v10104_v14, %v7717_v12 }
 0x5a9   :  { %10097 = vst [vmem:[#allocation88_spill] sm:$0xff] %v7900_v17  ;;  %v3532_v43 = vmul.f32 %v7900_v17, %v7900_v17 }
 0x5aa   :  { %v3146_v8 = vadd.f32 %v3145_v31, %v7567_v22  ;;  %10105 = vst [vmem:[#allocation60_spill] sm:$0xff] %v7940_v47 }
 0x5ab   :  { %v3638_v46 = vadd.f32 %v3637_v59, %v3532_v43  ;;  %v7954_v43 = vsub.f32 %v7379_v49, %v7878_v40  ;;  %v10113_v49 = vld [vmem:[#allocation64_spill] sm:$0xff] }
 0x5ac   :  { %v3147_v60 = vadd.f32 %v3146_v8, %v7579_v1  ;;  %v3477_v8 = vmul.f32 %v7894_v0, %v7894_v0  ;;  %v7968_v0 = vsub.f32 %v10113_v49, %v7717_v12  ;;  %v10118_v49 = vld [vmem:[#allocation38_spill] sm:$0xff] }
 0x5ad   :  { %10110 = vst [vmem:[#allocation116_spill] sm:$0xff] %v7954_v43 }
 0x5ae   :  { %v3148_v36 = vadd.f32 %v3147_v60, %v7591_v39  ;;  %v10100_v60 = vld [vmem:[#allocation56_spill] sm:$0xff]  ;;  %10114 = vst [vmem:[#allocation64_spill] sm:$0xff] %v7968_v0 }
 0x5af   :  { %v7920_v62 = vsub.f32 %v10100_v60, %v7717_v12  ;;  %10102 = vst [vmem:[#allocation56_spill] sm:$0xff] %v7926_v37  ;;  %v3485_v60 = vmul.f32 %v7915_v51, %v7915_v51 }
 0x5b0   :  { %v3149_v31 = vadd.f32 %v3148_v36, %v7603_v61  ;;  %v3667_v36 = vadd.f32 %v3477_v8, %v3473_v50  ;;  %v10106_v8 = vld [vmem:[#allocation22_spill] sm:$0xff] }
 0x5b1   :  { %10101 = vst [vmem:[#allocation52_spill] sm:$0xff] %v7920_v62  ;;  %v3536_v50 = vmul.f32 %v7920_v62, %v7920_v62  ;;  %v7946_v59 = vsub.f32 %v10106_v8, %v7788_v2  ;;  %v10111_v62 = vld [vmem:[#allocation6_spill] sm:$0xff] }
 0x5b2   :  { %v3150_v25 = vadd.f32 %v3149_v31, %v7618_v35  ;;  %v7933_v31 = vsub.f32 %v7371_v54, %v7878_v40  ;;  %v3668_v11 = vadd.f32 %v3667_v36, %v3481_v20  ;;  %v10108_v54 = vld [vmem:[#allocation33_spill] sm:$0xff]  ;;  %v3489_v20 = vmul.f32 %v7926_v37, %v7926_v37 }
 0x5b3   :  { %10107 = vst [vmem:[#allocation22_spill] sm:$0xff] %v7946_v59  ;;  %v3639_v14 = vadd.f32 %v3638_v46, %v3536_v50  ;;  %v7961_v51 = vsub.f32 %v10111_v62, %v7878_v40  ;;  %v10115_v46 = vld [vmem:[#allocation10_spill] sm:$0xff]  ;;  %v3497_v50 = vmul.f32 %v7954_v43, %v7954_v43 }
 0x5b4   :  { %v3151_v34 = vadd.f32 %v3150_v25, %v7632_v18  ;;  %10103 = vst [vmem:[#allocation115_spill] sm:$0xff] %v7933_v31  ;;  %v7950_v25 = vsub.f32 %v10108_v54, %v7788_v2  ;;  %v3669_v36 = vadd.f32 %v3668_v11, %v3485_v60  ;;  %v3493_v8 = vmul.f32 %v7933_v31, %v7933_v31 }
 0x5b5   :  { %10112 = vst [vmem:[#allocation6_spill] sm:$0xff] %v7961_v51  ;;  %v3540_v11 = vmul.f32 %v7940_v47, %v7940_v47  ;;  %v7978_v60 = vsub.f32 %v10115_v46, %v7878_v40  ;;  %v7985_v31 = vsub.f32 %v10118_v49, %v7788_v2 }
 0x5b6   :  { %v3152_v17 = vadd.f32 %v3151_v34, %v7646_v19  ;;  %10109 = vst [vmem:[#allocation33_spill] sm:$0xff] %v7950_v25  ;;  %v3670_v54 = vadd.f32 %v3669_v36, %v3489_v20  ;;  %v3478_v62 = vmul.f32 %v7950_v25, %v7950_v25  ;;  %v10117_v36 = vld [vmem:[#allocation113_spill] sm:$0xff]  ;;  %v3501_v25 = vmul.f32 %v7961_v51, %v7961_v51 }
 0x5b7   :  { %10116 = vst [vmem:[#allocation10_spill] sm:$0xff] %v7978_v60  ;;  %10119 = vst [vmem:[#allocation113_spill] sm:$0xff] %v7985_v31  ;;  %v3640_v47 = vadd.f32 %v3639_v14, %v3540_v11  ;;  %v10125_v11 = vld [vmem:[#allocation28_spill] sm:$0xff]  ;;  %v3505_v49 = vmul.f32 %v7978_v60, %v7978_v60 }
 0x5b8   :  { %v3153_v34 = vadd.f32 %v3152_v17, %v7660_v9  ;;  %v3474_v17 = vmul.f32 %v7946_v59, %v7946_v59  ;;  %v3671_v20 = vadd.f32 %v3670_v54, %v3493_v8  ;;  %v10120_v59 = vld [vmem:[#allocation16_spill] sm:$0xff]  ;;  %v3544_v54 = vmul.f32 %v7968_v0, %v7968_v0 }
 0x5b9   :  { %v7989_v37 = vsub.f32 %v10120_v59, %v7878_v40  ;;  %v10123_v8 = vld [vmem:[#allocation68_spill] sm:$0xff]  ;;  %v8004_v59 = vsub.f32 %v10125_v11, %v7878_v40 }
 0x5ba   :  { %v3154_v30 = vadd.f32 %v3153_v34, %v7672_v44  ;;  %v3672_v46 = vadd.f32 %v3671_v20, %v3497_v50  ;;  %v7993_v44 = vpop.f32.mrf.mxu0  ;;  %v3710_v14 = vadd.f32 %v3478_v62, %v3474_v17  ;;  %v10127_v20 = vld [vmem:[#allocation9_spill] sm:$0xff] }
 0x5bb   :  { %10121 = vst [vmem:[#allocation38_spill] sm:$0xff] %v7989_v37  ;;  %10122 = vst [vmem:[#allocation16_spill] sm:$0xff] %v7993_v44  ;;  %v8010_v51 = vsub.f32 %v10127_v20, %v7788_v2  ;;  %v10129_v17 = vld [vmem:[#allocation25_spill] sm:$0xff]  ;;  %v3509_v11 = vmul.f32 %v7989_v37, %v7989_v37 }
 0x5bc   :  { %v3155_v34 = vadd.f32 %v3154_v30, %v10117_v36  ;;  %v7998_v30 = vsub.f32 %v10123_v8, %v7717_v12  ;;  %10126 = vst [vmem:[#allocation28_spill] sm:$0xff] %v8004_v59  ;;  %v3673_v50 = vadd.f32 %v3672_v46, %v3501_v25  ;;  %v8017_v62 = vsub.f32 %v10129_v17, %v7878_v40  ;;  %v10131_v25 = vld [vmem:[#allocation72_spill] sm:$0xff]  ;;  %v10135_v17 = vld [vmem:[#allocation11_spill] sm:$0xff] }
 0x5bd   :  { %10128 = vst [vmem:[#allocation9_spill] sm:$0xff] %v8010_v51  ;;  %v8023_v46 = vsub.f32 %v10131_v25, %v7717_v12  ;;  %v8035_v37 = vsub.f32 %v10135_v17, %v7788_v2 }
 0x5be   :  { %v3156_v43 = vadd.f32 %v3155_v34, %v7702_v3  ;;  %10124 = vst [vmem:[#allocation68_spill] sm:$0xff] %v7998_v30  ;;  %v3482_v34 = vmul.f32 %v7985_v31, %v7985_v31  ;;  %v3641_v3 = vadd.f32 %v3640_v47, %v3544_v54  ;;  %10130 = vst [vmem:[#allocation25_spill] sm:$0xff] %v8017_v62  ;;  %v10133_v31 = vld [vmem:[#allocation32_spill] sm:$0xff] }
 0x5bf   :  { %v3674_v0 = vadd.f32 %v3673_v50, %v3505_v49  ;;  %10132 = vst [vmem:[#allocation72_spill] sm:$0xff] %v8023_v46  ;;  %v3548_v20 = vmul.f32 %v7998_v30, %v7998_v30  ;;  %v3513_v47 = vmul.f32 %v8004_v59, %v8004_v59  ;;  %10136 = vst [vmem:[#allocation11_spill] sm:$0xff] %v8035_v37  ;;  %v10137_v30 = vld [vmem:[#allocation46_spill] sm:$0xff]  ;;  %v10139_v59 = vld [vmem:[#allocation76_spill] sm:$0xff] }
 0x5c0   :  { %v3157_v8 = vadd.f32 %v3156_v43, %v7993_v44  ;;  %v3711_v60 = vadd.f32 %v3710_v14, %v3482_v34  ;;  %v8029_v43 = vsub.f32 %v10133_v31, %v7878_v40  ;;  %v3486_v49 = vmul.f32 %v8010_v51, %v8010_v51  ;;  %v10141_v51 = vld [vmem:[#allocation50_spill] sm:$0xff] }
 0x5c1   :  { %v3675_v54 = vadd.f32 %v3674_v0, %v3509_v11  ;;  %v3642_v25 = vadd.f32 %v3641_v3, %v3548_v20  ;;  %v8041_v14 = vsub.f32 %v10137_v30, %v7878_v40  ;;  %v3517_v31 = vmul.f32 %v8017_v62, %v8017_v62  ;;  %v10143_v20 = vld [vmem:[#allocation13_spill] sm:$0xff] }
 0x5c2   :  { %10134 = vst [vmem:[#allocation32_spill] sm:$0xff] %v8029_v43  ;;  %v3158_v50 = vrot.slane %v3157_v8, 4  ;;  %v8047_v0 = vsub.f32 %v10139_v59, %v7717_v12  ;;  %v3552_v11 = vmul.f32 %v8023_v46, %v8023_v46  ;;  %v3712_v17 = vadd.f32 %v3711_v60, %v3486_v49  ;;  %v10145_v46 = vld [vmem:[#allocation54_spill] sm:$0xff] }
 0x5c3   :  { %10138 = vst [vmem:[#allocation46_spill] sm:$0xff] %v8041_v14  ;;  %v3676_v34 = vadd.f32 %v3675_v54, %v3513_v47  ;;  %v8053_v44 = vsub.f32 %v10141_v51, %v7878_v40  ;;  %v3521_v3 = vmul.f32 %v8029_v43, %v8029_v43  ;;  %v8059_v62 = vsub.f32 %v10143_v20, %v7788_v2  ;;  %v10147_v43 = vld [vmem:[#allocation80_spill] sm:$0xff] }
 0x5c4   :  { %10140 = vst [vmem:[#allocation76_spill] sm:$0xff] %v8047_v0  ;;  %v3490_v59 = vmul.f32 %v8035_v37, %v8035_v37  ;;  %v3159_v47 = vadd.f32 %v3158_v50, %v3157_v8  ;;  %v3643_v54 = vadd.f32 %v3642_v25, %v3552_v11  ;;  %v8065_v60 = vsub.f32 %v10145_v46, %v7878_v40  ;;  %v10149_v37 = vld [vmem:[#allocation58_spill] sm:$0xff]  ;;  %v10151_v25 = vld [vmem:[#allocation4_spill] sm:$0xff] }
 0x5c5   :  { %10142 = vst [vmem:[#allocation50_spill] sm:$0xff] %v8053_v44  ;;  %v3677_v30 = vadd.f32 %v3676_v34, %v3517_v31  ;;  %10144 = vst [vmem:[#allocation13_spill] sm:$0xff] %v8059_v62  ;;  %v3525_v51 = vmul.f32 %v8041_v14, %v8041_v14  ;;  %v8071_v31 = vsub.f32 %v10147_v43, %v7717_v12 }
 0x5c6   :  { %10146 = vst [vmem:[#allocation54_spill] sm:$0xff] %v8065_v60  ;;  %v3556_v34 = vmul.f32 %v8047_v0, %v8047_v0  ;;  %v3713_v20 = vadd.f32 %v3712_v17, %v3490_v59  ;;  %v8077_v8 = vsub.f32 %v10149_v37, %v7878_v40  ;;  %v3529_v46 = vmul.f32 %v8053_v44, %v8053_v44  ;;  %v10153_v0 = vld [vmem:[#allocation62_spill] sm:$0xff]  ;;  %v10155_v44 = vld [vmem:[#allocation83_spill] sm:$0xff] }
 0x5c7   :  { %v3678_v49 = vadd.f32 %v3677_v30, %v3521_v3  ;;  %10148 = vst [vmem:[#allocation80_spill] sm:$0xff] %v8071_v31  ;;  %v8083_v11 = vsub.f32 %v10151_v25, %v7788_v2  ;;  %v3494_v43 = vmul.f32 %v8059_v62, %v8059_v62  ;;  %v3160_v3 = vrot.slane %v3159_v47, 2  ;;  %v10157_v62 = vld [vmem:[#allocation66_spill] sm:$0xff] }
 0x5c8   :  { %10150 = vst [vmem:[#allocation58_spill] sm:$0xff] %v8077_v8  ;;  %v3644_v30 = vadd.f32 %v3643_v54, %v3556_v34  ;;  %v8089_v17 = vsub.f32 %v10153_v0, %v7878_v40  ;;  %v3533_v37 = vmul.f32 %v8065_v60, %v8065_v60  ;;  %v8101_v14 = vsub.f32 %v10157_v62, %v7878_v40  ;;  %v10159_v34 = vld [vmem:[#allocation5_spill] sm:$0xff] }
 0x5c9   :  { %v3679_v50 = vadd.f32 %v3678_v49, %v3525_v51  ;;  %10152 = vst [vmem:[#allocation4_spill] sm:$0xff] %v8083_v11  ;;  %v8095_v51 = vsub.f32 %v10155_v44, %v7717_v12  ;;  %v3560_v49 = vmul.f32 %v8071_v31, %v8071_v31  ;;  %v3714_v25 = vadd.f32 %v3713_v20, %v3494_v43  ;;  %v8114_v20 = vld [vmem:[%s9450_s4 + $0xb8] sm:$0xff]  }
 0x5ca   :  { %10154 = vst [vmem:[#allocation62_spill] sm:$0xff] %v8089_v17  ;;  %10158 = vst [vmem:[#allocation66_spill] sm:$0xff] %v8101_v14  ;;  %v3537_v0 = vmul.f32 %v8077_v8, %v8077_v8  ;;  %v8107_v60 = vsub.f32 %v10159_v34, %v7788_v2  ;;  %v3498_v44 = vmul.f32 %v8083_v11, %v8083_v11  ;;  %4941 = vmatpush1.bf16.msra.mxu0 %v8114_v20  ;;  %v10165_v11 = vmov 0  }
 0x5cb   :  { %v3680_v59 = vadd.f32 %v3679_v50, %v3529_v46  ;;  %10156 = vst [vmem:[#allocation83_spill] sm:$0xff] %v8095_v51  ;;  %v3161_v46 = vadd.f32 %v3160_v3, %v3159_v47  ;;  %v3645_v50 = vadd.f32 %v3644_v30, %v3560_v49  ;;  %v8118_v62 = vsub.f32 %v10030_v56, %v7878_v40 }
 0x5cc   :  { %10160 = vst [vmem:[#allocation5_spill] sm:$0xff] %v8107_v60  ;;  %v3541_v43 = vmul.f32 %v8089_v17, %v8089_v17  ;;  %v3564_v47 = vmul.f32 %v8095_v51, %v8095_v51  ;;  %v3715_v3 = vadd.f32 %v3714_v25, %v3498_v44  ;;  %v8131_v30 = vsub.f32 %v10031_v4, %v7878_v40  ;;  %v8145_v25 = vld [vmem:[%s9450_s4 + $0xb0] sm:$0xff]  }
 0x5cd   :  { %v3681_v54 = vadd.f32 %v3680_v59, %v3533_v37  ;;  %10161 = vst [vmem:[#allocation117_spill] sm:$0xff] %v8118_v62  ;;  %v10162_v59 = vld [vmem:[#allocation86_spill] sm:$0xff]  ;;  %v3545_v56 = vmul.f32 %v8101_v14, %v8101_v14  ;;  %4942 = vmatprep.subr.bf16.mxu0 %v10165_v11  ;;  %v3162_v51 = vrot.slane %v3161_v46, 1  ;;  %v8149_v44 = vsub.f32 %v10032_v58, %v7878_v40  ;;  %v10218_v17 = vld [vmem:[#allocation108_spill] sm:$0xff] }
 0x5ce   :  { %v8124_v34 = vsub.f32 %v10162_v59, %v7717_v12  ;;  %10164 = vst [vmem:[#allocation118_spill] sm:$0xff] %v8131_v30  ;;  %v3502_v59 = vmul.f32 %v8107_v60, %v8107_v60  ;;  %v3646_v4 = vadd.f32 %v3645_v50, %v3564_v47  ;;  %4943 = vmatpush1.bf16.msra.mxu0 %v8145_v25 }
 0x5cf   :  { %v3682_v37 = vadd.f32 %v3681_v54, %v3537_v0  ;;  %v10166_v0 = vld [vmem:[#allocation8_spill] sm:$0xff]  ;;  %10168 = vst [vmem:[#allocation119_spill] sm:$0xff] %v8149_v44  ;;  %v8162_v50 = vsub.f32 %v7517_v13, %v7878_v40  ;;  %v3553_v58 = vmul.f32 %v8131_v30, %v8131_v30  ;;  %4944 = vmatprep.subr.bf16.mxu0 %v10165_v11  ;;  %v8179_v13 = vld [vmem:[%s9450_s4 + $0xa8] sm:$0xff]  }
 0x5d0   :  { %10163 = vst [vmem:[#allocation86_spill] sm:$0xff] %v8124_v34  ;;  %v8138_v54 = vsub.f32 %v10166_v0, %v7788_v2  ;;  %v10169_v0 = vld [vmem:[#allocation89_spill] sm:$0xff]  ;;  %v3568_v60 = vmul.f32 %v8124_v34, %v8124_v34  ;;  %v3716_v14 = vadd.f32 %v3715_v3, %v3502_v59  ;;  %v3163_v34 = vadd.f32 %v3162_v51, %v3161_v46  ;;  %v5564_v3 = vld [vmem:[%s9450_s4 + $0x28] sm:$0xff]   ;;  %v10175_v51 = vld [vmem:[#allocation92_spill] sm:$0xff] }
 0x5d1   :  { %v3683_v49 = vadd.f32 %v3682_v37, %v3541_v43  ;;  %v3549_v43 = vmul.f32 %v8118_v62, %v8118_v62  ;;  %v8155_v31 = vsub.f32 %v10169_v0, %v7717_v12  ;;  %10171 = vst [vmem:[#allocation120_spill] sm:$0xff] %v8162_v50  ;;  %v8189_v46 = vsub.f32 %v10175_v51, %v7717_v12 }
 0x5d2   :  { %10167 = vst [vmem:[#allocation8_spill] sm:$0xff] %v8138_v54  ;;  %v3506_v0 = vmul.f32 %v8138_v54, %v8138_v54  ;;  %v3647_v59 = vadd.f32 %v3646_v4, %v3568_v60  ;;  %v8195_v30 = vsub.f32 %v7541_v55, %v7878_v40  ;;  %4760 = vmatpush1.bf16.msra.mxu1 %v5564_v3  ;;  %v5565_v3 = vld [vmem:[%s9450_s4 + $0x20] sm:$0xff]   ;;  %v8218_v51 = vmul.f32 0.0033333334, %v3163_v34 }
 0x5d3   :  { %v3684_v37 = vadd.f32 %v3683_v49, %v3545_v56  ;;  %10170 = vst [vmem:[#allocation89_spill] sm:$0xff] %v8155_v31  ;;  %v10172_v56 = vld [vmem:[#allocation15_spill] sm:$0xff]  ;;  %10176 = vst [vmem:[#allocation92_spill] sm:$0xff] %v8189_v46  ;;  %v3572_v54 = vmul.f32 %v8155_v31, %v8155_v31  ;;  %4945 = vmatpush1.bf16.msra.mxu0 %v8179_v13  ;;  %v3561_v60 = vmul.f32 %v8162_v50, %v8162_v50 }
 0x5d4   :  { %v8169_v49 = vsub.f32 %v10172_v56, %v7788_v2  ;;  %10177 = vst [vmem:[#allocation122_spill] sm:$0xff] %v8195_v30  ;;  %4761 = vmatprep.subr.bf16.mxu1 %v10165_v11  ;;  %4946 = vmatprep.subr.bf16.mxu0 %v10165_v11  ;;  %v8228_v50 = vsub.f32 %v7553_v29, %v7878_v40 }
 0x5d5   :  { %v3685_v47 = vadd.f32 %v3684_v37, %v3549_v43  ;;  %v8183_v43 = vsub.f32 %v7529_v45, %v7878_v40  ;;  %v3557_v37 = vmul.f32 %v8149_v44, %v8149_v44  ;;  %v3717_v45 = vadd.f32 %v3716_v14, %v3506_v0  ;;  %v8214_v14 = vld [vmem:[%s9450_s4 + $0xa0] sm:$0xff]  }
 0x5d6   :  { %10173 = vst [vmem:[#allocation15_spill] sm:$0xff] %v8169_v49  ;;  %v3510_v55 = vmul.f32 %v8169_v49, %v8169_v49  ;;  %v3648_v0 = vadd.f32 %v3647_v59, %v3572_v54  ;;  %v3576_v49 = vmul.f32 %v8189_v46, %v8189_v46  ;;  %10182 = vst [vmem:[#allocation123_spill] sm:$0xff] %v8228_v50  ;;  %4762 = vmatpush1.bf16.msra.mxu1 %v5565_v3  ;;  %v5567_v3 = vld [vmem:[%s9450_s4 + $0x18] sm:$0xff]  }
 0x5d7   :  { %10174 = vst [vmem:[#allocation121_spill] sm:$0xff] %v8183_v43  ;;  %v3686_v56 = vadd.f32 %v3685_v47, %v3553_v58  ;;  %v10178_v58 = vld [vmem:[#allocation24_spill] sm:$0xff]  ;;  %4947 = vmatpush1.bf16.msra.mxu0 %v8214_v14  ;;  %v3569_v59 = vmul.f32 %v8195_v30, %v8195_v30  ;;  %4763 = vmatprep.subr.bf16.mxu1 %v10165_v11 }
 0x5d8   :  { %v8204_v47 = vsub.f32 %v10178_v58, %v7788_v2  ;;  %v10180_v58 = vld [vmem:[#allocation94_spill] sm:$0xff]  ;;  %v3718_v54 = vadd.f32 %v3717_v45, %v3510_v55  ;;  %4948 = vmatprep.subr.bf16.mxu0 %v10165_v11  ;;  %v8247_v45 = vld [vmem:[%s9450_s4 + $0x98] sm:$0xff]   ;;  %v3649_v55 = vadd.f32 %v3648_v0, %v3576_v49  ;;  %v8266_v0 = vsub.f32 %v7565_v48, %v7878_v40  ;;  %v8284_v48 = vld [vmem:[%s9450_s4 + $0x90] sm:$0xff]  }
 0x5d9   :  { %v3687_v4 = vadd.f32 %v3686_v56, %v3557_v37  ;;  %v3565_v37 = vmul.f32 %v8183_v43, %v8183_v43  ;;  %v8222_v31 = vsub.f32 %v10180_v58, %v7717_v12  ;;  %v8255_v58 = vsub.f32 %v10037_v6, %v8218_v51  ;;  %v10190_v6 = vld [vmem:[#allocation37_spill] sm:$0xff]  ;;  %v10194_v30 = vld [vmem:[#allocation96_spill] sm:$0xff] }
 0x5da   :  { %10179 = vst [vmem:[#allocation24_spill] sm:$0xff] %v8204_v47  ;;  %v3514_v29 = vmul.f32 %v8204_v47, %v8204_v47  ;;  %4764 = vmatpush1.bf16.msra.mxu1 %v5567_v3  ;;  %10189 = vst [vmem:[#allocation126_spill] sm:$0xff] %v8266_v0  ;;  %v8298_v43 = vsub.f32 %v10194_v30, %v7878_v40  ;;  %v5571_v30 = vld [vmem:[%s9450_s4 + $0x8] sm:$0xff]   ;;  %v8405_v8 = vsub.f32 %v10218_v17, %v7878_v40 }
 0x5db   :  { %v3688_v56 = vadd.f32 %v3687_v4, %v3561_v60  ;;  %10181 = vst [vmem:[#allocation94_spill] sm:$0xff] %v8222_v31  ;;  %v10183_v60 = vld [vmem:[#allocation19_spill] sm:$0xff]  ;;  %10186 = vst [vmem:[#allocation125_spill] sm:$0xff] %v8255_v58  ;;  %v3580_v46 = vmul.f32 %v8222_v31, %v8222_v31  ;;  %4949 = vmatpush1.bf16.msra.mxu0 %v8247_v45  ;;  %4765 = vmatprep.subr.bf16.mxu1 %v10165_v11  ;;  %v10192_v31 = vld [vmem:[#allocation100_spill] sm:$0xff] }
 0x5dc   :  { %v8237_v4 = vsub.f32 %v10183_v60, %v7788_v2  ;;  %v10187_v60 = vld [vmem:[#allocation97_spill] sm:$0xff]  ;;  %v3719_v49 = vadd.f32 %v3718_v54, %v3514_v29  ;;  %4950 = vmatprep.subr.bf16.mxu0 %v10165_v11  ;;  %v5569_v54 = vld [vmem:[%s9450_s4 + $0x10] sm:$0xff]   ;;  %10195 = vst [vmem:[#allocation96_spill] sm:$0xff] %v8298_v43 }
 0x5dd   :  { %v3689_v34 = vadd.f32 %v3688_v56, %v3565_v37  ;;  %v8251_v56 = vsub.f32 %v10036_v41, %v8218_v51  ;;  %v8259_v47 = vsub.f32 %v10187_v60, %v7717_v12  ;;  %v3573_v41 = vmul.f32 %v8228_v50, %v8228_v50 }
 0x5de   :  { %10184 = vst [vmem:[#allocation19_spill] sm:$0xff] %v8237_v4  ;;  %v3650_v29 = vadd.f32 %v3649_v55, %v3580_v46  ;;  %4766 = vmatpush1.bf16.msra.mxu1 %v5569_v54  ;;  %v3577_v55 = vmul.f32 %v8266_v0, %v8266_v0  ;;  %v10199_v0 = vld [vmem:[#allocation103_spill] sm:$0xff] }
 0x5df   :  { %v3690_v37 = vadd.f32 %v3689_v34, %v3569_v59  ;;  %10185 = vst [vmem:[#allocation124_spill] sm:$0xff] %v8251_v56  ;;  %10188 = vst [vmem:[#allocation97_spill] sm:$0xff] %v8259_v47  ;;  %v8274_v59 = vsub.f32 %v10190_v6, %v7788_v2  ;;  %v3518_v34 = vmul.f32 %v8237_v4, %v8237_v4  ;;  %4951 = vmatpush1.bf16.msra.mxu0 %v8284_v48 }
 0x5e0   :  { %v3475_v60 = vmul.f32 %v8251_v56, %v8251_v56  ;;  %v3479_v6 = vmul.f32 %v8255_v58, %v8255_v58  ;;  %v8292_v4 = vsub.f32 %v10192_v31, %v7717_v12  ;;  %v3584_v50 = vmul.f32 %v8259_v47, %v8259_v47  ;;  %4767 = vmatprep.subr.bf16.mxu1 %v10165_v11  ;;  %v10197_v31 = vld [vmem:[#allocation45_spill] sm:$0xff]  ;;  %v10201_v58 = vld [vmem:[#allocation99_spill] sm:$0xff] }
 0x5e1   :  { %10191 = vst [vmem:[#allocation37_spill] sm:$0xff] %v8274_v59  ;;  %v3691_v3 = vadd.f32 %v3690_v37, %v3573_v41  ;;  %v3720_v46 = vadd.f32 %v3719_v49, %v3518_v34  ;;  %v8305_v37 = vsub.f32 %v10040_v5, %v8218_v51  ;;  %4952 = vmatprep.subr.bf16.mxu0 %v10165_v11  ;;  %v8319_v49 = vld [vmem:[%s9450_s4 + $0x88] sm:$0xff]  }
 0x5e2   :  { %10193 = vst [vmem:[#allocation100_spill] sm:$0xff] %v8292_v4  ;;  %v8311_v41 = vsub.f32 %v10197_v31, %v7788_v2  ;;  %v3651_v34 = vadd.f32 %v3650_v29, %v3584_v50  ;;  %v3522_v5 = vmul.f32 %v8274_v59, %v8274_v59  ;;  %v3753_v47 = vadd.f32 %v3479_v6, %v3475_v60  ;;  %v10203_v29 = vld [vmem:[#allocation41_spill] sm:$0xff] }
 0x5e3   :  { %10196 = vst [vmem:[#allocation127_spill] sm:$0xff] %v8305_v37  ;;  %v3692_v54 = vadd.f32 %v3691_v3, %v3577_v55  ;;  %v8325_v44 = vsub.f32 %v10199_v0, %v7717_v12  ;;  %v3588_v31 = vmul.f32 %v8292_v4, %v8292_v4  ;;  %v8331_v56 = vsub.f32 %v10201_v58, %v7878_v40  ;;  %v10205_v60 = vld [vmem:[#allocation49_spill] sm:$0xff]  ;;  %v5573_v58 = vld [vmem:[%s9450_s4] sm:$0xff]  }
 0x5e4   :  { %10198 = vst [vmem:[#allocation45_spill] sm:$0xff] %v8311_v41  ;;  %4768 = vmatpush1.bf16.msra.mxu1 %v5571_v30  ;;  %v3721_v62 = vadd.f32 %v3720_v46, %v3522_v5  ;;  %v3581_v50 = vmul.f32 %v8298_v43, %v8298_v43  ;;  %v8337_v3 = vsub.f32 %v10203_v29, %v8218_v51  ;;  %v8353_v46 = vld [vmem:[%s9450_s4 + $0x80] sm:$0xff]  }
 0x5e5   :  { %10200 = vst [vmem:[#allocation103_spill] sm:$0xff] %v8325_v44  ;;  %10202 = vst [vmem:[#allocation99_spill] sm:$0xff] %v8331_v56  ;;  %v3483_v0 = vmul.f32 %v8305_v37, %v8305_v37  ;;  %4769 = vmatprep.subr.bf16.mxu1 %v10165_v11  ;;  %v8344_v6 = vsub.f32 %v10205_v60, %v7788_v2  ;;  %4953 = vmatpush1.bf16.msra.mxu0 %v8319_v49  ;;  %v10207_v60 = vld [vmem:[#allocation106_spill] sm:$0xff] }
 0x5e6   :  { %10204 = vst [vmem:[#allocation41_spill] sm:$0xff] %v8337_v3  ;;  %v3652_v55 = vadd.f32 %v3651_v34, %v3588_v31  ;;  %v3526_v30 = vmul.f32 %v8311_v41, %v8311_v41  ;;  %v3693_v5 = vadd.f32 %v3692_v54, %v3581_v50  ;;  %4954 = vmatprep.subr.bf16.mxu0 %v10165_v11  ;;  %v10209_v43 = vld [vmem:[#allocation102_spill] sm:$0xff] }
 0x5e7   :  { %10206 = vst [vmem:[#allocation49_spill] sm:$0xff] %v8344_v6  ;;  %v3754_v29 = vadd.f32 %v3753_v47, %v3483_v0  ;;  %v8360_v59 = vsub.f32 %v10207_v60, %v7717_v12  ;;  %v3592_v4 = vmul.f32 %v8325_v44, %v8325_v44  ;;  %v8366_v37 = vsub.f32 %v10209_v43, %v7878_v40  ;;  %v10211_v47 = vld [vmem:[#allocation43_spill] sm:$0xff]  ;;  %v10212_v0 = vld [vmem:[#allocation53_spill] sm:$0xff] }
 0x5e8   :  { %4770 = vmatpush1.bf16.msra.mxu1 %v5573_v58  ;;  %v3722_v34 = vadd.f32 %v3721_v62, %v3526_v30  ;;  %v3585_v31 = vmul.f32 %v8331_v56, %v8331_v56  ;;  %v8372_v54 = vsub.f32 %v10211_v47, %v8218_v51  ;;  %v3487_v50 = vmul.f32 %v8337_v3, %v8337_v3  ;;  %v5575_v62 = vld [vmem:[%s9450_s4 + $0x78] sm:$0xff]  }
 0x5e9   :  { %10208 = vst [vmem:[#allocation106_spill] sm:$0xff] %v8360_v59  ;;  %10210 = vst [vmem:[#allocation102_spill] sm:$0xff] %v8366_v37  ;;  %4771 = vmatprep.subr.bf16.mxu1 %v10165_v11  ;;  %v8379_v60 = vsub.f32 %v10212_v0, %v7788_v2  ;;  %v3530_v43 = vmul.f32 %v8344_v6, %v8344_v6  ;;  %4955 = vmatpush1.bf16.msra.mxu0 %v8353_v46  ;;  %v8390_v58 = vld [vmem:[%s9450_s4 + $0xf8] sm:$0xff]  }
 0x5ea   :  { %v3653_v30 = vadd.f32 %v3652_v55, %v3592_v4  ;;  %v10214_v47 = vld [vmem:[#allocation105_spill] sm:$0xff]  ;;  %v3694_v0 = vadd.f32 %v3693_v5, %v3585_v31  ;;  %v3755_v41 = vadd.f32 %v3754_v29, %v3487_v50  ;;  %4956 = vmatprep.subr.bf16.mxu0 %v10165_v11  ;;  %v3596_v3 = vmul.f32 %v8360_v59, %v8360_v59  ;;  %v10220_v5 = vld [vmem:[#allocation14_spill] sm:$0xff] }
 0x5eb   :  { %10213 = vst [vmem:[#allocation43_spill] sm:$0xff] %v8379_v60  ;;  %v8394_v44 = vsub.f32 %v10214_v47, %v7878_v40  ;;  %v10216_v6 = vld [vmem:[#allocation109_spill] sm:$0xff]  ;;  %v3723_v4 = vadd.f32 %v3722_v34, %v3530_v43  ;;  %v3589_v55 = vmul.f32 %v8366_v37, %v8366_v37  ;;  %v8411_v29 = vsub.f32 %v10220_v5, %v8218_v51  ;;  %v10223_v34 = vld [vmem:[#allocation111_spill] sm:$0xff]  ;;  %v5577_v43 = vld [vmem:[%s9450_s4 + $0x70] sm:$0xff]  }
 0x5ec   :  { %v8399_v56 = vsub.f32 %v10216_v6, %v7717_v12  ;;  %10219 = vst [vmem:[#allocation109_spill] sm:$0xff] %v8405_v8  ;;  %4772 = vmatpush2.bf16.msra.mxu1 %v5575_v62  ;;  %v3491_v12 = vmul.f32 %v8372_v54, %v8372_v54  ;;  %v10221_v6 = vld [vmem:[#allocation57_spill] sm:$0xff]  ;;  %v3534_v17 = vmul.f32 %v8379_v60, %v8379_v60 }
 0x5ed   :  { %10215 = vst [vmem:[#allocation53_spill] sm:$0xff] %v8394_v44  ;;  %4773 = vmatprep.subr.bf16.mxu1 %v10165_v11  ;;  %v8418_v31 = vsub.f32 %v10221_v6, %v7788_v2  ;;  %v8424_v50 = vsub.f32 %v10223_v34, %v7878_v40  ;;  %4957 = vmatpush2.bf16.msra.mxu0 %v8390_v58 }
 0x5ee   :  { %10217 = vst [vmem:[#allocation105_spill] sm:$0xff] %v8399_v56  ;;  %v3654_v62 = vadd.f32 %v3653_v30, %v3596_v3  ;;  %v3593_v47 = vmul.f32 %v8394_v44, %v8394_v44  ;;  %v3695_v5 = vadd.f32 %v3694_v0, %v3589_v55  ;;  %v3756_v6 = vadd.f32 %v3755_v41, %v3491_v12  ;;  %v10226_v30 = vld [vmem:[#allocation21_spill] sm:$0xff] }
 0x5ef   :  { %10222 = vst [vmem:[#allocation108_spill] sm:$0xff] %v8418_v31  ;;  %10224 = vst [vmem:[#allocation14_spill] sm:$0xff] %v8424_v50  ;;  %4958 = vmatprep.subr.bf16.mxu0 %v10165_v11  ;;  %v3600_v60 = vmul.f32 %v8399_v56, %v8399_v56  ;;  %v8437_v34 = vsub.f32 %v7658_v38, %v7878_v40  ;;  %v3597_v59 = vmul.f32 %v8405_v8, %v8405_v8  ;;  %v10227_v0 = vld [vmem:[#allocation61_spill] sm:$0xff] }
 0x5f0   :  { %4774 = vmatpush2.bf16.msra.mxu1 %v5577_v43  ;;  %v3724_v37 = vadd.f32 %v3723_v4, %v3534_v17  ;;  %v3696_v3 = vadd.f32 %v3695_v5, %v3593_v47  ;;  %v8443_v44 = vsub.f32 %v10226_v30, %v8218_v51  ;;  %v3495_v41 = vmul.f32 %v8411_v29, %v8411_v29  ;;  %v10229_v47 = vld [vmem:[#allocation70_spill] sm:$0xff] }
 0x5f1   :  { %10225 = vst [vmem:[#allocation57_spill] sm:$0xff] %v8437_v34  ;;  %4775 = vmatprep.subr.bf16.mxu1 %v10165_v11  ;;  %v8450_v55 = vsub.f32 %v10227_v0, %v7788_v2  ;;  %v3538_v38 = vmul.f32 %v8418_v31, %v8418_v31  ;;  %v3655_v12 = vadd.f32 %v3654_v62, %v3600_v60  ;;  %v10231_v62 = vld [vmem:[#allocation65_spill] sm:$0xff] }
 0x5f2   :  { %v3601_v4 = vmul.f32 %v8424_v50, %v8424_v50  ;;  %v3697_v17 = vadd.f32 %v3696_v3, %v3597_v59  ;;  %v3757_v43 = vadd.f32 %v3756_v6, %v3495_v41  ;;  %v3604_v5 = vmul.f32 %v10229_v47, %v10229_v47 }
 0x5f3   :  { %10228 = vst [vmem:[#allocation111_spill] sm:$0xff] %v8450_v55  ;;  %v8460_v30 = vsub.f32 %v7670_v63, %v7878_v40  ;;  %v3605_v0 = vmul.f32 %v8437_v34, %v8437_v34  ;;  %v3725_v56 = vadd.f32 %v3724_v37, %v3538_v38  ;;  %v8466_v60 = vsub.f32 %v10055_v23, %v8218_v51  ;;  %v10234_v38 = vld [vmem:[#allocation74_spill] sm:$0xff]  ;;  %v8640_v34 = vld [vmem:[%s9450_s4 + $0xc8] sm:$0xff]  }
 0x5f4   :  { %v3698_v8 = vadd.f32 %v3697_v17, %v3601_v4  ;;  %v3499_v59 = vmul.f32 %v8443_v44, %v8443_v44  ;;  %v8472_v6 = vsub.f32 %v10231_v62, %v7788_v2  ;;  %v3656_v3 = vadd.f32 %v3655_v12, %v3604_v5  ;;  %v10236_v5 = vld [vmem:[#allocation69_spill] sm:$0xff] }
 0x5f5   :  { %10230 = vst [vmem:[#allocation21_spill] sm:$0xff] %v8460_v30  ;;  %v3542_v63 = vmul.f32 %v8450_v55, %v8450_v55  ;;  %v8478_v37 = vsub.f32 %v7682_v33, %v7878_v40  ;;  %v3609_v23 = vmul.f32 %v8460_v30, %v8460_v30  ;;  %v3608_v4 = vmul.f32 %v10234_v38, %v10234_v38  ;;  %v10248_v55 = vld [vmem:[#allocation77_spill] sm:$0xff] }
 0x5f6   :  { %10232 = vst [vmem:[#allocation61_spill] sm:$0xff] %v8472_v6  ;;  %v3699_v41 = vadd.f32 %v3698_v8, %v3605_v0  ;;  %v3758_v31 = vadd.f32 %v3757_v43, %v3499_v59  ;;  %v8486_v62 = vsub.f32 %v10056_v32, %v8218_v51  ;;  %v3503_v12 = vmul.f32 %v8466_v60, %v8466_v60 }
 0x5f7   :  { %10233 = vst [vmem:[#allocation65_spill] sm:$0xff] %v8478_v37  ;;  %v3726_v17 = vadd.f32 %v3725_v56, %v3542_v63  ;;  %v3657_v43 = vadd.f32 %v3656_v3, %v3608_v4  ;;  %v8492_v33 = vsub.f32 %v10236_v5, %v7788_v2  ;;  %v3546_v0 = vmul.f32 %v8472_v6, %v8472_v6  ;;  %v5579_v56 = vld [vmem:[%s9450_s4 + $0x68] sm:$0xff]   ;;  %v10242_v6 = vld [vmem:[#allocation73_spill] sm:$0xff] }
 0x5f8   :  { %10235 = vst [vmem:[#allocation128_spill] sm:$0xff] %v8486_v62  ;;  %v3700_v8 = vadd.f32 %v3699_v41, %v3609_v23  ;;  %v3759_v59 = vadd.f32 %v3758_v31, %v3503_v12  ;;  %v8501_v32 = vsub.f32 %v7690_v28, %v7878_v40  ;;  %v8505_v63 = vsub.f32 %v7791_v53, %v7878_v40  ;;  %v8512_v41 = vld [vmem:[%s9450_s4 + $0xf0] sm:$0xff]   ;;  %v10240_v31 = vld [vmem:[#allocation78_spill] sm:$0xff] }
 0x5f9   :  { %10237 = vst [vmem:[#allocation69_spill] sm:$0xff] %v8492_v33  ;;  %v3613_v3 = vmul.f32 %v8478_v37, %v8478_v37  ;;  %v3612_v23 = vmul.f32 %v10240_v31, %v10240_v31  ;;  %v3727_v4 = vadd.f32 %v3726_v17, %v3546_v0  ;;  %v8518_v28 = vsub.f32 %v10059_v21, %v8218_v51  ;;  %v5581_v40 = vld [vmem:[%s9450_s4 + $0x60] sm:$0xff]   ;;  %v8536_v0 = vld [vmem:[%s9450_s4 + $0xe8] sm:$0xff]  }
 0x5fa   :  { %10238 = vst [vmem:[#allocation129_spill] sm:$0xff] %v8501_v32  ;;  %10239 = vst [vmem:[#allocation130_spill] sm:$0xff] %v8505_v63  ;;  %v3507_v53 = vmul.f32 %v8486_v62, %v8486_v62  ;;  %4776 = vmatpush2.bf16.msra.mxu1 %v5579_v56  ;;  %v8528_v31 = vsub.f32 %v10242_v6, %v7788_v2  ;;  %v3550_v21 = vmul.f32 %v8492_v33, %v8492_v33  ;;  %v10244_v56 = vld [vmem:[#allocation34_spill] sm:$0xff] }
 0x5fb   :  { %10241 = vst [vmem:[#allocation131_spill] sm:$0xff] %v8518_v28  ;;  %v3701_v12 = vadd.f32 %v3700_v8, %v3613_v3  ;;  %4777 = vmatprep.subr.bf16.mxu1 %v10165_v11  ;;  %v3658_v5 = vadd.f32 %v3657_v43, %v3612_v23  ;;  %4959 = vmatpush2.bf16.msra.mxu0 %v8512_v41  ;;  %v10245_v8 = vld [vmem:[#allocation2_spill] sm:$0xff] }
 0x5fc   :  { %10243 = vst [vmem:[#allocation73_spill] sm:$0xff] %v8528_v31  ;;  %v3760_v17 = vadd.f32 %v3759_v59, %v3507_v53  ;;  %v3468_v3 = vmul.f32 %v10245_v8, %v10244_v56  ;;  %v3469_v43 = vmul.f32 %v10245_v8, %v8505_v63  ;;  %v3617_v6 = vmul.f32 %v8501_v32, %v8501_v32  ;;  %v10246_v23 = vld [vmem:[#allocation26_spill] sm:$0xff]  ;;  %v5583_v56 = vld [vmem:[%s9450_s4 + $0x58] sm:$0xff]  }
 0x5fd   :  { %4960 = vmatprep.subr.bf16.mxu0 %v10165_v11  ;;  %v3616_v59 = vmul.f32 %v10246_v23, %v10246_v23  ;;  %v3728_v53 = vadd.f32 %v3727_v4, %v3550_v21  ;;  %v8549_v33 = vsub.f32 %v10060_v15, %v8218_v51  ;;  %v3511_v38 = vmul.f32 %v8518_v28, %v8518_v28 }
 0x5fe   :  { %4778 = vmatpush2.bf16.msra.mxu1 %v5581_v40  ;;  %v3702_v63 = vadd.f32 %v3701_v12, %v3617_v6  ;;  %v8559_v23 = vsub.f32 %v10248_v55, %v7788_v2  ;;  %v3554_v15 = vmul.f32 %v8528_v31, %v8528_v31  ;;  %v8567_v40 = vld [vmem:[%s9450_s4 + $0xe0] sm:$0xff]   ;;  %v3621_v21 = vmul.f32 %v3469_v43, %v3469_v43  ;;  %v10257_v31 = vld [vmem:[#allocation47_spill] sm:$0xff] }
 0x5ff   :  { %10247 = vst [vmem:[#allocation2_spill] sm:$0xff] %v8549_v33  ;;  %4779 = vmatprep.subr.bf16.mxu1 %v10165_v11  ;;  %v3659_v32 = vadd.f32 %v3658_v5, %v3616_v59  ;;  %v3761_v4 = vadd.f32 %v3760_v17, %v3511_v38  ;;  %4961 = vmatpush2.bf16.msra.mxu0 %v8536_v0  ;;  %v5585_v38 = vld [vmem:[%s9450_s4 + $0x50] sm:$0xff]   ;;  %v10251_v59 = vld [vmem:[#allocation81_spill] sm:$0xff] }
 0x600   :  { %10249 = vst [vmem:[#allocation77_spill] sm:$0xff] %v8559_v23  ;;  %4962 = vmatprep.subr.bf16.mxu0 %v10165_v11  ;;  %v3620_v12 = vmul.f32 %v3468_v3, %v3468_v3  ;;  %v3729_v5 = vadd.f32 %v3728_v53, %v3554_v15  ;;  %v8572_v55 = vsub.f32 %v10064_v24, %v8218_v51 }
 0x601   :  { %v3515_v6 = vmul.f32 %v8549_v33, %v8549_v33  ;;  %v3703_v17 = vadd.f32 %v3702_v63, %v3621_v21  ;;  %v8582_v3 = vsub.f32 %v10251_v59, %v7788_v2  ;;  %v3558_v24 = vmul.f32 %v8559_v23, %v8559_v23  ;;  %v10255_v59 = vld [vmem:[#allocation84_spill] sm:$0xff]  ;;  %v10272_v33 = vld [vmem:[#allocation67_spill] sm:$0xff] }
 0x602   :  { %10250 = vst [vmem:[#allocation132_spill] sm:$0xff] %v8572_v55  ;;  %4780 = vmatpush2.bf16.msra.mxu1 %v5583_v56  ;;  %v3660_v43 = vadd.f32 %v3659_v32, %v3620_v12  ;;  %v8590_v56 = vld [vmem:[%s9450_s4 + $0xd8] sm:$0xff]   ;;  %v10253_v32 = vld [vmem:[#allocation31_spill] sm:$0xff]  ;;  %v3519_v21 = vmul.f32 %v8572_v55, %v8572_v55  ;;  %v8605_v23 = vsub.f32 %v10255_v59, %v7788_v2 }
 0x603   :  { %4781 = vmatprep.subr.bf16.mxu1 %v10165_v11  ;;  %10252 = vst [vmem:[#allocation81_spill] sm:$0xff] %v8582_v3  ;;  %v3762_v53 = vadd.f32 %v3761_v4, %v3515_v6  ;;  %4963 = vmatpush2.bf16.msra.mxu0 %v8567_v40  ;;  %v3730_v63 = vadd.f32 %v3729_v5, %v3558_v24  ;;  %v5587_v4 = vld [vmem:[%s9450_s4 + $0x48] sm:$0xff]   ;;  %v3704_v12 = vrot.slane %v3703_v17, 4 }
 0x604   :  { %4964 = vmatprep.subr.bf16.mxu0 %v10165_v11  ;;  %v8595_v15 = vsub.f32 %v10253_v32, %v8218_v51  ;;  %v3661_v6 = vrot.slane %v3660_v43, 4  ;;  %10256 = vst [vmem:[#allocation84_spill] sm:$0xff] %v8605_v23  ;;  %v3562_v5 = vmul.f32 %v8582_v3, %v8582_v3  ;;  %v8618_v37 = vsub.f32 %v10257_v31, %v8218_v51 }
 0x605   :  { %v3763_v24 = vadd.f32 %v3762_v53, %v3519_v21  ;;  %v5591_v53 = vld [vmem:[%s9450_s4 + $0x40] sm:$0xff]   ;;  %v10259_v21 = vld [vmem:[#allocation87_spill] sm:$0xff]  ;;  %v3705_v30 = vadd.f32 %v3704_v12, %v3703_v17  ;;  %v3566_v31 = vmul.f32 %v8605_v23, %v8605_v23 }
 0x606   :  { %10254 = vst [vmem:[#allocation31_spill] sm:$0xff] %v8595_v15  ;;  %4782 = vmatpush2.bf16.msra.mxu1 %v5585_v38  ;;  %v8613_v38 = vld [vmem:[%s9450_s4 + $0xd0] sm:$0xff]   ;;  %v3731_v32 = vadd.f32 %v3730_v63, %v3562_v5  ;;  %10258 = vst [vmem:[#allocation47_spill] sm:$0xff] %v8618_v37  ;;  %v3523_v59 = vmul.f32 %v8595_v15, %v8595_v15  ;;  %v8627_v3 = vsub.f32 %v10259_v21, %v7788_v2  ;;  %v10261_v5 = vld [vmem:[#allocation51_spill] sm:$0xff] }
 0x607   :  { %4783 = vmatprep.subr.bf16.mxu1 %v10165_v11  ;;  %4965 = vmatpush2.bf16.msra.mxu0 %v8590_v56  ;;  %v3662_v63 = vadd.f32 %v3661_v6, %v3660_v43  ;;  %v8634_v47 = vsub.f32 %v10261_v5, %v8218_v51  ;;  %v8645_v43 = vsub.f32 %v10075_v26, %v8218_v51  ;;  %v10264_v6 = vld [vmem:[#allocation90_spill] sm:$0xff]  ;;  %v3706_v21 = vrot.slane %v3705_v30, 2 }
 0x608   :  { %4966 = vmatprep.subr.bf16.mxu0 %v10165_v11  ;;  %10260 = vst [vmem:[#allocation87_spill] sm:$0xff] %v8627_v3  ;;  %v3732_v17 = vadd.f32 %v3731_v32, %v3566_v31  ;;  %v3527_v12 = vmul.f32 %v8618_v37, %v8618_v37  ;;  %v10266_v32 = vld [vmem:[#allocation59_spill] sm:$0xff] }
 0x609   :  { %10262 = vst [vmem:[#allocation51_spill] sm:$0xff] %v8634_v47  ;;  %10263 = vst [vmem:[#allocation133_spill] sm:$0xff] %v8645_v43  ;;  %v3663_v5 = vrot.slane %v3662_v63, 2  ;;  %v8658_v31 = vsub.f32 %v10266_v32, %v8218_v51  ;;  %v3531_v26 = vmul.f32 %v8634_v47, %v8634_v47  ;;  %v3535_v32 = vmul.f32 %v8645_v43, %v8645_v43 }
 0x60a   :  { %4784 = vmatpush2.bf16.msra.mxu1 %v5587_v4  ;;  %v3764_v4 = vadd.f32 %v3763_v24, %v3523_v59  ;;  %v8651_v24 = vsub.f32 %v10264_v6, %v7788_v2  ;;  %v3570_v59 = vmul.f32 %v8627_v3, %v8627_v3  ;;  %v10268_v3 = vld [vmem:[#allocation63_spill] sm:$0xff]  ;;  %v3707_v15 = vadd.f32 %v3706_v21, %v3705_v30 }
 0x60b   :  { %4785 = vmatprep.subr.bf16.mxu1 %v10165_v11  ;;  %4967 = vmatpush2.bf16.msra.mxu0 %v8613_v38  ;;  %10267 = vst [vmem:[#allocation59_spill] sm:$0xff] %v8658_v31  ;;  %v8671_v50 = vsub.f32 %v10268_v3, %v8218_v51  ;;  %v3664_v55 = vadd.f32 %v3663_v5, %v3662_v63  ;;  %v10275_v63 = vld [vmem:[#allocation95_spill] sm:$0xff] }
 0x60c   :  { %4968 = vmatprep.subr.bf16.mxu0 %v10165_v11  ;;  %10265 = vst [vmem:[#allocation90_spill] sm:$0xff] %v8651_v24  ;;  %v3765_v23 = vadd.f32 %v3764_v4, %v3527_v12  ;;  %v3733_v6 = vadd.f32 %v3732_v17, %v3570_v59  ;;  %v10270_v4 = vld [vmem:[#allocation93_spill] sm:$0xff]  ;;  %v3574_v47 = vmul.f32 %v8651_v24, %v8651_v24 }
 0x60d   :  { %10269 = vst [vmem:[#allocation63_spill] sm:$0xff] %v8671_v50  ;;  %v8677_v12 = vsub.f32 %v10270_v4, %v7788_v2  ;;  %v8683_v17 = vsub.f32 %v10272_v33, %v8218_v51  ;;  %v3539_v3 = vmul.f32 %v8658_v31, %v8658_v31  ;;  %v3543_v4 = vmul.f32 %v8671_v50, %v8671_v50  ;;  %v10279_v31 = vld [vmem:[#allocation98_spill] sm:$0xff] }
 0x60e   :  { %4786 = vmatpush2.bf16.msra.mxu1 %v5591_v53  ;;  %v8666_v53 = vld [vmem:[%s9450_s4 + $0xc0] sm:$0xff]   ;;  %v3766_v37 = vadd.f32 %v3765_v23, %v3531_v26  ;;  %v3734_v23 = vadd.f32 %v3733_v6, %v3574_v47  ;;  %v8690_v26 = vsub.f32 %v10082_v7, %v8218_v51  ;;  %v8696_v21 = vsub.f32 %v10275_v63, %v7788_v2  ;;  %v10277_v7 = vld [vmem:[#allocation75_spill] sm:$0xff] }
 0x60f   :  { %5335 = vmatprep.subr.bf16.mxu1 %v10165_v11  ;;  %4969 = vmatpush2.bf16.msra.mxu0 %v8640_v34  ;;  %10271 = vst [vmem:[#allocation93_spill] sm:$0xff] %v8677_v12  ;;  %10273 = vst [vmem:[#allocation67_spill] sm:$0xff] %v8683_v17  ;;  %v3708_v33 = vrot.slane %v3707_v15, 1  ;;  %v3665_v5 = vrot.slane %v3664_v55, 1  ;;  %v3547_v47 = vmul.f32 %v8683_v17, %v8683_v17 }
 0x610   :  { %4970 = vmatprep.subr.bf16.mxu0 %v10165_v11  ;;  %v3767_v59 = vadd.f32 %v3766_v37, %v3535_v32  ;;  %10274 = vst [vmem:[#allocation134_spill] sm:$0xff] %v8690_v26  ;;  %10276 = vst [vmem:[#allocation95_spill] sm:$0xff] %v8696_v21  ;;  %v3578_v37 = vmul.f32 %v8677_v12, %v8677_v12  ;;  %v8704_v32 = vsub.f32 %v10277_v7, %v8218_v51 }
 0x611   :  { %v3709_v63 = vadd.f32 %v3708_v33, %v3707_v15  ;;  %v3666_v50 = vadd.f32 %v3665_v5, %v3664_v55  ;;  %v8710_v43 = vsub.f32 %v10279_v31, %v7788_v2  ;;  %v3582_v12 = vmul.f32 %v8696_v21, %v8696_v21  ;;  %v10282_v55 = vld [vmem:[#allocation101_spill] sm:$0xff]  ;;  %v10310_v21 = vld [vmem:[#allocation36_spill] sm:$0xff] }
 0x612   :  { %v3768_v30 = vadd.f32 %v3767_v59, %v3539_v3  ;;  %10278 = vst [vmem:[#allocation75_spill] sm:$0xff] %v8704_v32  ;;  %v3735_v24 = vadd.f32 %v3734_v23, %v3578_v37  ;;  %v3551_v3 = vmul.f32 %v8690_v26, %v8690_v26  ;;  %v3555_v23 = vmul.f32 %v8704_v32, %v8704_v32 }
 0x613   :  { %4971 = vmatpush2.bf16.msra.mxu0 %v8666_v53  ;;  %10280 = vst [vmem:[#allocation98_spill] sm:$0xff] %v8710_v43  ;;  %v3797_v37 = vmul.f32 0.0033333334, %v3709_v63  ;;  %v3796_v15 = vmul.f32 0.0033333334, %v3666_v50  ;;  %v8722_v33 = vsub.f32 %v10282_v55, %v7788_v2  ;;  %v3586_v31 = vmul.f32 %v8710_v43, %v8710_v43  ;;  %v10285_v50 = vld [vmem:[#allocation104_spill] sm:$0xff] }
 0x614   :  { %v3769_v6 = vadd.f32 %v3768_v30, %v3543_v4  ;;  %v8716_v4 = vsub.f32 %v10085_v57, %v8218_v51  ;;  %v3736_v30 = vadd.f32 %v3735_v24, %v3582_v12  ;;  %v8728_v5 = vsub.f32 %v10086_v10, %v8218_v51 }
 0x615   :  { %10283 = vst [vmem:[#allocation101_spill] sm:$0xff] %v8722_v33  ;;  %v3801_v7 = vadd.f32 1e-05, %v3797_v37  ;;  %v3800_v12 = vadd.f32 1e-05, %v3796_v15  ;;  %v8752_v15 = vsub.f32 %v10090_v16, %v8218_v51  ;;  %v8768_v16 = vsub.f32 %v7567_v22, %v8218_v51 }
 0x616   :  { %v3770_v59 = vadd.f32 %v3769_v6, %v3547_v47  ;;  %10281 = vst [vmem:[#allocation135_spill] sm:$0xff] %v8716_v4  ;;  %10284 = vst [vmem:[#allocation136_spill] sm:$0xff] %v8728_v5  ;;  %v3559_v57 = vmul.f32 %v8716_v4, %v8716_v4  ;;  %v3737_v6 = vadd.f32 %v3736_v30, %v3586_v31  ;;  %v10288_v30 = vld [vmem:[#allocation107_spill] sm:$0xff] }
 0x617   :  { %v3563_v10 = vmul.f32 %v8728_v5, %v8728_v5  ;;  %5600 = vrsqrt.f32 %v3801_v7  ;;  %v8746_v37 = vsub.f32 %v10288_v30, %v7788_v2  ;;  %10290 = vst [vmem:[#allocation138_spill] sm:$0xff] %v8752_v15  ;;  %v8758_v31 = vsub.f32 %v10092_v52, %v8218_v51  ;;  %10294 = vst [vmem:[#allocation140_spill] sm:$0xff] %v8768_v16  ;;  %v10318_v5 = vld [vmem:[#allocation56_spill] sm:$0xff] }
 0x618   :  { %v3771_v17 = vadd.f32 %v3770_v59, %v3551_v3  ;;  %v3590_v3 = vmul.f32 %v8722_v33, %v8722_v33  ;;  %v8740_v59 = vsub.f32 %v10089_v42, %v8218_v51  ;;  %5602 = vrsqrt.f32 %v3800_v12  ;;  %v10305_v33 = vld [vmem:[#allocation20_spill] sm:$0xff] }
 0x619   :  { %10289 = vst [vmem:[#allocation107_spill] sm:$0xff] %v8746_v37  ;;  %10291 = vst [vmem:[#allocation139_spill] sm:$0xff] %v8758_v31  ;;  %v3571_v12 = vmul.f32 %v8752_v15, %v8752_v15  ;;  %v8774_v52 = vsub.f32 %v7579_v1, %v8218_v51  ;;  %v3579_v22 = vmul.f32 %v8768_v16, %v8768_v16 }
 0x61a   :  { %v3772_v47 = vadd.f32 %v3771_v17, %v3555_v23  ;;  %v8734_v17 = vsub.f32 %v10285_v50, %v7788_v2  ;;  %10287 = vst [vmem:[#allocation137_spill] sm:$0xff] %v8740_v59  ;;  %v3738_v63 = vadd.f32 %v3737_v6, %v3590_v3  ;;  %v3567_v42 = vmul.f32 %v8740_v59, %v8740_v59  ;;  %v10292_v6 = vld [vmem:[#allocation110_spill] sm:$0xff]  ;;  %v10317_v59 = vld [vmem:[#allocation35_spill] sm:$0xff] }
 0x61b   :  { %v8762_v7 = vsub.f32 %v10292_v6, %v7788_v2  ;;  %10295 = vst [vmem:[#allocation141_spill] sm:$0xff] %v8774_v52  ;;  %v3575_v3 = vmul.f32 %v8758_v31, %v8758_v31  ;;  %v8788_v1 = vsub.f32 %v7603_v61, %v8218_v51 }
 0x61c   :  { %v3773_v24 = vadd.f32 %v3772_v47, %v3559_v57  ;;  %10286 = vst [vmem:[#allocation104_spill] sm:$0xff] %v8734_v17  ;;  %v3594_v47 = vmul.f32 %v8734_v17, %v8734_v17 }
 0x61d   :  { %10293 = vst [vmem:[#allocation110_spill] sm:$0xff] %v8762_v7  ;;  %10297 = vst [vmem:[#allocation143_spill] sm:$0xff] %v8788_v1 }
 0x61e   :  { %v3774_v23 = vadd.f32 %v3773_v24, %v3563_v10  ;;  %v3739_v55 = vadd.f32 %v3738_v63, %v3594_v47  ;;  %v3598_v24 = vmul.f32 %v8746_v37, %v8746_v37  ;;  %v3602_v10 = vmul.f32 %v8762_v7, %v8762_v7  ;;  %v10304_v37 = vld [vmem:[#allocation39_spill] sm:$0xff] }
 0x61f   :  { %v8782_v63 = vsub.f32 %v7591_v39, %v8218_v51  ;;  %v3583_v47 = vmul.f32 %v8774_v52, %v8774_v52  ;;  %v8798_v39 = vsub.f32 %v7618_v35, %v8218_v51  ;;  %v8814_v7 = vsub.f32 %v7632_v18, %v8218_v51 }
 0x620   :  { %v3775_v57 = vadd.f32 %v3774_v23, %v3567_v42  ;;  %v3740_v50 = vadd.f32 %v3739_v55, %v3598_v24 }
 0x621   :  { %10296 = vst [vmem:[#allocation142_spill] sm:$0xff] %v8782_v63  ;;  %10299 = vst [vmem:[#allocation144_spill] sm:$0xff] %v8798_v39 }
 0x622   :  { %v3776_v2 = vadd.f32 %v3775_v57, %v3571_v12  ;;  %v3741_v30 = vadd.f32 %v3740_v50, %v3602_v10  ;;  %v10298_v57 = vld [vmem:[#allocation12_spill] sm:$0xff]  ;;  %v3587_v12 = vmul.f32 %v8782_v63, %v8782_v63  ;;  %v10300_v50 = vld [vmem:[#allocation3_spill] sm:$0xff]  ;;  %10303 = vst [vmem:[#allocation145_spill] sm:$0xff] %v8814_v7 }
 0x623   :  { %v3606_v6 = vmul.f32 %v10298_v57, %v10298_v57  ;;  %v10308_v63 = vld [vmem:[#allocation91_spill] sm:$0xff] }
 0x624   :  { %v3777_v23 = vadd.f32 %v3776_v2, %v3575_v3  ;;  %v8792_v55 = vpop.eup %5600  ;;  %v3470_v3 = vmul.f32 %v10245_v8, %v10300_v50  ;;  %v10301_v2 = vld [vmem:[#allocation44_spill] sm:$0xff] }
 0x625   :  { %v8800_v24 = vpop.eup %5602  ;;  %v3610_v10 = vmul.f32 %v10301_v2, %v10301_v2  ;;  %v3742_v57 = vadd.f32 %v3741_v30, %v3606_v6  ;;  %v3809_v35 = vmul.f32 %v8792_v55, %v7890_v27  ;;  %v8824_v30 = vsub.f32 %v7646_v19, %v8218_v51  ;;  %v10307_v6 = vld [vmem:[#allocation85_spill] sm:$0xff] }
 0x626   :  { %v3778_v42 = vadd.f32 %v3777_v23, %v3579_v22  ;;  %v10302_v22 = vld [vmem:[#allocation17_spill] sm:$0xff]  ;;  %v3808_v17 = vmul.f32 %v8800_v24, %v10304_v37  ;;  %v3812_v43 = vmul.f32 %v8800_v24, %v10305_v33  ;;  %v3595_v27 = vmul.f32 %v8798_v39, %v8798_v39  ;;  %v10312_v39 = vld [vmem:[#allocation112_spill] sm:$0xff] }
 0x627   :  { %v3614_v23 = vmul.f32 %v10302_v22, %v10302_v22  ;;  %10306 = vst [vmem:[#allocation39_spill] sm:$0xff] %v8824_v30  ;;  %v3813_v18 = vmul.f32 %v8792_v55, %v10307_v6  ;;  %v3618_v33 = vmul.f32 %v10310_v21, %v10310_v21  ;;  %v3743_v52 = vadd.f32 %v3742_v57, %v3610_v10  ;;  %v10314_v57 = vld [vmem:[#allocation114_spill] sm:$0xff]  ;;  %v10315_v22 = vld [vmem:[#allocation16_spill] sm:$0xff] }
 0x628   :  { %v3779_v61 = vadd.f32 %v3778_v42, %v3583_v47  ;;  %v3591_v47 = vmul.f32 %v8788_v1, %v8788_v1  ;;  %v3817_v1 = vmul.f32 %v8792_v55, %v10308_v63  ;;  %v8838_v19 = vsub.f32 %v7660_v9, %v8218_v51 }
 0x629   :  { %v8842_v16 = vsub.f32 %v10312_v39, %v8218_v51  ;;  %v8846_v6 = vsub.f32 %v10117_v36, %v8218_v51  ;;  %v3599_v63 = vmul.f32 %v8814_v7, %v8814_v7  ;;  %v3964_v21 = vmul.f32 0.01, %v3812_v43 }
 0x62a   :  { %v3780_v42 = vadd.f32 %v3779_v61, %v3587_v12  ;;  %v10309_v12 = vld [vmem:[#allocation48_spill] sm:$0xff]  ;;  %10311 = vst [vmem:[#allocation20_spill] sm:$0xff] %v8838_v19  ;;  %v8852_v10 = vsub.f32 %v10314_v57, %v8218_v51  ;;  %v3603_v9 = vmul.f32 %v8824_v30, %v8824_v30  ;;  %v3965_v31 = vmul.f32 0.01, %v3813_v18  ;;  %v10316_v57 = vld [vmem:[#allocation27_spill] sm:$0xff] }
 0x62b   :  { %v3821_v61 = vmul.f32 %v8792_v55, %v10309_v12  ;;  %10313 = vst [vmem:[#allocation85_spill] sm:$0xff] %v8842_v16  ;;  %v3960_v12 = vmul.f32 0.01, %v3808_v17  ;;  %v3969_v15 = vmul.f32 0.01, %v3817_v1  ;;  %v3744_v36 = vadd.f32 %v3743_v52, %v3614_v23  ;;  %v10319_v23 = vld [vmem:[#allocation115_spill] sm:$0xff] }
 0x62c   :  { %v3781_v37 = vadd.f32 %v3780_v42, %v3591_v47  ;;  %v3961_v42 = vmul.f32 0.01, %v3809_v35  ;;  %v8858_v2 = vsub.f32 %v10315_v22, %v8218_v51  ;;  %v3816_v7 = vmul.f32 %v8800_v24, %v10316_v57 }
 0x62d   :  { %v3973_v50 = vmul.f32 0.01, %v3821_v61  ;;  %v3825_v52 = vmul.f32 %v8792_v55, %v10318_v5  ;;  %v3829_v51 = vmul.f32 %v8792_v55, %v10319_v23  ;;  %v4112_v22 = vmax.f32 %v3808_v17, %v3960_v12 }
 0x62e   :  { %v3782_v47 = vadd.f32 %v3781_v37, %v3595_v27  ;;  %v3607_v27 = vmul.f32 %v8838_v19, %v8838_v19  ;;  %v3611_v37 = vmul.f32 %v8842_v16, %v8842_v16  ;;  %v4113_v30 = vmax.f32 %v3809_v35, %v3961_v42 }
 0x62f   :  { %v4116_v4 = vmax.f32 %v3812_v43, %v3964_v21  ;;  %v4121_v32 = vmax.f32 %v3817_v1, %v3969_v15  ;;  %v4117_v26 = vmax.f32 %v3813_v18, %v3965_v31  ;;  %v4125_v16 = vmax.f32 %v3821_v61, %v3973_v50 }
 0x630   :  { %v3783_v39 = vadd.f32 %v3782_v47, %v3599_v63  ;;  %v3820_v63 = vmul.f32 %v8800_v24, %v10317_v59  ;;  %v3622_v28 = vmul.f32 %v3470_v3, %v3470_v3  ;;  %v3471_v57 = vmul.f32 %v10245_v8, %v8858_v2  ;;  %v10320_v3 = vld [vmem:[#allocation40_spill] sm:$0xff] }
 0x631   :  { %v3745_v62 = vadd.f32 %v3744_v36, %v3618_v33  ;;  %v3615_v59 = vmul.f32 %v8846_v6, %v8846_v6  ;;  %v4417_v42 = vpack.c.bf16 %v4117_v26, %v4113_v30  ;;  %v3968_v5 = vmul.f32 0.01, %v3816_v7  ;;  %v10321_v26 = vld [vmem:[#allocation42_spill] sm:$0xff] }
 0x632   :  { %v3784_v47 = vadd.f32 %v3783_v39, %v3603_v9  ;;  %v3972_v9 = vmul.f32 0.01, %v3820_v63  ;;  %v3619_v17 = vmul.f32 %v8852_v10, %v8852_v10  ;;  %v4416_v43 = vpack.c.bf16 %v4116_v4, %v4112_v22 }
 0x633   :  { %v3977_v15 = vmul.f32 0.01, %v3825_v52  ;;  %v3981_v31 = vmul.f32 0.01, %v3829_v51  ;;  %4787 = vmatprep.mubr.bf16.mxu1 %v4417_v42  ;;  %v4421_v1 = vpack.c.bf16 %v4125_v16, %v4121_v32  ;;  %v3623_v50 = vmul.f32 %v3471_v57, %v3471_v57  ;;  %v10323_v32 = vld [vmem:[#allocation6_spill] sm:$0xff] }
 0x634   :  { %v3785_v19 = vadd.f32 %v3784_v47, %v3607_v27  ;;  %4788 = vmatmul.mubr.bf16.vlgmr.msra.gmra.mxu1 %v4416_v43  ;;  %v3824_v18 = vmul.f32 %v8800_v24, %v10320_v3  ;;  %v3746_v61 = vadd.f32 %v3745_v62, %v3622_v28  ;;  %v3828_v30 = vmul.f32 %v8800_v24, %v10321_v26  ;;  %v10327_v43 = vld [vmem:[#allocation38_spill] sm:$0xff] }
 0x635   :  { %5351 = vmatpush1.bf16.msra.mxu1 %v8114_v20  ;;  %4795 = vmatprep.mubr.bf16.mxu1 %v4421_v1  ;;  %v4120_v12 = vmax.f32 %v3816_v7, %v3968_v5  ;;  %v4124_v39 = vmax.f32 %v3820_v63, %v3972_v9  ;;  %v3837_v16 = vmul.f32 %v8792_v55, %v10323_v32  ;;  %v10326_v9 = vld [vmem:[#allocation10_spill] sm:$0xff] }
 0x636   :  { %v3786_v35 = vadd.f32 %v3785_v19, %v3611_v37  ;;  %v10322_v19 = vld [vmem:[#allocation116_spill] sm:$0xff]  ;;  %5336 = vmatprep.subr.bf16.mxu1 %v10165_v11  ;;  %v4129_v27 = vmax.f32 %v3825_v52, %v3977_v15  ;;  %v4133_v62 = vmax.f32 %v3829_v51, %v3981_v31  ;;  %v3747_v28 = vrot.slane %v3746_v61, 4  ;;  %v10324_v52 = vld [vmem:[#allocation23_spill] sm:$0xff] }
 0x637   :  { %v3833_v4 = vmul.f32 %v8792_v55, %v10322_v19  ;;  %v3976_v20 = vmul.f32 0.01, %v3824_v18  ;;  %v3980_v47 = vmul.f32 0.01, %v3828_v30  ;;  %v4420_v23 = vpack.c.bf16 %v4124_v39, %v4120_v12  ;;  %v10329_v39 = vld [vmem:[#allocation55_spill] sm:$0xff] }
 0x638   :  { %v3787_v21 = vadd.f32 %v3786_v35, %v3615_v59  ;;  %v3989_v7 = vmul.f32 0.01, %v3837_v16  ;;  %v4425_v63 = vpack.c.bf16 %v4133_v62, %v4129_v27  ;;  %v3748_v59 = vadd.f32 %v3747_v28, %v3746_v61  ;;  %v10325_v35 = vld [vmem:[#allocation29_spill] sm:$0xff] }
 0x639   :  { %5352 = vmatpush1.bf16.msra.mxu1 %v8145_v25  ;;  %v3985_v22 = vmul.f32 0.01, %v3833_v4  ;;  %v3832_v51 = vmul.f32 %v8800_v24, %v10324_v52  ;;  %v3836_v25 = vmul.f32 %v8800_v24, %v10325_v35  ;;  %v4128_v42 = vmax.f32 %v3824_v18, %v3976_v20  ;;  %v10331_v62 = vld [vmem:[#allocation25_spill] sm:$0xff]  ;;  %v10332_v35 = vld [vmem:[#allocation18_spill] sm:$0xff] }
 0x63a   :  { %v3788_v33 = vadd.f32 %v3787_v21, %v3619_v17  ;;  %5337 = vmatprep.subr.bf16.mxu1 %v10165_v11  ;;  %v4132_v5 = vmax.f32 %v3828_v30, %v3980_v47  ;;  %v3841_v17 = vmul.f32 %v8792_v55, %v10326_v9  ;;  %v3845_v21 = vmul.f32 %v8792_v55, %v10327_v43 }
 0x63b   :  { %v4137_v15 = vmax.f32 %v3833_v4, %v3985_v22  ;;  %v4141_v31 = vmax.f32 %v3837_v16, %v3989_v7  ;;  %v3988_v3 = vmul.f32 0.01, %v3836_v25  ;;  %v10328_v4 = vld [vmem:[#allocation7_spill] sm:$0xff]  ;;  %v3853_v28 = vmul.f32 %v8792_v55, %v10331_v62 }
 0x63c   :  { %v3789_v36 = vadd.f32 %v3788_v33, %v3623_v50  ;;  %4796 = vmatmul.mubr.bf16.gmra.mxu1 %v4420_v23  ;;  %v3984_v50 = vmul.f32 0.01, %v3832_v51  ;;  %v4424_v61 = vpack.c.bf16 %v4132_v5, %v4128_v42  ;;  %v3993_v18 = vmul.f32 0.01, %v3841_v17  ;;  %v10333_v42 = vld [vmem:[#allocation71_spill] sm:$0xff] }
 0x63d   :  { %4803 = vmatprep.mubr.bf16.mxu1 %v4425_v63  ;;  %5353 = vmatpush1.bf16.msra.mxu1 %v8179_v13  ;;  %v3749_v13 = vrot.slane %v3748_v59, 2  ;;  %v3997_v33 = vmul.f32 0.01, %v3845_v21  ;;  %v4429_v26 = vpack.c.bf16 %v4141_v31, %v4137_v15  ;;  %v3840_v12 = vmul.f32 %v8800_v24, %v10328_v4  ;;  %v10336_v4 = vld [vmem:[#allocation79_spill] sm:$0xff] }
 0x63e   :  { %v3790_v37 = vrot.slane %v3789_v36, 4  ;;  %5338 = vmatprep.subr.bf16.mxu1 %v10165_v11  ;;  %v4136_v32 = vmax.f32 %v3832_v51, %v3984_v50  ;;  %v4140_v16 = vmax.f32 %v3836_v25, %v3988_v3  ;;  %v3848_v25 = vmul.f32 %v8800_v24, %v10332_v35 }
 0x63f   :  { %v3750_v19 = vadd.f32 %v3749_v13, %v3748_v59  ;;  %v4149_v20 = vmax.f32 %v3845_v21, %v3997_v33  ;;  %v3992_v23 = vmul.f32 0.01, %v3840_v12  ;;  %v10335_v21 = vld [vmem:[#allocation46_spill] sm:$0xff] }
 0x640   :  { %v3791_v57 = vadd.f32 %v3790_v37, %v3789_v36  ;;  %v10330_v36 = vld [vmem:[#allocation28_spill] sm:$0xff]  ;;  %v4145_v37 = vmax.f32 %v3841_v17, %v3993_v18  ;;  %v4428_v7 = vpack.c.bf16 %v4140_v16, %v4136_v32  ;;  %v3861_v15 = vmul.f32 %v8792_v55, %v10335_v21  ;;  %v10338_v16 = vld [vmem:[#allocation50_spill] sm:$0xff] }
 0x641   :  { %5354 = vmatpush1.bf16.msra.mxu1 %v8214_v14  ;;  %v3844_v14 = vmul.f32 %v8800_v24, %v10329_v39  ;;  %v3849_v27 = vmul.f32 %v8792_v55, %v10330_v36  ;;  %v4144_v5 = vmax.f32 %v3840_v12, %v3992_v23  ;;  %v10334_v17 = vld [vmem:[#allocation32_spill] sm:$0xff]  ;;  %v4000_v50 = vmul.f32 0.01, %v3848_v25  ;;  %v10337_v39 = vld [vmem:[#allocation82_spill] sm:$0xff] }
 0x642   :  { %v3792_v1 = vrot.slane %v3791_v57, 2  ;;  %5339 = vmatprep.subr.bf16.mxu1 %v10165_v11  ;;  %v4433_v59 = vpack.c.bf16 %v4149_v20, %v4145_v37  ;;  %v3857_v43 = vmul.f32 %v8792_v55, %v10334_v17  ;;  %v4013_v33 = vmul.f32 0.01, %v3861_v15 }
 0x643   :  { %v3996_v22 = vmul.f32 0.01, %v3844_v14  ;;  %v4001_v63 = vmul.f32 0.01, %v3849_v27  ;;  %v3856_v12 = vmul.f32 %v8800_v24, %v10336_v4  ;;  %v3865_v36 = vmul.f32 %v8792_v55, %v10338_v16  ;;  %v10351_v16 = vld [vmem:[#allocation33_spill] sm:$0xff] }
 0x644   :  { %v3793_v30 = vadd.f32 %v3792_v1, %v3791_v57  ;;  %4804 = vmatmul.mubr.bf16.gmra.mxu1 %v4424_v61  ;;  %v4005_v57 = vmul.f32 0.01, %v3853_v28  ;;  %v4009_v18 = vmul.f32 0.01, %v3857_v43  ;;  %v4165_v37 = vmax.f32 %v3861_v15, %v4013_v33 }
 0x645   :  { %4811 = vmatprep.mubr.bf16.mxu1 %v4429_v26  ;;  %5355 = vmatpush1.bf16.msra.mxu1 %v8247_v45  ;;  %v3751_v45 = vrot.slane %v3750_v19, 1  ;;  %v4148_v9 = vmax.f32 %v3844_v14, %v3996_v22  ;;  %v4153_v31 = vmax.f32 %v3849_v27, %v4001_v63  ;;  %v4152_v14 = vmax.f32 %v3848_v25, %v4000_v50  ;;  %v10339_v27 = vld [vmem:[#allocation54_spill] sm:$0xff] }
 0x646   :  { %5340 = vmatprep.subr.bf16.mxu1 %v10165_v11  ;;  %v3794_v47 = vrot.slane %v3793_v30, 1  ;;  %v4157_v1 = vmax.f32 %v3853_v28, %v4005_v57  ;;  %v3869_v62 = vmul.f32 %v8792_v55, %v10339_v27  ;;  %v4161_v28 = vmax.f32 %v3857_v43, %v4009_v18  ;;  %v10341_v57 = vld [vmem:[#allocation88_spill] sm:$0xff]  ;;  %v10343_v25 = vld [vmem:[#allocation62_spill] sm:$0xff] }
 0x647   :  { %v3752_v51 = vadd.f32 %v3751_v45, %v3750_v19  ;;  %v4432_v61 = vpack.c.bf16 %v4148_v9, %v4144_v5  ;;  %v4017_v45 = vmul.f32 0.01, %v3865_v36 }
 0x648   :  { %v3795_v52 = vadd.f32 %v3794_v47, %v3793_v30  ;;  %v4437_v26 = vpack.c.bf16 %v4157_v1, %v4153_v31  ;;  %v4021_v23 = vmul.f32 0.01, %v3869_v62  ;;  %v4441_v22 = vpack.c.bf16 %v4165_v37, %v4161_v28  ;;  %v10344_v1 = vld [vmem:[#allocation52_spill] sm:$0xff]  ;;  %v10352_v28 = vld [vmem:[#allocation125_spill] sm:$0xff] }
 0x649   :  { %5356 = vmatpush1.bf16.msra.mxu1 %v8284_v48  ;;  %v3852_v48 = vmul.f32 %v8800_v24, %v10333_v42  ;;  %v3877_v42 = vmul.f32 %v8792_v55, %v10343_v25 }
 0x64a   :  { %5341 = vmatprep.subr.bf16.mxu1 %v10165_v11  ;;  %v3799_v13 = vmul.f32 0.0033333334, %v3795_v52  ;;  %v4173_v5 = vmax.f32 %v3869_v62, %v4021_v23 }
 0x64b   :  { %v4004_v3 = vmul.f32 0.01, %v3852_v48  ;;  %v4029_v15 = vmul.f32 0.01, %v3877_v42 }
 0x64c   :  { %4812 = vmatmul.mubr.bf16.gmra.mxu1 %v4428_v7  ;;  %v3803_v30 = vadd.f32 1e-05, %v3799_v13  ;;  %v10340_v7 = vld [vmem:[#allocation30_spill] sm:$0xff]  ;;  %v3872_v13 = vmul.f32 %v8800_v24, %v10344_v1  ;;  %v10358_v1 = vld [vmem:[#allocation113_spill] sm:$0xff] }
 0x64d   :  { %4819 = vmatprep.mubr.bf16.mxu1 %v4433_v59  ;;  %5357 = vmatpush1.bf16.msra.mxu1 %v8319_v49  ;;  %v3798_v49 = vmul.f32 0.0033333334, %v3752_v51  ;;  %v4156_v32 = vmax.f32 %v3852_v48, %v4004_v3  ;;  %v3864_v63 = vmul.f32 %v8800_v24, %v10340_v7  ;;  %v3868_v59 = vmul.f32 %v8800_v24, %v10341_v57  ;;  %v10355_v57 = vld [vmem:[#allocation68_spill] sm:$0xff] }
 0x64e   :  { %5342 = vmatprep.subr.bf16.mxu1 %v10165_v11  ;;  %5604 = vrsqrt.f32 %v3803_v30  ;;  %v4169_v48 = vmax.f32 %v3865_v36, %v4017_v45  ;;  %v4181_v4 = vmax.f32 %v3877_v42, %v4029_v15  ;;  %v4024_v27 = vmul.f32 0.01, %v3872_v13 }
 0x64f   :  { %v3802_v19 = vadd.f32 1e-05, %v3798_v49  ;;  %v4436_v47 = vpack.c.bf16 %v4156_v32, %v4152_v14  ;;  %v4016_v9 = vmul.f32 0.01, %v3864_v63  ;;  %v4020_v17 = vmul.f32 0.01, %v3868_v59 }
 0x650   :  { %v4445_v31 = vpack.c.bf16 %v4173_v5, %v4169_v48  ;;  %v10345_v49 = vld [vmem:[#allocation60_spill] sm:$0xff]  ;;  %v10350_v32 = vld [vmem:[#allocation22_spill] sm:$0xff]  ;;  %v4176_v25 = vmax.f32 %v3872_v13, %v4024_v27 }
 0x651   :  { %5358 = vmatpush1.bf16.msra.mxu1 %v8353_v46  ;;  %v3860_v46 = vmul.f32 %v8800_v24, %v10337_v39  ;;  %5606 = vrsqrt.f32 %v3802_v19  ;;  %v3876_v50 = vmul.f32 %v8800_v24, %v10345_v49  ;;  %v4172_v18 = vmax.f32 %v3868_v59, %v4020_v17  ;;  %v10359_v49 = vld [vmem:[#allocation9_spill] sm:$0xff]  ;;  %v10361_v27 = vld [vmem:[#allocation76_spill] sm:$0xff] }
 0x652   :  { %5343 = vmatprep.subr.bf16.mxu1 %v10165_v11  ;;  %v3884_v59 = vmul.f32 %v8800_v24, %v10355_v57 }
 0x653   :  { %v4012_v20 = vmul.f32 0.01, %v3860_v46  ;;  %v4028_v62 = vmul.f32 0.01, %v3876_v50 }
 0x654   :  { %4820 = vmatmul.mubr.bf16.gmra.mxu1 %v4432_v61  ;;  %v4168_v61 = vmax.f32 %v3864_v63, %v4016_v9  ;;  %v10356_v9 = vld [vmem:[#allocation118_spill] sm:$0xff] }
 0x655   :  { %4827 = vmatprep.mubr.bf16.mxu1 %v4437_v26  ;;  %5359 = vmatpush2.bf16.msra.mxu1 %v8390_v58  ;;  %v4008_v58 = vmul.f32 0.01, %v3856_v12  ;;  %v4164_v51 = vmax.f32 %v3860_v46, %v4012_v20  ;;  %v10347_v26 = vld [vmem:[#allocation117_spill] sm:$0xff]  ;;  %v10349_v46 = vld [vmem:[#allocation124_spill] sm:$0xff]  ;;  %v4180_v42 = vmax.f32 %v3876_v50, %v4028_v62  ;;  %v3889_v17 = vmul.f32 %v8792_v55, %v10356_v9 }
 0x656   :  { %5344 = vmatprep.subr.bf16.mxu1 %v10165_v11  ;;  %v3885_v30 = vmul.f32 %v8792_v55, %v10347_v26  ;;  %v4444_v23 = vpack.c.bf16 %v4172_v18, %v4168_v61  ;;  %v4036_v61 = vmul.f32 0.01, %v3884_v59 }
 0x657   :  { %v4160_v52 = vmax.f32 %v3856_v12, %v4008_v58  ;;  %v10348_v12 = vld [vmem:[#allocation64_spill] sm:$0xff]  ;;  %v10353_v58 = vld [vmem:[#allocation127_spill] sm:$0xff] }
 0x658   :  { %v8966_v39 = vmul.f32 %v8800_v24, %v10348_v12  ;;  %v4037_v7 = vmul.f32 0.01, %v3885_v30  ;;  %v4041_v12 = vmul.f32 0.01, %v3889_v17 }
 0x659   :  { %5360 = vmatpush2.bf16.msra.mxu1 %v8512_v41  ;;  %v10342_v41 = vld [vmem:[#allocation58_spill] sm:$0xff]  ;;  %v4440_v43 = vpack.c.bf16 %v4164_v51, %v4160_v52 }
 0x65a   :  { %5345 = vmatprep.subr.bf16.mxu1 %v10165_v11  ;;  %v3873_v35 = vmul.f32 %v8792_v55, %v10342_v41  ;;  %v4032_v52 = vmul.f32 0.01, %v8966_v39 }
 0x65c   :  { %4828 = vmatmul.mubr.bf16.gmra.mxu1 %v4436_v47  ;;  %v4025_v21 = vmul.f32 0.01, %v3873_v35  ;;  %v10354_v47 = vld [vmem:[#allocation41_spill] sm:$0xff] }
 0x65d   :  { %4835 = vmatprep.mubr.bf16.mxu1 %v4441_v22  ;;  %5361 = vmatpush2.bf16.msra.mxu1 %v8536_v0  ;;  %v8950_v0 = vpop.eup %5604 }
 0x65e   :  { %5346 = vmatprep.subr.bf16.mxu1 %v10165_v11  ;;  %v8956_v3 = vpop.eup %5606  ;;  %v4177_v19 = vmax.f32 %v3873_v35, %v4025_v21  ;;  %v3811_v14 = vmul.f32 %v8950_v0, %v10349_v46  ;;  %v3815_v37 = vmul.f32 %v8950_v0, %v10352_v28  ;;  %v3819_v20 = vmul.f32 %v8950_v0, %v10353_v58 }
 0x65f   :  { %v3814_v36 = vmul.f32 %v8956_v3, %v10351_v16  ;;  %v3823_v45 = vmul.f32 %v8950_v0, %v10354_v47  ;;  %v3818_v13 = vmul.f32 %v8956_v3, %v10358_v1  ;;  %v3822_v50 = vmul.f32 %v8956_v3, %v10359_v49  ;;  %v10360_v16 = vld [vmem:[#allocation72_spill] sm:$0xff]  ;;  %v10367_v1 = vld [vmem:[#allocation83_spill] sm:$0xff] }
 0x660   :  { %v4449_v63 = vpack.c.bf16 %v4181_v4, %v4177_v19  ;;  %v3963_v51 = vmul.f32 0.01, %v3811_v14  ;;  %v3967_v48 = vmul.f32 0.01, %v3815_v37  ;;  %v3971_v5 = vmul.f32 0.01, %v3819_v20 }
 0x661   :  { %5362 = vmatpush2.bf16.msra.mxu1 %v8567_v40  ;;  %v10346_v40 = vld [vmem:[#allocation66_spill] sm:$0xff]  ;;  %v3966_v35 = vmul.f32 0.01, %v3814_v36  ;;  %v4448_v19 = vpack.c.bf16 %v4180_v42, %v4176_v25  ;;  %v3970_v62 = vmul.f32 0.01, %v3818_v13  ;;  %v4188_v28 = vmax.f32 %v3884_v59, %v4036_v61  ;;  %v10362_v47 = vld [vmem:[#allocation120_spill] sm:$0xff] }
 0x662   :  { %5347 = vmatprep.subr.bf16.mxu1 %v10165_v11  ;;  %v3881_v33 = vmul.f32 %v8792_v55, %v10346_v40  ;;  %v4115_v18 = vmax.f32 %v3811_v14, %v3963_v51  ;;  %v4119_v4 = vmax.f32 %v3815_v37, %v3967_v48  ;;  %v3888_v14 = vmul.f32 %v8800_v24, %v10360_v16  ;;  %v10365_v51 = vld [vmem:[#allocation13_spill] sm:$0xff] }
 0x663   :  { %v4118_v26 = vmax.f32 %v3814_v36, %v3966_v35  ;;  %v4122_v35 = vmax.f32 %v3818_v13, %v3970_v62  ;;  %v3835_v48 = vmul.f32 %v8950_v0, %v8443_v44  ;;  %v3900_v49 = vmul.f32 %v8800_v24, %v10367_v1  ;;  %v10372_v62 = vld [vmem:[#allocation128_spill] sm:$0xff]  ;;  %v10379_v1 = vld [vmem:[#allocation15_spill] sm:$0xff] }
 0x664   :  { %4836 = vmatmul.mubr.bf16.gmra.mxu1 %v4440_v43  ;;  %v4033_v22 = vmul.f32 0.01, %v3881_v33  ;;  %v10357_v43 = vld [vmem:[#allocation119_spill] sm:$0xff]  ;;  %v4419_v36 = vpack.c.bf16 %v4119_v4, %v4115_v18 }
 0x665   :  { %4843 = vmatprep.mubr.bf16.mxu1 %v4445_v31  ;;  %5363 = vmatpush2.bf16.msra.mxu1 %v8590_v56  ;;  %v3810_v56 = vmul.f32 %v8956_v3, %v10350_v32  ;;  %v3893_v21 = vmul.f32 %v8792_v55, %v10357_v43  ;;  %v4189_v31 = vmax.f32 %v3885_v30, %v4037_v7  ;;  %v4052_v16 = vmul.f32 0.01, %v3900_v49 }
 0x666   :  { %5348 = vmatprep.subr.bf16.mxu1 %v10165_v11  ;;  %v4185_v15 = vmax.f32 %v3881_v33, %v4033_v22  ;;  %v3831_v33 = vmul.f32 %v8950_v0, %v8411_v29  ;;  %v4123_v30 = vmax.f32 %v3819_v20, %v3971_v5  ;;  %v3974_v29 = vmul.f32 0.01, %v3822_v50  ;;  %4972 = vmatprep.mubr.bf16.mxu0 %v4419_v36 }
 0x667   :  { %v3962_v41 = vmul.f32 0.01, %v3810_v56  ;;  %v4045_v46 = vmul.f32 0.01, %v3893_v21  ;;  %v4193_v7 = vmax.f32 %v3889_v17, %v4041_v12  ;;  %v3839_v5 = vmul.f32 %v8950_v0, %v8466_v60  ;;  %v10370_v12 = vld [vmem:[#allocation4_spill] sm:$0xff] }
 0x668   :  { %v4453_v32 = vpack.c.bf16 %v4189_v31, %v4185_v15  ;;  %v4126_v25 = vmax.f32 %v3822_v50, %v3974_v29  ;;  %v10366_v15 = vld [vmem:[#allocation80_spill] sm:$0xff]  ;;  %v3843_v29 = vmul.f32 %v8950_v0, %v10372_v62 }
 0x669   :  { %5364 = vmatpush2.bf16.msra.mxu1 %v8613_v38  ;;  %v3975_v38 = vmul.f32 0.01, %v3823_v45  ;;  %v4114_v40 = vmax.f32 %v3810_v56, %v3962_v41  ;;  %v4184_v56 = vmax.f32 %v8966_v39, %v4032_v52  ;;  %v4197_v39 = vmax.f32 %v3893_v21, %v4045_v46 }
 0x66a   :  { %5349 = vmatprep.subr.bf16.mxu1 %v10165_v11  ;;  %v4040_v52 = vmul.f32 0.01, %v3888_v14  ;;  %v3830_v41 = vmul.f32 %v8956_v3, %v10365_v51  ;;  %v3896_v31 = vmul.f32 %v8800_v24, %v10366_v15  ;;  %v4422_v44 = vpack.c.bf16 %v4126_v25, %v4122_v35 }
 0x66b   :  { %v4418_v37 = vpack.c.bf16 %v4118_v26, %v4114_v40  ;;  %v4452_v42 = vpack.c.bf16 %v4188_v28, %v4184_v56  ;;  %v4457_v21 = vpack.c.bf16 %v4197_v39, %v4193_v7  ;;  %v3987_v40 = vmul.f32 0.01, %v3835_v48  ;;  %v10368_v26 = vld [vmem:[#allocation122_spill] sm:$0xff]  ;;  %v10373_v28 = vld [vmem:[#allocation131_spill] sm:$0xff]  ;;  %v10375_v7 = vld [vmem:[#allocation89_spill] sm:$0xff] }
 0x66c   :  { %4844 = vmatmul.mubr.bf16.gmra.mxu1 %v4444_v23  ;;  %v10363_v23 = vld [vmem:[#allocation121_spill] sm:$0xff]  ;;  %v4192_v13 = vmax.f32 %v3888_v14, %v4040_v52  ;;  %v3982_v61 = vmul.f32 0.01, %v3830_v41  ;;  %v3991_v60 = vmul.f32 0.01, %v3839_v5  ;;  %v3834_v46 = vmul.f32 %v8956_v3, %v10370_v12  ;;  %v10383_v12 = vld [vmem:[#allocation94_spill] sm:$0xff] }
 0x66d   :  { %4851 = vmatprep.mubr.bf16.mxu1 %v4449_v63  ;;  %5365 = vmatpush2.bf16.msra.mxu1 %v8640_v34  ;;  %v3827_v34 = vmul.f32 %v8950_v0, %v8372_v54  ;;  %v3892_v54 = vmul.f32 %v8800_v24, %v10361_v27  ;;  %v3901_v22 = vmul.f32 %v8792_v55, %v10363_v23  ;;  %v10364_v63 = vld [vmem:[#allocation11_spill] sm:$0xff]  ;;  %v10371_v14 = vld [vmem:[#allocation5_spill] sm:$0xff]  ;;  %v10374_v23 = vld [vmem:[#allocation86_spill] sm:$0xff] }
 0x66e   :  { %5350 = vmatprep.subr.bf16.mxu1 %v10165_v11  ;;  %v4127_v11 = vmax.f32 %v3823_v45, %v3975_v38  ;;  %v3897_v45 = vmul.f32 %v8792_v55, %v10362_v47  ;;  %4973 = vmatmul.mubr.bf16.vlgmr.msra.gmra.mxu0 %v4418_v37  ;;  %v3826_v57 = vmul.f32 %v8956_v3, %v10364_v63 }
 0x66f   :  { %v3979_v58 = vmul.f32 0.01, %v3827_v34  ;;  %v4044_v59 = vmul.f32 0.01, %v3892_v54  ;;  %v4053_v43 = vmul.f32 0.01, %v3901_v22  ;;  %v3838_v27 = vmul.f32 %v8956_v3, %v10371_v14 }
 0x670   :  { %v4423_v20 = vpack.c.bf16 %v4127_v11, %v4123_v30  ;;  %v4049_v17 = vmul.f32 0.01, %v3897_v45  ;;  %v3978_v50 = vmul.f32 0.01, %v3826_v57  ;;  %v4134_v56 = vmax.f32 %v3830_v41, %v3982_v61 }
 0x671   :  { %5366 = vmatpush2.bf16.msra.mxu1 %v8666_v53  ;;  %v3983_v53 = vmul.f32 0.01, %v3831_v33  ;;  %v4131_v38 = vmax.f32 %v3827_v34, %v3979_v58  ;;  %v4196_v18 = vmax.f32 %v3892_v54, %v4044_v59  ;;  %v4205_v11 = vmax.f32 %v3901_v22, %v4053_v43  ;;  %v10378_v43 = vld [vmem:[#allocation8_spill] sm:$0xff] }
 0x672   :  { %4980 = vmatprep.mubr.bf16.mxu0 %v4423_v20  ;;  %v4201_v4 = vmax.f32 %v3897_v45, %v4049_v17  ;;  %v4130_v54 = vmax.f32 %v3826_v57, %v3978_v50  ;;  %v3847_v37 = vmul.f32 %v8950_v0, %v10373_v28  ;;  %v4139_v58 = vmax.f32 %v3835_v48, %v3987_v40  ;;  %v10381_v40 = vld [vmem:[#allocation132_spill] sm:$0xff] }
 0x673   :  { %v4135_v9 = vmax.f32 %v3831_v33, %v3983_v53  ;;  %v10369_v33 = vld [vmem:[#allocation123_spill] sm:$0xff]  ;;  %v4456_v36 = vpack.c.bf16 %v4196_v18, %v4192_v13  ;;  %v4143_v53 = vmax.f32 %v3839_v5, %v3991_v60  ;;  %v3904_v22 = vmul.f32 %v8800_v24, %v10374_v23  ;;  %v10377_v5 = vld [vmem:[#allocation96_spill] sm:$0xff]  ;;  %v10380_v18 = vld [vmem:[#allocation2_spill] sm:$0xff] }
 0x674   :  { %4852 = vmatmul.mubr.bf16.gmra.mxu1 %v4448_v19  ;;  %v3905_v19 = vmul.f32 %v8792_v55, %v10368_v26  ;;  %v3909_v30 = vmul.f32 %v8792_v55, %v10369_v33  ;;  %v4461_v45 = vpack.c.bf16 %v4205_v11, %v4201_v4  ;;  %v3908_v39 = vmul.f32 %v8800_v24, %v10375_v7  ;;  %v10382_v4 = vld [vmem:[#allocation92_spill] sm:$0xff]  ;;  %v10387_v7 = vld [vmem:[#allocation19_spill] sm:$0xff] }
 0x675   :  { %4859 = vmatprep.mubr.bf16.mxu1 %v4453_v32  ;;  %v4427_v34 = vpack.c.bf16 %v4135_v9, %v4131_v38  ;;  %v4048_v32 = vmul.f32 0.01, %v3896_v31  ;;  %v3986_v57 = vmul.f32 0.01, %v3834_v46  ;;  %v3990_v52 = vmul.f32 0.01, %v3838_v27 }
 0x676   :  { %4981 = vmatmul.mubr.bf16.gmra.mxu0 %v4422_v44  ;;  %v4057_v20 = vmul.f32 0.01, %v3905_v19  ;;  %v4061_v47 = vmul.f32 0.01, %v3909_v30  ;;  %v4204_v59 = vmax.f32 %v3900_v49, %v4052_v16  ;;  %v4426_v51 = vpack.c.bf16 %v4134_v56, %v4130_v54 }
 0x677   :  { %4988 = vmatprep.mubr.bf16.mxu0 %v4427_v34  ;;  %v4200_v63 = vmax.f32 %v3896_v31, %v4048_v32  ;;  %v3995_v41 = vmul.f32 0.01, %v3843_v29  ;;  %v3999_v35 = vmul.f32 0.01, %v3847_v37  ;;  %v4431_v25 = vpack.c.bf16 %v4143_v53, %v4139_v58 }
 0x678   :  { %v3917_v38 = vmul.f32 %v8792_v55, %v10377_v5  ;;  %v4209_v9 = vmax.f32 %v3905_v19, %v4057_v20  ;;  %v4213_v17 = vmax.f32 %v3909_v30, %v4061_v47  ;;  %v4056_v15 = vmul.f32 0.01, %v3904_v22  ;;  %v10386_v47 = vld [vmem:[#allocation24_spill] sm:$0xff] }
 0x679   :  { %v4060_v31 = vmul.f32 0.01, %v3908_v39  ;;  %v3846_v49 = vmul.f32 %v8956_v3, %v10379_v1  ;;  %v4138_v13 = vmax.f32 %v3834_v46, %v3986_v57  ;;  %v4142_v50 = vmax.f32 %v3838_v27, %v3990_v52 }
 0x67a   :  { %v4460_v61 = vpack.c.bf16 %v4204_v59, %v4200_v63  ;;  %v3851_v44 = vmul.f32 %v8950_v0, %v10380_v18  ;;  %v3855_v60 = vmul.f32 %v8950_v0, %v10381_v40  ;;  %v4147_v34 = vmax.f32 %v3843_v29, %v3995_v41  ;;  %v10384_v29 = vld [vmem:[#allocation99_spill] sm:$0xff] }
 0x67b   :  { %v4151_v26 = vmax.f32 %v3847_v37, %v3999_v35  ;;  %v4069_v33 = vmul.f32 0.01, %v3917_v38  ;;  %v4465_v30 = vpack.c.bf16 %v4213_v17, %v4209_v9  ;;  %v3912_v11 = vmul.f32 %v8800_v24, %v10382_v4  ;;  %v10385_v37 = vld [vmem:[#allocation102_spill] sm:$0xff]  ;;  %v10388_v59 = vld [vmem:[#allocation31_spill] sm:$0xff]  ;;  %v10390_v9 = vld [vmem:[#allocation97_spill] sm:$0xff] }
 0x67c   :  { %4860 = vmatmul.mubr.bf16.gmra.mxu1 %v4452_v42  ;;  %v10376_v42 = vld [vmem:[#allocation126_spill] sm:$0xff]  ;;  %v3916_v32 = vmul.f32 %v8800_v24, %v10383_v12  ;;  %v4208_v46 = vmax.f32 %v3904_v22, %v4056_v15  ;;  %v3998_v14 = vmul.f32 0.01, %v3846_v49  ;;  %v4212_v27 = vmax.f32 %v3908_v39, %v4060_v31  ;;  %v10389_v41 = vld [vmem:[#allocation47_spill] sm:$0xff]  ;;  %v10395_v12 = vld [vmem:[#allocation45_spill] sm:$0xff] }
 0x67d   :  { %4867 = vmatprep.mubr.bf16.mxu1 %v4457_v21  ;;  %v3913_v48 = vmul.f32 %v8792_v55, %v10376_v42  ;;  %v3842_v21 = vmul.f32 %v8956_v3, %v10378_v43  ;;  %v4430_v54 = vpack.c.bf16 %v4142_v50, %v4138_v13  ;;  %v4003_v56 = vmul.f32 0.01, %v3851_v44  ;;  %v10391_v43 = vld [vmem:[#allocation100_spill] sm:$0xff] }
 0x67e   :  { %4989 = vmatmul.mubr.bf16.gmra.mxu0 %v4426_v51  ;;  %v4435_v62 = vpack.c.bf16 %v4151_v26, %v4147_v34  ;;  %v3921_v28 = vmul.f32 %v8792_v55, %v10384_v29  ;;  %v3925_v58 = vmul.f32 %v8792_v55, %v10385_v37  ;;  %v4221_v20 = vmax.f32 %v3917_v38, %v4069_v33  ;;  %v10394_v33 = vld [vmem:[#allocation37_spill] sm:$0xff] }
 0x67f   :  { %4996 = vmatprep.mubr.bf16.mxu0 %v4431_v25  ;;  %v4065_v19 = vmul.f32 0.01, %v3913_v48  ;;  %v3994_v16 = vmul.f32 0.01, %v3842_v21  ;;  %v4064_v23 = vmul.f32 0.01, %v3912_v11  ;;  %v3854_v39 = vmul.f32 %v8956_v3, %v10387_v7 }
 0x680   :  { %v4068_v22 = vmul.f32 0.01, %v3916_v32  ;;  %v4150_v57 = vmax.f32 %v3846_v49, %v3998_v14  ;;  %v4464_v52 = vpack.c.bf16 %v4212_v27, %v4208_v46  ;;  %v3859_v51 = vmul.f32 %v8950_v0, %v10388_v59  ;;  %v10396_v27 = vld [vmem:[#allocation51_spill] sm:$0xff] }
 0x681   :  { %v4217_v53 = vmax.f32 %v3913_v48, %v4065_v19  ;;  %v4146_v63 = vmax.f32 %v3842_v21, %v3994_v16  ;;  %v3863_v35 = vmul.f32 %v8950_v0, %v10389_v41  ;;  %v4155_v25 = vmax.f32 %v3851_v44, %v4003_v56  ;;  %v10392_v44 = vld [vmem:[#allocation53_spill] sm:$0xff] }
 0x682   :  { %v4073_v48 = vmul.f32 0.01, %v3921_v28  ;;  %v4077_v5 = vmul.f32 0.01, %v3925_v58  ;;  %v3920_v17 = vmul.f32 %v8800_v24, %v10390_v9  ;;  %v3924_v15 = vmul.f32 %v8800_v24, %v10391_v43  ;;  %v10397_v56 = vld [vmem:[#allocation133_spill] sm:$0xff]  ;;  %v10403_v43 = vld [vmem:[#allocation43_spill] sm:$0xff] }
 0x683   :  { %v4469_v38 = vpack.c.bf16 %v4221_v20, %v4217_v53  ;;  %v4216_v21 = vmax.f32 %v3912_v11, %v4064_v23  ;;  %v4006_v1 = vmul.f32 0.01, %v3854_v39  ;;  %v4220_v49 = vmax.f32 %v3916_v32, %v4068_v22  ;;  %v10398_v53 = vld [vmem:[#allocation103_spill] sm:$0xff] }
 0x684   :  { %4868 = vmatmul.mubr.bf16.gmra.mxu1 %v4456_v36  ;;  %v4007_v36 = vmul.f32 0.01, %v3855_v60  ;;  %v4434_v13 = vpack.c.bf16 %v4150_v57, %v4146_v63  ;;  %v4011_v50 = vmul.f32 0.01, %v3859_v51  ;;  %v3929_v40 = vmul.f32 %v8792_v55, %v10392_v44 }
 0x685   :  { %4875 = vmatprep.mubr.bf16.mxu1 %v4461_v45  ;;  %v3850_v45 = vmul.f32 %v8956_v3, %v10386_v47  ;;  %v4225_v26 = vmax.f32 %v3921_v28, %v4073_v48  ;;  %v4229_v19 = vmax.f32 %v3925_v58, %v4077_v5  ;;  %v4072_v4 = vmul.f32 0.01, %v3920_v17  ;;  %v10399_v47 = vld [vmem:[#allocation106_spill] sm:$0xff]  ;;  %v10402_v5 = vld [vmem:[#allocation49_spill] sm:$0xff] }
 0x686   :  { %4997 = vmatmul.mubr.bf16.gmra.mxu0 %v4430_v54  ;;  %v4159_v42 = vmax.f32 %v3855_v60, %v4007_v36  ;;  %v10393_v60 = vld [vmem:[#allocation109_spill] sm:$0xff]  ;;  %v4076_v11 = vmul.f32 0.01, %v3924_v15  ;;  %v3862_v32 = vmul.f32 %v8956_v3, %v10395_v12  ;;  %v4158_v16 = vmax.f32 %v3854_v39, %v4006_v1 }
 0x687   :  { %5004 = vmatprep.mubr.bf16.mxu0 %v4435_v62  ;;  %v4002_v31 = vmul.f32 0.01, %v3850_v45  ;;  %v3933_v34 = vmul.f32 %v8792_v55, %v10393_v60  ;;  %v4468_v14 = vpack.c.bf16 %v4220_v49, %v4216_v21  ;;  %v3867_v54 = vmul.f32 %v8950_v0, %v10396_v27  ;;  %v10404_v49 = vld [vmem:[#allocation59_spill] sm:$0xff] }
 0x688   :  { %v4439_v18 = vpack.c.bf16 %v4159_v42, %v4155_v25  ;;  %v3871_v36 = vmul.f32 %v8950_v0, %v10397_v56  ;;  %v4163_v62 = vmax.f32 %v3859_v51, %v4011_v50  ;;  %v4081_v28 = vmul.f32 0.01, %v3929_v40  ;;  %v10400_v51 = vld [vmem:[#allocation14_spill] sm:$0xff]  ;;  %v10405_v50 = vld [vmem:[#allocation63_spill] sm:$0xff] }
 0x689   :  { %v4154_v46 = vmax.f32 %v3850_v45, %v4002_v31  ;;  %v4085_v37 = vmul.f32 0.01, %v3933_v34  ;;  %v4473_v58 = vpack.c.bf16 %v4229_v19, %v4225_v26  ;;  %v3928_v20 = vmul.f32 %v8800_v24, %v10398_v53  ;;  %v10406_v26 = vld [vmem:[#allocation105_spill] sm:$0xff] }
 0x68a   :  { %v3932_v23 = vmul.f32 %v8800_v24, %v10399_v47  ;;  %v4224_v45 = vmax.f32 %v3920_v17, %v4072_v4  ;;  %v4014_v7 = vmul.f32 0.01, %v3862_v32  ;;  %v4228_v39 = vmax.f32 %v3924_v15, %v4076_v11  ;;  %v10411_v47 = vld [vmem:[#allocation111_spill] sm:$0xff] }
 0x68b   :  { %v4438_v63 = vpack.c.bf16 %v4158_v16, %v4154_v46  ;;  %v4019_v57 = vmul.f32 0.01, %v3867_v54  ;;  %v3937_v41 = vmul.f32 %v8792_v55, %v10400_v51  ;;  %v4233_v42 = vmax.f32 %v3929_v40, %v4081_v28 }
 0x68c   :  { %4876 = vmatmul.mubr.bf16.gmra.mxu1 %v4460_v61  ;;  %v4015_v61 = vmul.f32 0.01, %v3863_v35  ;;  %v4237_v48 = vmax.f32 %v3933_v34, %v4085_v37  ;;  %v4080_v9 = vmul.f32 0.01, %v3928_v20  ;;  %v4084_v17 = vmul.f32 0.01, %v3932_v23 }
 0x68d   :  { %4883 = vmatprep.mubr.bf16.mxu1 %v4465_v30  ;;  %v3858_v30 = vmul.f32 %v8956_v3, %v10394_v33  ;;  %v3870_v15 = vmul.f32 %v8956_v3, %v10403_v43  ;;  %v4166_v31 = vmax.f32 %v3862_v32, %v4014_v7  ;;  %v4472_v1 = vpack.c.bf16 %v4228_v39, %v4224_v45  ;;  %v10407_v33 = vld [vmem:[#allocation70_spill] sm:$0xff]  ;;  %v10410_v37 = vld [vmem:[#allocation108_spill] sm:$0xff]  ;;  %v10412_v39 = vld [vmem:[#allocation67_spill] sm:$0xff] }
 0x68e   :  { %5005 = vmatmul.mubr.bf16.gmra.mxu0 %v4434_v13  ;;  %v4167_v29 = vmax.f32 %v3863_v35, %v4015_v61  ;;  %v10401_v35 = vld [vmem:[#allocation57_spill] sm:$0xff]  ;;  %v3875_v13 = vmul.f32 %v8950_v0, %v10404_v49  ;;  %v3879_v61 = vmul.f32 %v8950_v0, %v10405_v50  ;;  %v4089_v40 = vmul.f32 0.01, %v3937_v41 }
 0x68f   :  { %5012 = vmatprep.mubr.bf16.mxu0 %v4439_v18  ;;  %v4010_v22 = vmul.f32 0.01, %v3858_v30  ;;  %v3941_v25 = vmul.f32 %v8792_v55, %v10401_v35  ;;  %v4171_v18 = vmax.f32 %v3867_v54, %v4019_v57  ;;  %v4477_v34 = vpack.c.bf16 %v4237_v48, %v4233_v42  ;;  %v10408_v54 = vld [vmem:[#allocation21_spill] sm:$0xff]  ;;  %v10413_v57 = vld [vmem:[#allocation134_spill] sm:$0xff] }
 0x690   :  { %v4443_v59 = vpack.c.bf16 %v4167_v29, %v4163_v62  ;;  %v3936_v19 = vmul.f32 %v8800_v24, %v10406_v26  ;;  %v3940_v4 = vmul.f32 %v8800_v24, %v10407_v33  ;;  %v4022_v12 = vmul.f32 0.01, %v3870_v15 }
 0x691   :  { %v4162_v21 = vmax.f32 %v3858_v30, %v4010_v22  ;;  %v4093_v60 = vmul.f32 0.01, %v3941_v25  ;;  %v4232_v30 = vmax.f32 %v3928_v20, %v4080_v9  ;;  %v4236_v32 = vmax.f32 %v3932_v23, %v4084_v17 }
 0x692   :  { %v4027_v16 = vmul.f32 0.01, %v3875_v13  ;;  %v3945_v56 = vmul.f32 %v8792_v55, %v10408_v54  ;;  %v4241_v29 = vmax.f32 %v3937_v41, %v4089_v40  ;;  %v4088_v53 = vmul.f32 0.01, %v3936_v19  ;;  %v10414_v41 = vld [vmem:[#allocation130_spill] sm:$0xff]  ;;  %v10422_v54 = vld [vmem:[#allocation135_spill] sm:$0xff] }
 0x693   :  { %v4442_v46 = vpack.c.bf16 %v4166_v31, %v4162_v21  ;;  %v4245_v28 = vmax.f32 %v3941_v25, %v4093_v60  ;;  %v4092_v20 = vmul.f32 0.01, %v3940_v4  ;;  %v3878_v23 = vmul.f32 %v8956_v3, %v10411_v47 }
 0x694   :  { %4884 = vmatmul.mubr.bf16.gmra.mxu1 %v4464_v52  ;;  %v4023_v52 = vmul.f32 0.01, %v3871_v36  ;;  %v4174_v22 = vmax.f32 %v3870_v15, %v4022_v12  ;;  %v4476_v7 = vpack.c.bf16 %v4236_v32, %v4232_v30  ;;  %v3957_v35 = vmul.f32 %v8792_v55, %v10414_v41  ;;  %v10425_v41 = vld [vmem:[#allocation73_spill] sm:$0xff] }
 0x695   :  { %4891 = vmatprep.mubr.bf16.mxu1 %v4469_v38  ;;  %v3866_v38 = vmul.f32 %v8956_v3, %v10402_v5  ;;  %v4097_v25 = vmul.f32 0.01, %v3945_v56  ;;  %v4481_v48 = vpack.c.bf16 %v4245_v28, %v4241_v29  ;;  %v10415_v5 = vld [vmem:[#allocation74_spill] sm:$0xff]  ;;  %v4240_v43 = vmax.f32 %v3936_v19, %v4088_v53  ;;  %v10419_v19 = vld [vmem:[#allocation69_spill] sm:$0xff] }
 0x696   :  { %5013 = vmatmul.mubr.bf16.gmra.mxu0 %v4438_v63  ;;  %v4175_v44 = vmax.f32 %v3871_v36, %v4023_v52  ;;  %v10409_v36 = vld [vmem:[#allocation65_spill] sm:$0xff]  ;;  %v3883_v63 = vmul.f32 %v8950_v0, %v10412_v39  ;;  %v3887_v52 = vmul.f32 %v8950_v0, %v10413_v57  ;;  %v3944_v9 = vmul.f32 %v8800_v24, %v10415_v5  ;;  %v10423_v53 = vld [vmem:[#allocation26_spill] sm:$0xff] }
 0x697   :  { %5020 = vmatprep.mubr.bf16.mxu0 %v4443_v59  ;;  %v4018_v11 = vmul.f32 0.01, %v3866_v38  ;;  %v3949_v62 = vmul.f32 %v8792_v55, %v10409_v36  ;;  %v4179_v59 = vmax.f32 %v3875_v13, %v4027_v16  ;;  %v4030_v21 = vmul.f32 0.01, %v3878_v23 }
 0x698   :  { %v4447_v27 = vpack.c.bf16 %v4175_v44, %v4171_v18  ;;  %v4244_v31 = vmax.f32 %v3940_v4, %v4092_v20  ;;  %v4035_v49 = vmul.f32 0.01, %v3883_v63  ;;  %v4039_v13 = vmul.f32 0.01, %v3887_v52 }
 0x699   :  { %v4170_v45 = vmax.f32 %v3866_v38, %v4018_v11  ;;  %v4101_v42 = vmul.f32 0.01, %v3949_v62  ;;  %v10416_v38 = vld [vmem:[#allocation78_spill] sm:$0xff]  ;;  %v4109_v44 = vmul.f32 0.01, %v3957_v35  ;;  %v4249_v40 = vmax.f32 %v3945_v56, %v4097_v25  ;;  %v10420_v11 = vld [vmem:[#allocation129_spill] sm:$0xff] }
 0x69a   :  { %v3948_v17 = vmul.f32 %v8800_v24, %v10416_v38  ;;  %v3886_v33 = vmul.f32 %v8956_v3, %v10419_v19  ;;  %v4096_v30 = vmul.f32 0.01, %v3944_v9  ;;  %v3953_v12 = vmul.f32 %v8792_v55, %v10420_v11  ;;  %v10426_v25 = vld [vmem:[#allocation77_spill] sm:$0xff] }
 0x69b   :  { %v4253_v60 = vmax.f32 %v3949_v62, %v4101_v42  ;;  %v4480_v16 = vpack.c.bf16 %v4244_v31, %v4240_v43  ;;  %v3895_v56 = vmul.f32 %v8950_v0, %v10422_v54  ;;  %v4187_v36 = vmax.f32 %v3883_v63, %v4035_v49  ;;  %v10427_v43 = vld [vmem:[#allocation136_spill] sm:$0xff] }
 0x69c   :  { %4892 = vmatmul.mubr.bf16.gmra.mxu1 %v4468_v14  ;;  %v4031_v14 = vmul.f32 0.01, %v3879_v61  ;;  %v4100_v4 = vmul.f32 0.01, %v3948_v17  ;;  %v4191_v62 = vmax.f32 %v3887_v52, %v4039_v13  ;;  %v4261_v29 = vmax.f32 %v3957_v35, %v4109_v44 }
 0x69d   :  { %4899 = vmatprep.mubr.bf16.mxu1 %v4473_v58  ;;  %v3874_v58 = vmul.f32 %v8956_v3, %v10410_v37  ;;  %v4485_v28 = vpack.c.bf16 %v4253_v60, %v4249_v40  ;;  %v3952_v20 = vmul.f32 %v8800_v24, %v10423_v53  ;;  %v4248_v47 = vmax.f32 %v3944_v9, %v4096_v30  ;;  %v10430_v40 = vld [vmem:[#allocation17_spill] sm:$0xff]  ;;  %v10431_v30 = vld [vmem:[#allocation3_spill] sm:$0xff] }
 0x69e   :  { %5021 = vmatmul.mubr.bf16.gmra.mxu0 %v4442_v46  ;;  %v4183_v51 = vmax.f32 %v3879_v61, %v4031_v14  ;;  %v10417_v61 = vld [vmem:[#allocation34_spill] sm:$0xff]  ;;  %v4182_v46 = vmax.f32 %v3878_v23, %v4030_v21  ;;  %v10421_v14 = vld [vmem:[#allocation75_spill] sm:$0xff]  ;;  %v4105_v23 = vmul.f32 0.01, %v3953_v12  ;;  %v4047_v39 = vmul.f32 0.01, %v3895_v56 }
 0x69f   :  { %5028 = vmatprep.mubr.bf16.mxu0 %v4447_v27  ;;  %v4026_v15 = vmul.f32 0.01, %v3874_v58  ;;  %v3956_v18 = vmul.f32 %v8800_v24, %v10417_v61  ;;  %v3891_v27 = vmul.f32 %v8950_v0, %v10421_v14  ;;  %v4455_v57 = vpack.c.bf16 %v4191_v62, %v4187_v36 }
 0x6a0   :  { %v4451_v50 = vpack.c.bf16 %v4183_v51, %v4179_v59  ;;  %v10424_v59 = vld [vmem:[#allocation85_spill] sm:$0xff]  ;;  %v3951_v52 = vmul.f32 %v8950_v0, %v8846_v6  ;;  %v4413_v24 = vmul.f32 %v10245_v8, %v4261_v29  ;;  %v3890_v35 = vmul.f32 %v8956_v3, %v10425_v41 }
 0x6a1   :  { %v4178_v32 = vmax.f32 %v3874_v58, %v4026_v15  ;;  %v4108_v37 = vmul.f32 0.01, %v3956_v18  ;;  %v4038_v58 = vmul.f32 0.01, %v3886_v33  ;;  %v3947_v63 = vmul.f32 %v8950_v0, %v10424_v59  ;;  %v10428_v6 = vld [vmem:[#allocation137_spill] sm:$0xff] }
 0x6a2   :  { %v3894_v42 = vmul.f32 %v8956_v3, %v10426_v25  ;;  %v4257_v38 = vmax.f32 %v3953_v12, %v4105_v23  ;;  %v3899_v15 = vmul.f32 %v8950_v0, %v10427_v43  ;;  %v3903_v21 = vmul.f32 %v8950_v0, %v10428_v6  ;;  %v10438_v43 = vld [vmem:[#allocation90_spill] sm:$0xff] }
 0x6a3   :  { %v4260_v51 = vmax.f32 %v3956_v18, %v4108_v37  ;;  %v4190_v9 = vmax.f32 %v3886_v33, %v4038_v58  ;;  %v3959_v49 = vmul.f32 %v8950_v0, %v8858_v2  ;;  %v4099_v13 = vmul.f32 0.01, %v3947_v63  ;;  %v10429_v18 = vld [vmem:[#allocation44_spill] sm:$0xff] }
 0x6a4   :  { %4900 = vmatmul.mubr.bf16.gmra.mxu1 %v4472_v1  ;;  %v4446_v1 = vpack.c.bf16 %v4174_v22, %v4170_v45  ;;  %v4252_v45 = vmax.f32 %v3948_v17, %v4100_v4  ;;  %v4450_v22 = vpack.c.bf16 %v4182_v46, %v4178_v32  ;;  %v4489_v61 = vpack.c.bf16 %v4413_v24, %v4257_v38  ;;  %v10437_v38 = vld [vmem:[#allocation87_spill] sm:$0xff] }
 0x6a5   :  { %4907 = vmatprep.mubr.bf16.mxu1 %v4477_v34  ;;  %v10418_v34 = vld [vmem:[#allocation61_spill] sm:$0xff]  ;;  %v3946_v44 = vmul.f32 %v8956_v3, %v10429_v18  ;;  %v3950_v60 = vmul.f32 %v8956_v3, %v10430_v40  ;;  %v4046_v19 = vmul.f32 0.01, %v3894_v42  ;;  %v3958_v4 = vmul.f32 %v8956_v3, %v10431_v30 }
 0x6a6   :  { %5029 = vmatmul.mubr.bf16.gmra.mxu0 %v4446_v1  ;;  %v3882_v26 = vmul.f32 %v8956_v3, %v10418_v34  ;;  %v4484_v17 = vpack.c.bf16 %v4252_v45, %v4248_v47  ;;  %v4199_v1 = vmax.f32 %v3895_v56, %v4047_v39  ;;  %v4412_v34 = vmul.f32 %v10245_v8, %v4260_v51  ;;  %v10433_v56 = vld [vmem:[#allocation84_spill] sm:$0xff] }
 0x6a7   :  { %5036 = vmatprep.mubr.bf16.mxu0 %v4451_v50  ;;  %v4103_v50 = vmul.f32 0.01, %v3951_v52  ;;  %v4051_v2 = vmul.f32 0.01, %v3899_v15  ;;  %v4055_v11 = vmul.f32 0.01, %v3903_v21  ;;  %v3902_v36 = vmul.f32 %v8956_v3, %v10433_v56 }
 0x6a8   :  { %v4034_v55 = vmul.f32 0.01, %v3882_v26  ;;  %v4111_v46 = vmul.f32 0.01, %v3959_v49  ;;  %v4098_v62 = vmul.f32 0.01, %v3946_v44  ;;  %v4198_v53 = vmax.f32 %v3894_v42, %v4046_v19 }
 0x6a9   :  { %v4255_v14 = vmax.f32 %v3951_v52, %v4103_v50  ;;  %v4102_v29 = vmul.f32 0.01, %v3950_v60  ;;  %v4203_v23 = vmax.f32 %v3899_v15, %v4051_v2  ;;  %v10436_v42 = vld [vmem:[#allocation36_spill] sm:$0xff]  ;;  %v3910_v15 = vmul.f32 %v8956_v3, %v10438_v43  ;;  %v10440_v50 = vld [vmem:[#allocation141_spill] sm:$0xff] }
 0x6aa   :  { %v4186_v5 = vmax.f32 %v3882_v26, %v4034_v55  ;;  %v4042_v26 = vmul.f32 0.01, %v3890_v35  ;;  %v10435_v55 = vld [vmem:[#allocation139_spill] sm:$0xff]  ;;  %v4250_v52 = vmax.f32 %v3946_v44, %v4098_v62 }
 0x6ab   :  { %v3911_v58 = vmul.f32 %v8950_v0, %v10435_v55  ;;  %v4254_v24 = vmax.f32 %v3950_v60, %v4102_v29  ;;  %v4062_v19 = vmul.f32 0.01, %v3910_v15 }
 0x6ac   :  { %4908 = vmatmul.mubr.bf16.gmra.mxu1 %v4476_v7  ;;  %v4043_v7 = vmul.f32 0.01, %v3891_v27  ;;  %v4454_v33 = vpack.c.bf16 %v4190_v9, %v4186_v5  ;;  %v4194_v37 = vmax.f32 %v3890_v35, %v4042_v26 }
 0x6ad   :  { %4915 = vmatprep.mubr.bf16.mxu1 %v4481_v48  ;;  %v4104_v48 = vmul.f32 0.01, %v3952_v20  ;;  %v4063_v35 = vmul.f32 0.01, %v3911_v58 }
 0x6ae   :  { %5037 = vmatmul.mubr.bf16.gmra.mxu0 %v4450_v22  ;;  %v4195_v31 = vmax.f32 %v3891_v27, %v4043_v7  ;;  %v10432_v27 = vld [vmem:[#allocation81_spill] sm:$0xff]  ;;  %v4207_v22 = vmax.f32 %v3903_v21, %v4055_v11  ;;  %v4263_v7 = vmax.f32 %v3959_v49, %v4111_v46  ;;  %v4458_v51 = vpack.c.bf16 %v4198_v53, %v4194_v37  ;;  %v10439_v49 = vld [vmem:[#allocation140_spill] sm:$0xff]  ;;  %v10442_v46 = vld [vmem:[#allocation95_spill] sm:$0xff] }
 0x6af   :  { %5044 = vmatprep.mubr.bf16.mxu0 %v4455_v57  ;;  %v4256_v32 = vmax.f32 %v3952_v20, %v4104_v48  ;;  %v3898_v54 = vmul.f32 %v8956_v3, %v10432_v27  ;;  %v10434_v20 = vld [vmem:[#allocation138_spill] sm:$0xff]  ;;  %v4110_v57 = vmul.f32 0.01, %v3958_v4  ;;  %v3954_v48 = vmul.f32 %v8956_v3, %v10436_v42 }
 0x6b0   :  { %v4459_v12 = vpack.c.bf16 %v4199_v1, %v4195_v31  ;;  %v3907_v45 = vmul.f32 %v8950_v0, %v10434_v20  ;;  %v4463_v25 = vpack.c.bf16 %v4207_v22, %v4203_v23  ;;  %v4415_v5 = vmul.f32 %v10245_v8, %v4263_v7  ;;  %v10446_v22 = vld [vmem:[#allocation101_spill] sm:$0xff] }
 0x6b1   :  { %v4488_v47 = vpack.c.bf16 %v4412_v34, %v4256_v32  ;;  %v4050_v59 = vmul.f32 0.01, %v3898_v54  ;;  %v4262_v9 = vmax.f32 %v3958_v4, %v4110_v57  ;;  %v4486_v1 = vpack.c.bf16 %v4254_v24, %v4250_v52  ;;  %v10448_v52 = vld [vmem:[#allocation145_spill] sm:$0xff] }
 0x6b2   :  { %v4059_v41 = vmul.f32 0.01, %v3907_v45  ;;  %v4215_v44 = vmax.f32 %v3911_v58, %v4063_v35  ;;  %v4106_v40 = vmul.f32 0.01, %v3954_v48  ;;  %v4214_v27 = vmax.f32 %v3910_v15, %v4062_v19  ;;  %v10445_v58 = vld [vmem:[#allocation98_spill] sm:$0xff] }
 0x6b3   :  { %v4202_v6 = vmax.f32 %v3898_v54, %v4050_v59  ;;  %v4414_v34 = vmul.f32 %v10245_v8, %v4262_v9  ;;  %v10443_v8 = vld [vmem:[#allocation142_spill] sm:$0xff]  ;;  %v3922_v23 = vmul.f32 %v8956_v3, %v10445_v58  ;;  %v3926_v7 = vmul.f32 %v8956_v3, %v10446_v22  ;;  %v10447_v59 = vld [vmem:[#allocation144_spill] sm:$0xff] }
 0x6b4   :  { %4916 = vmatmul.mubr.bf16.gmra.mxu1 %v4480_v16  ;;  %v4251_v16 = vmax.f32 %v3947_v63, %v4099_v13  ;;  %v4054_v63 = vmul.f32 0.01, %v3902_v36  ;;  %v3915_v13 = vmul.f32 %v8950_v0, %v10439_v49  ;;  %v4211_v18 = vmax.f32 %v3907_v45, %v4059_v41  ;;  %v10449_v9 = vld [vmem:[#allocation104_spill] sm:$0xff] }
 0x6b5   :  { %4923 = vmatprep.mubr.bf16.mxu1 %v4485_v28  ;;  %v3955_v28 = vmul.f32 %v8950_v0, %v8852_v10  ;;  %v4258_v11 = vmax.f32 %v3954_v48, %v4106_v40  ;;  %v3923_v56 = vmul.f32 %v8950_v0, %v10443_v8  ;;  %v3935_v24 = vmul.f32 %v8950_v0, %v10448_v52 }
 0x6b6   :  { %5045 = vmatmul.mubr.bf16.gmra.mxu0 %v4454_v33  ;;  %v4487_v39 = vpack.c.bf16 %v4255_v14, %v4251_v16  ;;  %v4206_v21 = vmax.f32 %v3902_v36, %v4054_v63  ;;  %v4067_v30 = vmul.f32 0.01, %v3915_v13  ;;  %v4467_v2 = vpack.c.bf16 %v4215_v44, %v4211_v18  ;;  %v10444_v36 = vld [vmem:[#allocation143_spill] sm:$0xff] }
 0x6b7   :  { %5052 = vmatprep.mubr.bf16.mxu0 %v4459_v12  ;;  %v4107_v10 = vmul.f32 0.01, %v3955_v28  ;;  %v10441_v12 = vld [vmem:[#allocation93_spill] sm:$0xff]  ;;  %v3918_v16 = vmul.f32 %v8956_v3, %v10442_v46  ;;  %v4490_v54 = vpack.c.bf16 %v4414_v34, %v4258_v11  ;;  %v3927_v62 = vmul.f32 %v8950_v0, %v10444_v36 }
 0x6b8   :  { %v4462_v33 = vpack.c.bf16 %v4206_v21, %v4202_v6  ;;  %v3914_v32 = vmul.f32 %v8956_v3, %v10441_v12  ;;  %v4219_v29 = vmax.f32 %v3915_v13, %v4067_v30  ;;  %v4075_v20 = vmul.f32 0.01, %v3923_v56  ;;  %v10451_v21 = vld [vmem:[#allocation39_spill] sm:$0xff] }
 0x6b9   :  { %v4259_v31 = vmax.f32 %v3955_v28, %v4107_v10  ;;  %v4070_v53 = vmul.f32 0.01, %v3918_v16  ;;  %v4079_v45 = vmul.f32 0.01, %v3927_v62  ;;  %v3931_v63 = vmul.f32 %v8950_v0, %v10447_v59 }
 0x6ba   :  { %v4066_v37 = vmul.f32 0.01, %v3914_v32  ;;  %v4227_v10 = vmax.f32 %v3923_v56, %v4075_v20  ;;  %v4074_v41 = vmul.f32 0.01, %v3922_v23  ;;  %v4078_v35 = vmul.f32 0.01, %v3926_v7 }
 0x6bb   :  { %v4491_v60 = vpack.c.bf16 %v4415_v5, %v4259_v31  ;;  %v4222_v57 = vmax.f32 %v3918_v16, %v4070_v53  ;;  %v4083_v42 = vmul.f32 0.01, %v3931_v63  ;;  %v4087_v48 = vmul.f32 0.01, %v3935_v24 }
 0x6bc   :  { %4924 = vmatmul.mubr.bf16.gmra.mxu1 %v4484_v17  ;;  %v3906_v17 = vmul.f32 %v8956_v3, %v10437_v38  ;;  %v3930_v38 = vmul.f32 %v8956_v3, %v10449_v9  ;;  %v4226_v15 = vmax.f32 %v3922_v23, %v4074_v41  ;;  %v4230_v6 = vmax.f32 %v3926_v7, %v4078_v35  ;;  %v9228_v9 = vld [vmem:[%s9451_s5] ss:$0 sm:$0xff] }
 0x6bd   :  { %4931 = vmatprep.mubr.bf16.mxu1 %v4489_v61  ;;  %v3919_v61 = vmul.f32 %v8950_v0, %v10440_v50  ;;  %v3939_v31 = vmul.f32 %v8950_v0, %v10451_v21  ;;  %v4235_v13 = vmax.f32 %v3931_v63, %v4083_v42  ;;  %v4239_v50 = vmax.f32 %v3935_v24, %v4087_v48 }
 0x6be   :  { %5053 = vmatmul.mubr.bf16.gmra.mxu0 %v4458_v51  ;;  %v4058_v26 = vmul.f32 0.01, %v3906_v17  ;;  %v4231_v51 = vmax.f32 %v3927_v62, %v4079_v45  ;;  %v4474_v44 = vpack.c.bf16 %v4230_v6, %v4226_v15 }
 0x6bf   :  { %5060 = vmatprep.mubr.bf16.mxu0 %v4463_v25  ;;  %v4071_v4 = vmul.f32 0.01, %v3919_v61  ;;  %v4091_v40 = vmul.f32 0.01, %v3939_v31  ;;  %v4479_v34 = vpack.c.bf16 %v4239_v50, %v4235_v13 }
 0x6c0   :  { %v4210_v14 = vmax.f32 %v3906_v17, %v4058_v26  ;;  %v4475_v5 = vpack.c.bf16 %v4231_v51, %v4227_v10  ;;  %v10450_v17 = vld [vmem:[#allocation107_spill] sm:$0xff]  ;;  %v10453_v26 = vld [vmem:[#allocation110_spill] sm:$0xff] }
 0x6c1   :  { %v4223_v28 = vmax.f32 %v3919_v61, %v4071_v4  ;;  %v3934_v43 = vmul.f32 %v8956_v3, %v10450_v17  ;;  %v4082_v61 = vmul.f32 0.01, %v3930_v38  ;;  %v3938_v19 = vmul.f32 %v8956_v3, %v10453_v26 }
 0x6c2   :  { %v4243_v11 = vmax.f32 %v3939_v31, %v4091_v40 }
 0x6c3   :  { %v4471_v55 = vpack.c.bf16 %v4223_v28, %v4219_v29  ;;  %v4086_v18 = vmul.f32 0.01, %v3934_v43  ;;  %v4234_v4 = vmax.f32 %v3930_v38, %v4082_v61  ;;  %v4090_v12 = vmul.f32 0.01, %v3938_v19 }
 0x6c4   :  { %4932 = vmatmul.mubr.bf16.gmra.mxu1 %v4488_v47  ;;  %v4466_v47 = vpack.c.bf16 %v4214_v27, %v4210_v14 }
 0x6c5   :  { %5108 = vmatprep.mubr.bf16.mxu1 %v4487_v39  ;;  %v4218_v39 = vmax.f32 %v3914_v32, %v4066_v37  ;;  %v4242_v14 = vmax.f32 %v3938_v19, %v4090_v12 }
 0x6c6   :  { %5061 = vmatmul.mubr.bf16.gmra.mxu0 %v4462_v33  ;;  %v10454_v33 = vld [vmem:[#allocation12_spill] sm:$0xff] }
 0x6c7   :  { %5068 = vmatprep.mubr.bf16.mxu0 %v4467_v2  ;;  %v4470_v25 = vpack.c.bf16 %v4222_v57, %v4218_v39  ;;  %v3942_v30 = vmul.f32 %v8956_v3, %v10454_v33  ;;  %v4238_v2 = vmax.f32 %v3934_v43, %v4086_v18 }
 0x6c9   :  { %v4094_v32 = vmul.f32 0.01, %v3942_v30  ;;  %v4478_v46 = vpack.c.bf16 %v4238_v2, %v4234_v4 }
 0x6cb   :  { %v4246_v27 = vmax.f32 %v3942_v30, %v4094_v32 }
 0x6cc   :  { %5109 = vmatmul.mubr.bf16.vlgmr.msra.gmra.mxu1 %v4486_v1  ;;  %v10452_v1 = vld [vmem:[#allocation20_spill] sm:$0xff] }
 0x6cd   :  { %5116 = vmatprep.mubr.bf16.mxu1 %v4491_v60  ;;  %v3943_v49 = vmul.f32 %v8950_v0, %v10452_v1  ;;  %v4482_v8 = vpack.c.bf16 %v4246_v27, %v4242_v14 }
 0x6ce   :  { %5069 = vmatmul.mubr.bf16.gmra.mxu0 %v4466_v47 }
 0x6cf   :  { %5076 = vmatprep.mubr.bf16.mxu0 %v4471_v55  ;;  %v4095_v60 = vmul.f32 0.01, %v3943_v49 }
 0x6d1   :  { %v4247_v0 = vmax.f32 %v3943_v49, %v4095_v60 }
 0x6d3   :  { %v4483_v16 = vpack.c.bf16 %v4247_v0, %v4243_v11 }
 0x6d4   :  { %5117 = vmatmul.mubr.bf16.gmra.mxu1 %v4490_v54 }
 0x6d6   :  { %5077 = vmatmul.mubr.bf16.gmra.mxu0 %v4470_v25 }
 0x6d7   :  { %5084 = vmatprep.mubr.bf16.mxu0 %v4475_v5 }
 0x6de   :  { %5085 = vmatmul.mubr.bf16.gmra.mxu0 %v4474_v44 }
 0x6df   :  { %5092 = vmatprep.mubr.bf16.mxu0 %v4479_v34 }
 0x6e6   :  { %5093 = vmatmul.mubr.bf16.gmra.mxu0 %v4478_v46 }
 0x6e7   :  { %5100 = vmatprep.mubr.bf16.mxu0 %v4483_v16 }
 0x6ee   :  { %5101 = vmatmul.mubr.bf16.gmra.mxu0 %v4482_v8 }
 0x6f4   :  { %v4789_v54 = vpop.f32.mrf.mxu1 }
 0x6f5   :  { %v4790_v17 = vadd.f32 %v9228_v9, %v4789_v54 }
 0x6f6   :  { %v4791_v56 = vpop.f32.mrf.mxu1 }
 0x6f8   :  { %v4792_v36 = vpop.f32.mrf.mxu1 }
 0x6f9   :  { %v4793_v31 = vadd.f32 %v9228_v9, %v4792_v36 }
 0x6fa   :  { %v4794_v62 = vpop.f32.mrf.mxu1 }
 0x6fc   :  { %v4797_v29 = vpop.f32.mrf.mxu1 }
 0x6fd   :  { %v4798_v18 = vadd.f32 %v9228_v9, %v4797_v29 }
 0x6fe   :  { %v4799_v3 = vpop.f32.mrf.mxu1 }
 0x700   :  { %v4800_v28 = vpop.f32.mrf.mxu1 }
 0x701   :  { %v4801_v19 = vadd.f32 %v9228_v9, %v4800_v28 }
 0x702   :  { %v4802_v37 = vpop.f32.mrf.mxu1 }
 0x704   :  { %v4805_v53 = vpop.f32.mrf.mxu1 }
 0x705   :  { %v4806_v0 = vadd.f32 %v9228_v9, %v4805_v53 }
 0x706   :  { %v4807_v47 = vpop.f32.mrf.mxu1 }
 0x708   :  { %v4808_v20 = vpop.f32.mrf.mxu1 }
 0x709   :  { %v4809_v27 = vadd.f32 %v9228_v9, %v4808_v20 }
 0x70a   :  { %v4810_v45 = vpop.f32.mrf.mxu1 }
 0x70c   :  { %v9205_v55 = vpop.f32.mrf.mxu1 }
 0x70d   :  { %v4814_v29 = vadd.f32 %v9228_v9, %v9205_v55 }
 0x70e   :  { %v4815_v58 = vpop.f32.mrf.mxu1 }
 0x710   :  { %v9207_v23 = vpop.f32.mrf.mxu1 }
 0x711   :  { %v4817_v20 = vadd.f32 %v9228_v9, %v9207_v23 }
 0x712   :  { %v4818_v22 = vpop.f32.mrf.mxu1 }
 0x714   :  { %v9209_v7 = vpop.f32.mrf.mxu1 }
 0x716   :  { %v4823_v39 = vpop.f32.mrf.mxu1 }
 0x718   :  { %v9211_v57 = vpop.f32.mrf.mxu1 }
 0x71a   :  { %v4826_v59 = vpop.f32.mrf.mxu1 }
 0x71b   :  { %v4822_v59 = vadd.f32 %v9228_v9, %v9209_v7 }
 0x71c   :  { %v9213_v63 = vpop.f32.mrf.mxu1 }
 0x71e   :  { %v4831_v52 = vpop.f32.mrf.mxu1 }
 0x720   :  { %v9215_v24 = vpop.f32.mrf.mxu1 }
 0x722   :  { %v4834_v10 = vpop.f32.mrf.mxu1 }
 0x724   :  { %v9217_v51 = vpop.f32.mrf.mxu1 }
 0x726   :  { %v4839_v41 = vpop.f32.mrf.mxu1 }
 0x728   :  { %v9219_v35 = vpop.f32.mrf.mxu1 }
 0x72a   :  { %v4842_v25 = vpop.f32.mrf.mxu1 }
 0x72c   :  { %v9221_v42 = vpop.f32.mrf.mxu1 }
 0x72e   :  { %v4847_v48 = vpop.f32.mrf.mxu1  ;;  %v4974_v6 = vpop.f32.mrf.mxu0 }
 0x72f   :  { %v4975_v21 = vadd.f32 %v4974_v6, %v4790_v17  ;;  %v4825_v48 = vadd.f32 %v9228_v9, %v9211_v57 }
 0x730   :  { %v9223_v5 = vpop.f32.mrf.mxu1  ;;  %v4976_v49 = vpop.f32.mrf.mxu0 }
 0x731   :  { %5125 = vst [vmem:[%s9452_s6] sm:$0xff] %v4975_v21  ;;  %v4830_v21 = vadd.f32 %v9228_v9, %v9213_v63 }
 0x732   :  { %v4850_v38 = vpop.f32.mrf.mxu1  ;;  %v4977_v50 = vpop.f32.mrf.mxu0 }
 0x733   :  { %v4978_v61 = vadd.f32 %v4977_v50, %v4793_v31 }
 0x734   :  { %v9231_v43 = vpop.f32.mrf.mxu1  ;;  %v4979_v40 = vpop.f32.mrf.mxu0 }
 0x735   :  { %5126 = vst [vmem:[%s9452_s6 + $0x8] sm:$0xff] %v4978_v61  ;;  %v4833_v61 = vadd.f32 %v9228_v9, %v9215_v24 }
 0x736   :  { %v4855_v15 = vpop.f32.mrf.mxu1  ;;  %v4982_v34 = vpop.f32.mrf.mxu0 }
 0x737   :  { %v4983_v26 = vadd.f32 %v4982_v34, %v4798_v18 }
 0x738   :  { %v9234_v1 = vpop.f32.mrf.mxu1  ;;  %v4984_v30 = vpop.f32.mrf.mxu0 }
 0x739   :  { %5127 = vst [vmem:[%s9452_s6 + $0x10] sm:$0xff] %v4983_v26  ;;  %v4838_v26 = vadd.f32 %v9228_v9, %v9217_v51 }
 0x73a   :  { %v4858_v13 = vpop.f32.mrf.mxu1  ;;  %v4985_v2 = vpop.f32.mrf.mxu0 }
 0x73b   :  { %v4986_v11 = vadd.f32 %v4985_v2, %v4801_v19 }
 0x73c   :  { %v9240_v44 = vpop.f32.mrf.mxu1  ;;  %v4987_v32 = vpop.f32.mrf.mxu0 }
 0x73d   :  { %5128 = vst [vmem:[%s9452_s6 + $0x18] sm:$0xff] %v4986_v11  ;;  %v4841_v11 = vadd.f32 %v9228_v9, %v9219_v35 }
 0x73e   :  { %v4863_v60 = vpop.f32.mrf.mxu1  ;;  %v4990_v16 = vpop.f32.mrf.mxu0 }
 0x73f   :  { %v4991_v14 = vadd.f32 %v4990_v16, %v4806_v0 }
 0x740   :  { %v9246_v33 = vpop.f32.mrf.mxu1  ;;  %v4992_v8 = vpop.f32.mrf.mxu0 }
 0x741   :  { %5129 = vst [vmem:[%s9452_s6 + $0x20] sm:$0xff] %v4991_v14  ;;  %v4846_v14 = vadd.f32 %v9228_v9, %v9221_v42 }
 0x742   :  { %v4866_v4 = vpop.f32.mrf.mxu1  ;;  %v4993_v36 = vpop.f32.mrf.mxu0 }
 0x743   :  { %v4994_v62 = vadd.f32 %v4993_v36, %v4809_v27 }
 0x744   :  { %v9252_v12 = vpop.f32.mrf.mxu1  ;;  %v4995_v28 = vpop.f32.mrf.mxu0 }
 0x745   :  { %5130 = vst [vmem:[%s9452_s6 + $0x28] sm:$0xff] %v4994_v62  ;;  %v4849_v62 = vadd.f32 %v9228_v9, %v9223_v5 }
 0x746   :  { %v4871_v46 = vpop.f32.mrf.mxu1  ;;  %v4998_v53 = vpop.f32.mrf.mxu0 }
 0x747   :  { %v4999_v47 = vadd.f32 %v4998_v53, %v4814_v29 }
 0x748   :  { %v9258_v54 = vpop.f32.mrf.mxu1  ;;  %v5000_v58 = vpop.f32.mrf.mxu0 }
 0x749   :  { %5131 = vst [vmem:[%s9452_s6 + $0x30] sm:$0xff] %v4999_v47  ;;  %v4854_v47 = vadd.f32 %v9228_v9, %v9231_v43 }
 0x74a   :  { %v4874_v56 = vpop.f32.mrf.mxu1  ;;  %v5001_v22 = vpop.f32.mrf.mxu0 }
 0x74b   :  { %v5002_v39 = vadd.f32 %v5001_v22, %v4817_v20 }
 0x74c   :  { %v9265_v3 = vpop.f32.mrf.mxu1  ;;  %v5003_v10 = vpop.f32.mrf.mxu0 }
 0x74d   :  { %5132 = vst [vmem:[%s9452_s6 + $0x38] sm:$0xff] %v5002_v39  ;;  %v4857_v39 = vadd.f32 %v9228_v9, %v9234_v1 }
 0x74e   :  { %v4879_v37 = vpop.f32.mrf.mxu1  ;;  %v5006_v41 = vpop.f32.mrf.mxu0 }
 0x74f   :  { %v5007_v25 = vadd.f32 %v5006_v41, %v4822_v59 }
 0x750   :  { %v9272_v45 = vpop.f32.mrf.mxu1  ;;  %v5008_v17 = vpop.f32.mrf.mxu0 }
 0x751   :  { %5133 = vst [vmem:[%s9452_s6 + $0x40] sm:$0xff] %v5007_v25  ;;  %v4862_v25 = vadd.f32 %v9228_v9, %v9240_v44 }
 0x752   :  { %v4882_v55 = vpop.f32.mrf.mxu1  ;;  %v5009_v15 = vpop.f32.mrf.mxu0 }
 0x753   :  { %v5010_v6 = vadd.f32 %v5009_v15, %v4825_v48 }
 0x754   :  { %v9279_v52 = vpop.f32.mrf.mxu1  ;;  %v5011_v49 = vpop.f32.mrf.mxu0 }
 0x755   :  { %5134 = vst [vmem:[%s9452_s6 + $0x48] sm:$0xff] %v5010_v6  ;;  %v4865_v6 = vadd.f32 %v9228_v9, %v9246_v33 }
 0x756   :  { %v4887_v23 = vpop.f32.mrf.mxu1  ;;  %v5014_v13 = vpop.f32.mrf.mxu0 }
 0x757   :  { %v5015_v50 = vadd.f32 %v5014_v13, %v4830_v21 }
 0x758   :  { %v9286_v38 = vpop.f32.mrf.mxu1  ;;  %v5016_v40 = vpop.f32.mrf.mxu0 }
 0x759   :  { %5135 = vst [vmem:[%s9452_s6 + $0x50] sm:$0xff] %v5015_v50  ;;  %v4870_v50 = vadd.f32 %v9228_v9, %v9252_v12 }
 0x75a   :  { %v4890_v7 = vpop.f32.mrf.mxu1  ;;  %v5017_v60 = vpop.f32.mrf.mxu0 }
 0x75b   :  { %v5018_v34 = vadd.f32 %v5017_v60, %v4833_v61 }
 0x75c   :  { %v9293_v31 = vpop.f32.mrf.mxu1  ;;  %v5019_v30 = vpop.f32.mrf.mxu0 }
 0x75d   :  { %5136 = vst [vmem:[%s9452_s6 + $0x58] sm:$0xff] %v5018_v34  ;;  %v4873_v34 = vadd.f32 %v9228_v9, %v9258_v54 }
 0x75e   :  { %v4895_v57 = vpop.f32.mrf.mxu1  ;;  %v5022_v4 = vpop.f32.mrf.mxu0 }
 0x75f   :  { %v5023_v2 = vadd.f32 %v5022_v4, %v4838_v26 }
 0x760   :  { %v9300_v18 = vpop.f32.mrf.mxu1  ;;  %v5024_v32 = vpop.f32.mrf.mxu0 }
 0x761   :  { %5137 = vst [vmem:[%s9452_s6 + $0x60] sm:$0xff] %v5023_v2 }
 0x762   :  { %v4898_v63 = vpop.f32.mrf.mxu1  ;;  %v5025_v46 = vpop.f32.mrf.mxu0 }
 0x763   :  { %v5026_v16 = vadd.f32 %v5025_v46, %v4841_v11  ;;  %v4878_v11 = vadd.f32 %v9228_v9, %v9265_v3 }
 0x764   :  { %v9307_v19 = vpop.f32.mrf.mxu1  ;;  %v5027_v8 = vpop.f32.mrf.mxu0 }
 0x765   :  { %5138 = vst [vmem:[%s9452_s6 + $0x68] sm:$0xff] %v5026_v16 }
 0x766   :  { %v4903_v24 = vpop.f32.mrf.mxu1  ;;  %v5030_v56 = vpop.f32.mrf.mxu0 }
 0x767   :  { %v5031_v36 = vadd.f32 %v5030_v56, %v4846_v14 }
 0x768   :  { %v9314_v0 = vpop.f32.mrf.mxu1  ;;  %v5032_v28 = vpop.f32.mrf.mxu0 }
 0x769   :  { %5139 = vst [vmem:[%s9452_s6 + $0x70] sm:$0xff] %v5031_v36 }
 0x76a   :  { %v4906_v51 = vpop.f32.mrf.mxu1  ;;  %v5033_v37 = vpop.f32.mrf.mxu0 }
 0x76b   :  { %v5034_v53 = vadd.f32 %v5033_v37, %v4849_v62 }
 0x76c   :  { %v9321_v27 = vpop.f32.mrf.mxu1  ;;  %v5035_v58 = vpop.f32.mrf.mxu0 }
 0x76d   :  { %5140 = vst [vmem:[%s9452_s6 + $0x78] sm:$0xff] %v5034_v53  ;;  %v4886_v53 = vadd.f32 %v9228_v9, %v9279_v52 }
 0x76e   :  { %v4911_v35 = vpop.f32.mrf.mxu1  ;;  %v5038_v55 = vpop.f32.mrf.mxu0 }
 0x76f   :  { %v5039_v22 = vadd.f32 %v5038_v55, %v4854_v47  ;;  %v4881_v35 = vadd.f32 %v9228_v9, %v9272_v45 }
 0x770   :  { %v9328_v29 = vpop.f32.mrf.mxu1  ;;  %v5040_v10 = vpop.f32.mrf.mxu0 }
 0x771   :  { %5141 = vst [vmem:[%s9452_s6 + $0x80] sm:$0xff] %v5039_v22  ;;  %v4889_v10 = vadd.f32 %v9228_v9, %v9286_v38 }
 0x772   :  { %v4914_v42 = vpop.f32.mrf.mxu1  ;;  %v5041_v23 = vpop.f32.mrf.mxu0 }
 0x773   :  { %v5042_v41 = vadd.f32 %v5041_v23, %v4857_v39 }
 0x774   :  { %v9335_v20 = vpop.f32.mrf.mxu1  ;;  %v5043_v17 = vpop.f32.mrf.mxu0 }
 0x775   :  { %5142 = vst [vmem:[%s9452_s6 + $0x88] sm:$0xff] %v5042_v41  ;;  %v4894_v17 = vadd.f32 %v9228_v9, %v9293_v31  ;;  %v4902_v31 = vadd.f32 %v9228_v9, %v9307_v19  ;;  %v4910_v19 = vadd.f32 %v9228_v9, %v9321_v27  ;;  %v4918_v27 = vadd.f32 %v9228_v9, %v9335_v20 }
 0x776   :  { %v4919_v5 = vpop.f32.mrf.mxu1  ;;  %v5046_v7 = vpop.f32.mrf.mxu0 }
 0x777   :  { %v5047_v15 = vadd.f32 %v5046_v7, %v4862_v25 }
 0x778   :  { %v9342_v59 = vpop.f32.mrf.mxu1  ;;  %v5048_v49 = vpop.f32.mrf.mxu0 }
 0x779   :  { %5143 = vst [vmem:[%s9452_s6 + $0x90] sm:$0xff] %v5047_v15  ;;  %v4897_v15 = vadd.f32 %v9228_v9, %v9300_v18  ;;  %v4905_v18 = vadd.f32 %v9228_v9, %v9314_v0  ;;  %v4913_v0 = vadd.f32 %v9228_v9, %v9328_v29  ;;  %v4921_v29 = vadd.f32 %v9228_v9, %v9342_v59 }
 0x77a   :  { %v4922_v43 = vpop.f32.mrf.mxu1  ;;  %v5049_v44 = vpop.f32.mrf.mxu0 }
 0x77b   :  { %v5050_v13 = vadd.f32 %v5049_v44, %v4865_v6 }
 0x77c   :  { %v4925_v48 = vpop.f32.mrf.mxu1  ;;  %v5051_v40 = vpop.f32.mrf.mxu0 }
 0x77d   :  { %5144 = vst [vmem:[%s9452_s6 + $0x98] sm:$0xff] %v5050_v13  ;;  %v4926_v4 = vadd.f32 %v9228_v9, %v4925_v48 }
 0x77e   :  { %v4927_v1 = vpop.f32.mrf.mxu1  ;;  %v5054_v33 = vpop.f32.mrf.mxu0 }
 0x77f   :  { %v5055_v60 = vadd.f32 %v5054_v33, %v4870_v50 }
 0x780   :  { %v4928_v21 = vpop.f32.mrf.mxu1  ;;  %v5056_v30 = vpop.f32.mrf.mxu0 }
 0x781   :  { %5145 = vst [vmem:[%s9452_s6 + $0xa0] sm:$0xff] %v5055_v60  ;;  %v4929_v14 = vadd.f32 %v9228_v9, %v4928_v21 }
 0x782   :  { %v4930_v57 = vpop.f32.mrf.mxu1  ;;  %v5057_v12 = vpop.f32.mrf.mxu0 }
 0x783   :  { %v5058_v2 = vadd.f32 %v5057_v12, %v4873_v34 }
 0x784   :  { %v4933_v61 = vpop.f32.mrf.mxu1  ;;  %v5059_v51 = vpop.f32.mrf.mxu0 }
 0x785   :  { %5146 = vst [vmem:[%s9452_s6 + $0xa8] sm:$0xff] %v5058_v2  ;;  %v4934_v42 = vadd.f32 %v9228_v9, %v4933_v61 }
 0x786   :  { %v4935_v63 = vpop.f32.mrf.mxu1  ;;  %v5062_v16 = vpop.f32.mrf.mxu0 }
 0x787   :  { %v5063_v8 = vadd.f32 %v5062_v16, %v4878_v11 }
 0x788   :  { %v4936_v26 = vpop.f32.mrf.mxu1  ;;  %v5064_v56 = vpop.f32.mrf.mxu0 }
 0x789   :  { %5147 = vst [vmem:[%s9452_s6 + $0xb0] sm:$0xff] %v5063_v8  ;;  %v4937_v22 = vadd.f32 %v9228_v9, %v4936_v26 }
 0x78a   :  { %v4938_v24 = vpop.f32.mrf.mxu1  ;;  %v5065_v28 = vpop.f32.mrf.mxu0 }
 0x78b   :  { %v5066_v37 = vadd.f32 %v5065_v28, %v4881_v35 }
 0x78c   :  { %v5110_v32 = vpop.f32.mrf.mxu1  ;;  %v5067_v47 = vpop.f32.mrf.mxu0 }
 0x78d   :  { %v5111_v46 = vadd.f32 %v5110_v32, %v4926_v4  ;;  %5148 = vst [vmem:[%s9452_s6 + $0xb8] sm:$0xff] %v5066_v37 }
 0x78e   :  { %v5112_v54 = vpop.f32.mrf.mxu1  ;;  %v5070_v55 = vpop.f32.mrf.mxu0 }
 0x78f   :  { %5159 = vst [vmem:[%s9452_s6 + $0x110] sm:$0xff] %v5111_v46  ;;  %v5071_v39 = vadd.f32 %v5070_v55, %v4886_v53 }
 0x790   :  { %v5113_v3 = vpop.f32.mrf.mxu1  ;;  %v5072_v43 = vpop.f32.mrf.mxu0 }
 0x791   :  { %v5114_v36 = vadd.f32 %v5113_v3, %v4929_v14  ;;  %5149 = vst [vmem:[%s9452_s6 + $0xc0] sm:$0xff] %v5071_v39 }
 0x792   :  { %v5115_v62 = vpop.f32.mrf.mxu1  ;;  %v5073_v25 = vpop.f32.mrf.mxu0 }
 0x793   :  { %5160 = vst [vmem:[%s9452_s6 + $0x118] sm:$0xff] %v5114_v36  ;;  %v5074_v48 = vadd.f32 %v5073_v25, %v4889_v10 }
 0x794   :  { %v5118_v45 = vpop.f32.mrf.mxu1  ;;  %v5075_v1 = vpop.f32.mrf.mxu0 }
 0x795   :  { %v5119_v58 = vadd.f32 %v5118_v45, %v4934_v42  ;;  %5150 = vst [vmem:[%s9452_s6 + $0xc8] sm:$0xff] %v5074_v48 }
 0x796   :  { %v5120_v5 = vpop.f32.mrf.mxu1  ;;  %v5078_v38 = vpop.f32.mrf.mxu0 }
 0x797   :  { %5161 = vst [vmem:[%s9452_s6 + $0x120] sm:$0xff] %v5119_v58  ;;  %v5079_v7 = vadd.f32 %v5078_v38, %v4894_v17 }
 0x798   :  { %v5121_v52 = vpop.f32.mrf.mxu1  ;;  %v5080_v6 = vpop.f32.mrf.mxu0 }
 0x799   :  { %v5122_v23 = vadd.f32 %v5121_v52, %v4937_v22  ;;  %5151 = vst [vmem:[%s9452_s6 + $0xd0] sm:$0xff] %v5079_v7 }
 0x79a   :  { %v5123_v41 = vpop.f32.mrf.mxu1  ;;  %v5081_v21 = vpop.f32.mrf.mxu0 }
 0x79b   :  { %5162 = vst [vmem:[%s9452_s6 + $0x128] sm:$0xff] %v5122_v23  ;;  %v5082_v49 = vadd.f32 %v5081_v21, %v4897_v15 }
 0x79c   :  { %v5083_v57 = vpop.f32.mrf.mxu0 }
 0x79d   :  { %5152 = vst [vmem:[%s9452_s6 + $0xd8] sm:$0xff] %v5082_v49 }
 0x79e   :  { %v5086_v44 = vpop.f32.mrf.mxu0 }
 0x79f   :  { %v5087_v13 = vadd.f32 %v5086_v44, %v4902_v31 }
 0x7a0   :  { %v5088_v50 = vpop.f32.mrf.mxu0 }
 0x7a1   :  { %5153 = vst [vmem:[%s9452_s6 + $0xe0] sm:$0xff] %v5087_v13 }
 0x7a2   :  { %v5089_v61 = vpop.f32.mrf.mxu0 }
 0x7a3   :  { %v5090_v40 = vadd.f32 %v5089_v61, %v4905_v18 }
 0x7a4   :  { %v5091_v63 = vpop.f32.mrf.mxu0 }
 0x7a5   :  { %5154 = vst [vmem:[%s9452_s6 + $0xe8] sm:$0xff] %v5090_v40 }
 0x7a6   :  { %v5094_v33 = vpop.f32.mrf.mxu0 }
 0x7a7   :  { %v5095_v60 = vadd.f32 %v5094_v33, %v4910_v19 }
 0x7a8   :  { %v5096_v34 = vpop.f32.mrf.mxu0 }
 0x7a9   :  { %5155 = vst [vmem:[%s9452_s6 + $0xf0] sm:$0xff] %v5095_v60 }
 0x7aa   :  { %v5097_v26 = vpop.f32.mrf.mxu0 }
 0x7ab   :  { %v5098_v30 = vadd.f32 %v5097_v26, %v4913_v0 }
 0x7ac   :  { %v5099_v24 = vpop.f32.mrf.mxu0 }
 0x7ad   :  { %5156 = vst [vmem:[%s9452_s6 + $0xf8] sm:$0xff] %v5098_v30 }
 0x7ae   :  { %v5102_v12 = vpop.f32.mrf.mxu0 }
 0x7af   :  { %v5103_v4 = vadd.f32 %v5102_v12, %v4918_v27 }
 0x7b0   :  { %v5104_v2 = vpop.f32.mrf.mxu0 }
 0x7b1   :  { %5157 = vst [vmem:[%s9452_s6 + $0x100] sm:$0xff] %v5103_v4 }
 0x7b2   :  { %v5105_v11 = vpop.f32.mrf.mxu0 }
 0x7b3   :  { %v5106_v32 = vadd.f32 %v5105_v11, %v4921_v29 }
 0x7b4   :  { %v5107_v51 = vpop.f32.mrf.mxu0 }
 0x7b5   :  { %5158 = vst [vmem:[%s9452_s6 + $0x108] sm:$0xff] %v5106_v32 }

</bundles_post_ra>
